<compile_context>
chip_gen: v5e
topology: v5e:2x2
jax: 0.10.0
libtpu: 0.0.40
codegen_flags: <defaults>
</compile_context>

<pallas_src>
import functools

import jax
import jax.numpy as jnp
from jax import lax
from jax.experimental import pallas as pl
from jax.experimental.pallas import tpu as pltpu

BN_EPS = 1e-5


# ----------------------------------------------------------------------------
# Fused Stem kernel (one batch element per grid step)
# ----------------------------------------------------------------------------
def _stem_kernel(pack_output,
                 p_ref, w1_ref, b1_ref,
                 dw2_w_ref, dw2_b_ref, pw2_w_ref, pw2_b_ref,
                 dw3_w_ref, dw3_b_ref, pw3_w_ref, pw3_b_ref,
                 o_ref, s1_ref, s2_ref):
    """p_ref : (1, H1*W1, 9*Cin) bf16  im2col patches of the input (stage-1)
       w1    : (9*Cin, C1)  bf16       conv1 weight (BN scale folded)
       pw*_w : (Cin, Cout)  bf16       pointwise weights (BN scale folded)
       dw*_w : (3, 3, C)    f32        depthwise weights (BN scale folded)
       *_b   : (1, C)       f32        folded BN biases
       o_ref : (1, H3*W3//2, 2*C3) (lane-dense packed) or (1, H3*W3, C3)
       s1/s2 : padded VMEM scratch for stage-1 / stage-2 activations."""
    H1p, W1p, C1 = s1_ref.shape
    H2p, W2p, C2 = s2_ref.shape
    H1, W1 = H1p - 2, W1p - 2
    H2, W2 = H2p - 2, W2p - 2
    H3, W3 = (H2 + 1) // 2, (W2 + 1) // 2
    f32 = jnp.float32

    # ---- Stage 1: single K=9*Cin MXU matmul over wrapper-built im2col -------
    h1 = jnp.dot(p_ref[0], w1_ref[...], preferred_element_type=f32)
    h1 = jnp.maximum(h1 + b1_ref[...], 0.0)                       # (H1*W1, C1)

    # Zero only the 1-element halo borders (not the whole buffer).  Done every
    # step (cheap) so the kernel stays correct if the batch axis is split
    # across TensorCores.
    s1_ref[0:1, :, :] = jnp.zeros((1, W1p, C1), f32)
    s1_ref[H1p - 1:H1p, :, :] = jnp.zeros((1, W1p, C1), f32)
    s1_ref[:, 0:1, :] = jnp.zeros((H1p, 1, C1), f32)
    s1_ref[:, W1p - 1:W1p, :] = jnp.zeros((H1p, 1, C1), f32)
    s1_ref[1:H1 + 1, 1:W1 + 1, :] = h1.reshape(H1, W1, C1)

    # ---- Stage 2: depthwise 3x3 s2 p1 (f32 VPU) + ReLU, then 1x1 (bf16 MXU) -
    wdw2 = dw2_w_ref[...]                                          # (3,3,C1)
    acc2 = jnp.zeros((H2, W2, C1), f32)
    for dy in range(3):
        for dx in range(3):
            tap = s1_ref[pl.ds(dy, H2, stride=2), pl.ds(dx, W2, stride=2), :]
            acc2 = acc2 + tap * wdw2[dy, dx:dx + 1, :]
    h2 = jnp.maximum(acc2 + dw2_b_ref[...], 0.0)                   # (H2,W2,C1)
    p2 = jnp.dot(h2.reshape(H2 * W2, C1).astype(jnp.bfloat16), pw2_w_ref[...],
                 preferred_element_type=f32)
    h2p = jnp.maximum(p2 + pw2_b_ref[...], 0.0)                    # (H2*W2, C2)

    s2_ref[0:1, :, :] = jnp.zeros((1, W2p, C2), f32)
    s2_ref[H2p - 1:H2p, :, :] = jnp.zeros((1, W2p, C2), f32)
    s2_ref[:, 0:1, :] = jnp.zeros((H2p, 1, C2), f32)
    s2_ref[:, W2p - 1:W2p, :] = jnp.zeros((H2p, 1, C2), f32)
    s2_ref[1:H2 + 1, 1:W2 + 1, :] = h2p.reshape(H2, W2, C2)

    # ---- Stage 3: depthwise 3x3 s2 p1 + ReLU, then 1x1 + ReLU ---------------
    wdw3 = dw3_w_ref[...]                                          # (3,3,C2)
    acc3 = jnp.zeros((H3, W3, C2), f32)
    for dy in range(3):
        for dx in range(3):
            tap = s2_ref[pl.ds(dy, H3, stride=2), pl.ds(dx, W3, stride=2), :]
            acc3 = acc3 + tap * wdw3[dy, dx:dx + 1, :]
    h3 = jnp.maximum(acc3 + dw3_b_ref[...], 0.0)                   # (H3,W3,C2)
    p3 = jnp.dot(h3.reshape(H3 * W3, C2).astype(jnp.bfloat16), pw3_w_ref[...],
                 preferred_element_type=f32)
    y = jnp.maximum(p3 + pw3_b_ref[...], 0.0)                      # (H3*W3, C3)

    if pack_output:
        # Lane-dense writeback: pack the two row-halves along lanes so the
        # store is a full 128-lane vst rather than masked 64-lane stores.
        half = (H3 * W3) // 2
        o_ref[0] = jnp.concatenate([y[:half, :], y[half:, :]], axis=-1)
    else:
        o_ref[0] = y


# ----------------------------------------------------------------------------
# Wrapper (NCHW in / NCHW out, matching the PyTorch module)
# ----------------------------------------------------------------------------
def stem_forward(x_nchw, kp):
    x = jnp.transpose(x_nchw, (0, 2, 3, 1))                        # -> NHWC
    N, H, W, Cin = x.shape
    C1 = kp["w1"].shape[1]
    C2 = kp["pw2_w"].shape[1]
    C3 = kp["pw3_w"].shape[1]
    H1, W1 = (H - 3) // 2 + 1, (W - 3) // 2 + 1        # conv1: k3 s2 p0
    H2, W2 = (H1 + 1) // 2, (W1 + 1) // 2              # dws2 : k3 s2 p1
    H3, W3 = (H2 + 1) // 2, (W2 + 1) // 2              # dws3 : k3 s2 p1

    # Stage-1 im2col in the wrapper: 9 stride-2 taps -> (N, H1*W1, 9*Cin).
    # bf16 keeps the stage-1 HBM read narrow and feeds the MXU natively.
    taps = [x[:, dy:dy + 2 * H1 - 1:2, dx:dx + 2 * W1 - 1:2, :]
            for dy in range(3) for dx in range(3)]
    patches = jnp.concatenate(taps, axis=-1).reshape(N, H1 * W1, 9 * Cin)
    patches = patches.astype(jnp.bfloat16)

    rows = H3 * W3
    pack = (2 * C3 == 128) and (rows % 2 == 0)
    if pack:
        out_shape = jax.ShapeDtypeStruct((N, rows // 2, 2 * C3), jnp.float32)
        out_spec = pl.BlockSpec((1, rows // 2, 2 * C3), lambda n: (n, 0, 0))
    else:
        out_shape = jax.ShapeDtypeStruct((N, rows, C3), jnp.float32)
        out_spec = pl.BlockSpec((1, rows, C3), lambda n: (n, 0, 0))

    def full_spec(a):
        nd = a.ndim
        return pl.BlockSpec(a.shape, lambda n, _nd=nd: (0,) * _nd)

    params = (kp["w1"], kp["b1"],
              kp["dw2_w"], kp["dw2_b"], kp["pw2_w"], kp["pw2_b"],
              kp["dw3_w"], kp["dw3_b"], kp["pw3_w"], kp["pw3_b"])

    out = pl.pallas_call(
        functools.partial(_stem_kernel, pack),
        out_shape=out_shape,
        grid=(N,),
        in_specs=[pl.BlockSpec((1, H1 * W1, 9 * Cin), lambda n: (n, 0, 0))]
                 + [full_spec(p) for p in params],
        out_specs=out_spec,
        scratch_shapes=[pltpu.VMEM((H1 + 2, W1 + 2, C1), jnp.float32),
                        pltpu.VMEM((H2 + 2, W2 + 2, C2), jnp.float32)],
        compiler_params=pltpu.CompilerParams(
            dimension_semantics=("parallel",),
            vmem_limit_bytes=32 * 1024 * 1024),
    )(patches, *params)

    if pack:
        out = jnp.concatenate([out[..., :C3], out[..., C3:]], axis=1)
    out = out.reshape(N, H3, W3, C3)
    return jnp.transpose(out, (0, 3, 1, 2))                        # -> NCHW


# ----------------------------------------------------------------------------
# Deterministic parameter construction (PyTorch shapes -> kernel layout)
# ----------------------------------------------------------------------------
class _KeyGen:
    def __init__(self, key):
        self._key = key

    def __call__(self):
        self._key, k = jax.random.split(self._key)
        return k


def init_params(key, in_channels=3, channels=(32, 48, 64)):
    C1, C2, C3 = channels
    kg = _KeyGen(key)

    def conv_w(shape):
        fan_in = shape[1] * shape[2] * shape[3]
        return jax.random.normal(kg(), shape, jnp.float32) / jnp.sqrt(fan_in)

    def bn(c):
        return dict(gamma=1.0 + 0.1 * jax.random.normal(kg(), (c,), jnp.float32),
                    beta=0.1 * jax.random.normal(kg(), (c,), jnp.float32),
                    mean=0.1 * jax.random.normal(kg(), (c,), jnp.float32),
                    var=0.5 + jax.random.uniform(kg(), (c,), jnp.float32))

    raw = dict(
        conv1_w=conv_w((C1, in_channels, 3, 3)), bn1=bn(C1),
        dw2_w=conv_w((C1, 1, 3, 3)), bn_dw2=bn(C1),
        pw2_w=conv_w((C2, C1, 1, 1)), bn_pw2=bn(C2),
        dw3_w=conv_w((C2, 1, 3, 3)), bn_dw3=bn(C2),
        pw3_w=conv_w((C3, C2, 1, 1)), bn_pw3=bn(C3),
    )

    def fold(p):
        s = p["gamma"] / jnp.sqrt(p["var"] + BN_EPS)
        return s, p["beta"] - p["mean"] * s

    s1, b1 = fold(raw["bn1"])
    sd2, bd2 = fold(raw["bn_dw2"])
    sp2, bp2 = fold(raw["bn_pw2"])
    sd3, bd3 = fold(raw["bn_dw3"])
    sp3, bp3 = fold(raw["bn_pw3"])

    bf16 = jnp.bfloat16
    kp = dict(
        # conv1 (C1,Cin,3,3) -> (3,3,Cin,C1) -> (9*Cin, C1), BN scale folded.
        w1=(jnp.transpose(raw["conv1_w"], (2, 3, 1, 0))
            .reshape(9 * in_channels, C1) * s1).astype(bf16),
        b1=b1.reshape(1, C1),
        # Depthwise weights stay f32 (VPU path; no bf16 VALU on v5e).
        dw2_w=jnp.transpose(raw["dw2_w"].reshape(C1, 3, 3), (1, 2, 0)) * sd2,
        dw2_b=bd2.reshape(1, C1),
        pw2_w=(raw["pw2_w"].reshape(C2, C1).T * sp2).astype(bf16),
        pw2_b=bp2.reshape(1, C2),
        dw3_w=jnp.transpose(raw["dw3_w"].reshape(C2, 3, 3), (1, 2, 0)) * sd3,
        dw3_b=bd3.reshape(1, C2),
        pw3_w=(raw["pw3_w"].reshape(C3, C2).T * sp3).astype(bf16),
        pw3_b=bp3.reshape(1, C3),
    )
    return raw, kp


# ----------------------------------------------------------------------------
# Pure-JAX reference (mirrors PyTorch NCHW convolutions) for validation
# ----------------------------------------------------------------------------
def ref_forward(x, raw):
    def conv(y, w, stride, pad, groups=1):
        return lax.conv_general_dilated(
            y, w, (stride, stride), ((pad, pad), (pad, pad)),
            feature_group_count=groups,
            dimension_numbers=("NCHW", "OIHW", "NCHW"))

    def bn(y, p):
        r = lambda a: a.reshape(1, -1, 1, 1)
        return (r(p["gamma"]) * (y - r(p["mean"]))
                / jnp.sqrt(r(p["var"]) + BN_EPS) + r(p["beta"]))

    y = jnp.maximum(bn(conv(x, raw["conv1_w"], 2, 0), raw["bn1"]), 0.0)
    y = jnp.maximum(bn(conv(y, raw["dw2_w"], 2, 1, groups=y.shape[1]), raw["bn_dw2"]), 0.0)
    y = jnp.maximum(bn(conv(y, raw["pw2_w"], 1, 0), raw["bn_pw2"]), 0.0)
    y = jnp.maximum(bn(conv(y, raw["dw3_w"], 2, 1, groups=y.shape[1]), raw["bn_dw3"]), 0.0)
    y = jnp.maximum(bn(conv(y, raw["pw3_w"], 1, 0), raw["bn_pw3"]), 0.0)
    return y


# ----------------------------------------------------------------------------
if __name__ == "__main__":
    # 65 -> 32 -> 16 -> 8 spatial; keeps every per-stage reshape sublane-aligned.
    N, CIN, H, W = 2, 3, 65, 65
    CHANNELS = (32, 48, 64)

    key = jax.random.PRNGKey(0)
    k_x, k_p = jax.random.split(key)
    x = jax.random.normal(k_x, (N, CIN, H, W), jnp.float32)
    raw_params, kernel_params = init_params(k_p, CIN, CHANNELS)

    out = jax.block_until_ready(stem_forward(x, kernel_params))
    assert out.shape == (N, CHANNELS[2], 8, 8), out.shape

    ref = jax.block_until_ready(ref_forward(x, raw_params))
    # Tolerance covers the bf16 MXU operands (f32 accumulation) in the kernel.
    max_err = float(jnp.max(jnp.abs(out - ref)))
    assert jnp.allclose(out, ref, atol=5e-2, rtol=5e-2), max_err

    print("KERNEL_OK")
</pallas_src>

<mosaic_0001>
module attributes {stable_mosaic.version = 11 : i64} {
  func.func @_stem_kernel(%arg0: i32, %arg1: memref<1x1024x27xbf16, #tpu.memory_space<vmem>>, %arg2: memref<27x32xbf16, #tpu.memory_space<vmem>>, %arg3: memref<1x32xf32, #tpu.memory_space<vmem>>, %arg4: memref<3x3x32xf32, #tpu.memory_space<vmem>>, %arg5: memref<1x32xf32, #tpu.memory_space<vmem>>, %arg6: memref<32x48xbf16, #tpu.memory_space<vmem>>, %arg7: memref<1x48xf32, #tpu.memory_space<vmem>>, %arg8: memref<3x3x48xf32, #tpu.memory_space<vmem>>, %arg9: memref<1x48xf32, #tpu.memory_space<vmem>>, %arg10: memref<48x64xbf16, #tpu.memory_space<vmem>>, %arg11: memref<1x64xf32, #tpu.memory_space<vmem>>, %arg12: memref<1x32x128xf32, #tpu.memory_space<vmem>>, %arg13: memref<34x34x32xf32, #tpu.memory_space<vmem>>, %arg14: memref<18x18x48xf32, #tpu.memory_space<vmem>>) attributes {dimension_semantics = [#tpu.dimension_semantics<parallel>], iteration_bounds = array<i64: 2>, scalar_prefetch = 0 : i64, scratch_operands = 2 : i64, tpu.core_type = #tpu.core_type<tc>, window_params = [{transform_indices = @transform_0, window_bounds = array<i64: 1, 1024, 27>}, {pipeline_mode = #tpu.pipeline_mode<synchronous>, transform_indices = @transform_1, window_bounds = array<i64: 27, 32>}, {pipeline_mode = #tpu.pipeline_mode<synchronous>, transform_indices = @transform_2, window_bounds = array<i64: 1, 32>}, {pipeline_mode = #tpu.pipeline_mode<synchronous>, transform_indices = @transform_3, window_bounds = array<i64: 3, 3, 32>}, {pipeline_mode = #tpu.pipeline_mode<synchronous>, transform_indices = @transform_4, window_bounds = array<i64: 1, 32>}, {pipeline_mode = #tpu.pipeline_mode<synchronous>, transform_indices = @transform_5, window_bounds = array<i64: 32, 48>}, {pipeline_mode = #tpu.pipeline_mode<synchronous>, transform_indices = @transform_6, window_bounds = array<i64: 1, 48>}, {pipeline_mode = #tpu.pipeline_mode<synchronous>, transform_indices = @transform_7, window_bounds = array<i64: 3, 3, 48>}, {pipeline_mode = #tpu.pipeline_mode<synchronous>, transform_indices = @transform_8, window_bounds = array<i64: 1, 48>}, {pipeline_mode = #tpu.pipeline_mode<synchronous>, transform_indices = @transform_9, window_bounds = array<i64: 48, 64>}, {pipeline_mode = #tpu.pipeline_mode<synchronous>, transform_indices = @transform_10, window_bounds = array<i64: 1, 64>}, {transform_indices = @transform_11, window_bounds = array<i64: 1, 32, 128>}]} {
    %c0 = arith.constant 0 : index
    %c0_0 = arith.constant 0 : index
    %c0_1 = arith.constant 0 : index
    %0 = vector.load %arg1[%c0, %c0_0, %c0_1] : memref<1x1024x27xbf16, #tpu.memory_space<vmem>>, vector<1x1024x27xbf16>
    %1 = vector.shape_cast %0 : vector<1x1024x27xbf16> to vector<1024x27xbf16>
    %c0_2 = arith.constant 0 : index
    %c0_3 = arith.constant 0 : index
    %2 = vector.load %arg2[%c0_2, %c0_3] : memref<27x32xbf16, #tpu.memory_space<vmem>>, vector<27x32xbf16>
    %cst = arith.constant dense<0.000000e+00> : vector<1024x32xf32>
    %3 = tpu.matmul %1, %2, %cst {dimension_numbers = #tpu.dot_dimension_numbers<[1], [0], [0], [1], [0, 0, 1, 1], [], []>} : vector<1024x27xbf16>, vector<27x32xbf16>, vector<1024x32xf32> -> vector<1024x32xf32>
    %c0_4 = arith.constant 0 : index
    %c0_5 = arith.constant 0 : index
    %4 = vector.load %arg3[%c0_4, %c0_5] : memref<1x32xf32, #tpu.memory_space<vmem>>, vector<1x32xf32>
    %5 = vector.broadcast %4 : vector<1x32xf32> to vector<1024x32xf32>
    %6 = arith.addf %3, %5 : vector<1024x32xf32>
    %cst_6 = arith.constant 0.000000e+00 : f32
    %7 = vector.broadcast %cst_6 : f32 to vector<1024x32xf32>
    %8 = arith.maximumf %6, %7 : vector<1024x32xf32>
    %cst_7 = arith.constant 0.000000e+00 : f32
    %9 = vector.broadcast %cst_7 : f32 to vector<1x34x32xf32>
    %c0_8 = arith.constant 0 : index
    %c0_9 = arith.constant 0 : index
    %c0_10 = arith.constant 0 : index
    %10 = vector.load %arg13[%c0_8, %c0_9, %c0_10] : memref<34x34x32xf32, #tpu.memory_space<vmem>>, vector<1x34x32xf32>
    tpu.vector_store %arg13[%c0_8, %c0_9, %c0_10], %9 {strides = array<i32>} : memref<34x34x32xf32, #tpu.memory_space<vmem>>, vector<1x34x32xf32>,
    %cst_11 = arith.constant 0.000000e+00 : f32
    %11 = vector.broadcast %cst_11 : f32 to vector<1x34x32xf32>
    %c33 = arith.constant 33 : index
    %c0_12 = arith.constant 0 : index
    %c0_13 = arith.constant 0 : index
    %12 = vector.load %arg13[%c33, %c0_12, %c0_13] : memref<34x34x32xf32, #tpu.memory_space<vmem>>, vector<1x34x32xf32>
    tpu.vector_store %arg13[%c33, %c0_12, %c0_13], %11 {strides = array<i32>} : memref<34x34x32xf32, #tpu.memory_space<vmem>>, vector<1x34x32xf32>,
    %cst_14 = arith.constant 0.000000e+00 : f32
    %13 = vector.broadcast %cst_14 : f32 to vector<34x1x32xf32>
    %c0_15 = arith.constant 0 : index
    %c0_16 = arith.constant 0 : index
    %c0_17 = arith.constant 0 : index
    %14 = vector.load %arg13[%c0_15, %c0_16, %c0_17] : memref<34x34x32xf32, #tpu.memory_space<vmem>>, vector<34x1x32xf32>
    tpu.vector_store %arg13[%c0_15, %c0_16, %c0_17], %13 {strides = array<i32>} : memref<34x34x32xf32, #tpu.memory_space<vmem>>, vector<34x1x32xf32>,
    %cst_18 = arith.constant 0.000000e+00 : f32
    %15 = vector.broadcast %cst_18 : f32 to vector<34x1x32xf32>
    %c0_19 = arith.constant 0 : index
    %c33_20 = arith.constant 33 : index
    %c0_21 = arith.constant 0 : index
    %16 = vector.load %arg13[%c0_19, %c33_20, %c0_21] : memref<34x34x32xf32, #tpu.memory_space<vmem>>, vector<34x1x32xf32>
    tpu.vector_store %arg13[%c0_19, %c33_20, %c0_21], %15 {strides = array<i32>} : memref<34x34x32xf32, #tpu.memory_space<vmem>>, vector<34x1x32xf32>,
    %17 = vector.shape_cast %8 : vector<1024x32xf32> to vector<32x32x32xf32>
    %c1 = arith.constant 1 : index
    %c1_22 = arith.constant 1 : index
    %c0_23 = arith.constant 0 : index
    %18 = vector.load %arg13[%c1, %c1_22, %c0_23] : memref<34x34x32xf32, #tpu.memory_space<vmem>>, vector<32x32x32xf32>
    tpu.vector_store %arg13[%c1, %c1_22, %c0_23], %17 {strides = array<i32>} : memref<34x34x32xf32, #tpu.memory_space<vmem>>, vector<32x32x32xf32>,
    %c0_24 = arith.constant 0 : index
    %c0_25 = arith.constant 0 : index
    %c0_26 = arith.constant 0 : index
    %19 = vector.load %arg4[%c0_24, %c0_25, %c0_26] : memref<3x3x32xf32, #tpu.memory_space<vmem>>, vector<3x3x32xf32>
    %cst_27 = arith.constant 0.000000e+00 : f32
    %20 = vector.broadcast %cst_27 : f32 to vector<16x16x32xf32>
    %c0_28 = arith.constant 0 : index
    %c0_29 = arith.constant 0 : index
    %c0_30 = arith.constant 0 : index
    %21 = tpu.strided_load %arg13[%c0_28, %c0_29, %c0_30] {strides = array<i32: 2, 2, 1>} : memref<34x34x32xf32, #tpu.memory_space<vmem>>, vector<16x16x32xf32>
    %22 = vector.extract_strided_slice %19 {offsets = [0, 0, 0], sizes = [1, 1, 32], strides = [1, 1, 1]} : vector<3x3x32xf32> to vector<1x1x32xf32>
    %23 = vector.shape_cast %22 : vector<1x1x32xf32> to vector<1x32xf32>
    %24 = vector.shape_cast %23 : vector<1x32xf32> to vector<1x1x32xf32>
    %25 = vector.broadcast %24 : vector<1x1x32xf32> to vector<16x16x32xf32>
    %26 = arith.mulf %21, %25 : vector<16x16x32xf32>
    %27 = arith.addf %20, %26 : vector<16x16x32xf32>
    %c0_31 = arith.constant 0 : index
    %c1_32 = arith.constant 1 : index
    %c0_33 = arith.constant 0 : index
    %28 = tpu.strided_load %arg13[%c0_31, %c1_32, %c0_33] {strides = array<i32: 2, 2, 1>} : memref<34x34x32xf32, #tpu.memory_space<vmem>>, vector<16x16x32xf32>
    %29 = vector.extract_strided_slice %19 {offsets = [0, 1, 0], sizes = [1, 1, 32], strides = [1, 1, 1]} : vector<3x3x32xf32> to vector<1x1x32xf32>
    %30 = vector.shape_cast %29 : vector<1x1x32xf32> to vector<1x32xf32>
    %31 = vector.shape_cast %30 : vector<1x32xf32> to vector<1x1x32xf32>
    %32 = vector.broadcast %31 : vector<1x1x32xf32> to vector<16x16x32xf32>
    %33 = arith.mulf %28, %32 : vector<16x16x32xf32>
    %34 = arith.addf %27, %33 : vector<16x16x32xf32>
    %c0_34 = arith.constant 0 : index
    %c2 = arith.constant 2 : index
    %c0_35 = arith.constant 0 : index
    %35 = tpu.strided_load %arg13[%c0_34, %c2, %c0_35] {strides = array<i32: 2, 2, 1>} : memref<34x34x32xf32, #tpu.memory_space<vmem>>, vector<16x16x32xf32>
    %36 = vector.extract_strided_slice %19 {offsets = [0, 2, 0], sizes = [1, 1, 32], strides = [1, 1, 1]} : vector<3x3x32xf32> to vector<1x1x32xf32>
    %37 = vector.shape_cast %36 : vector<1x1x32xf32> to vector<1x32xf32>
    %38 = vector.shape_cast %37 : vector<1x32xf32> to vector<1x1x32xf32>
    %39 = vector.broadcast %38 : vector<1x1x32xf32> to vector<16x16x32xf32>
    %40 = arith.mulf %35, %39 : vector<16x16x32xf32>
    %41 = arith.addf %34, %40 : vector<16x16x32xf32>
    %c1_36 = arith.constant 1 : index
    %c0_37 = arith.constant 0 : index
    %c0_38 = arith.constant 0 : index
    %42 = tpu.strided_load %arg13[%c1_36, %c0_37, %c0_38] {strides = array<i32: 2, 2, 1>} : memref<34x34x32xf32, #tpu.memory_space<vmem>>, vector<16x16x32xf32>
    %43 = vector.extract_strided_slice %19 {offsets = [1, 0, 0], sizes = [1, 1, 32], strides = [1, 1, 1]} : vector<3x3x32xf32> to vector<1x1x32xf32>
    %44 = vector.shape_cast %43 : vector<1x1x32xf32> to vector<1x32xf32>
    %45 = vector.shape_cast %44 : vector<1x32xf32> to vector<1x1x32xf32>
    %46 = vector.broadcast %45 : vector<1x1x32xf32> to vector<16x16x32xf32>
    %47 = arith.mulf %42, %46 : vector<16x16x32xf32>
    %48 = arith.addf %41, %47 : vector<16x16x32xf32>
    %c1_39 = arith.constant 1 : index
    %c1_40 = arith.constant 1 : index
    %c0_41 = arith.constant 0 : index
    %49 = tpu.strided_load %arg13[%c1_39, %c1_40, %c0_41] {strides = array<i32: 2, 2, 1>} : memref<34x34x32xf32, #tpu.memory_space<vmem>>, vector<16x16x32xf32>
    %50 = vector.extract_strided_slice %19 {offsets = [1, 1, 0], sizes = [1, 1, 32], strides = [1, 1, 1]} : vector<3x3x32xf32> to vector<1x1x32xf32>
    %51 = vector.shape_cast %50 : vector<1x1x32xf32> to vector<1x32xf32>
    %52 = vector.shape_cast %51 : vector<1x32xf32> to vector<1x1x32xf32>
    %53 = vector.broadcast %52 : vector<1x1x32xf32> to vector<16x16x32xf32>
    %54 = arith.mulf %49, %53 : vector<16x16x32xf32>
    %55 = arith.addf %48, %54 : vector<16x16x32xf32>
    %c1_42 = arith.constant 1 : index
    %c2_43 = arith.constant 2 : index
    %c0_44 = arith.constant 0 : index
    %56 = tpu.strided_load %arg13[%c1_42, %c2_43, %c0_44] {strides = array<i32: 2, 2, 1>} : memref<34x34x32xf32, #tpu.memory_space<vmem>>, vector<16x16x32xf32>
    %57 = vector.extract_strided_slice %19 {offsets = [1, 2, 0], sizes = [1, 1, 32], strides = [1, 1, 1]} : vector<3x3x32xf32> to vector<1x1x32xf32>
    %58 = vector.shape_cast %57 : vector<1x1x32xf32> to vector<1x32xf32>
    %59 = vector.shape_cast %58 : vector<1x32xf32> to vector<1x1x32xf32>
    %60 = vector.broadcast %59 : vector<1x1x32xf32> to vector<16x16x32xf32>
    %61 = arith.mulf %56, %60 : vector<16x16x32xf32>
    %62 = arith.addf %55, %61 : vector<16x16x32xf32>
    %c2_45 = arith.constant 2 : index
    %c0_46 = arith.constant 0 : index
    %c0_47 = arith.constant 0 : index
    %63 = tpu.strided_load %arg13[%c2_45, %c0_46, %c0_47] {strides = array<i32: 2, 2, 1>} : memref<34x34x32xf32, #tpu.memory_space<vmem>>, vector<16x16x32xf32>
    %64 = vector.extract_strided_slice %19 {offsets = [2, 0, 0], sizes = [1, 1, 32], strides = [1, 1, 1]} : vector<3x3x32xf32> to vector<1x1x32xf32>
    %65 = vector.shape_cast %64 : vector<1x1x32xf32> to vector<1x32xf32>
    %66 = vector.shape_cast %65 : vector<1x32xf32> to vector<1x1x32xf32>
    %67 = vector.broadcast %66 : vector<1x1x32xf32> to vector<16x16x32xf32>
    %68 = arith.mulf %63, %67 : vector<16x16x32xf32>
    %69 = arith.addf %62, %68 : vector<16x16x32xf32>
    %c2_48 = arith.constant 2 : index
    %c1_49 = arith.constant 1 : index
    %c0_50 = arith.constant 0 : index
    %70 = tpu.strided_load %arg13[%c2_48, %c1_49, %c0_50] {strides = array<i32: 2, 2, 1>} : memref<34x34x32xf32, #tpu.memory_space<vmem>>, vector<16x16x32xf32>
    %71 = vector.extract_strided_slice %19 {offsets = [2, 1, 0], sizes = [1, 1, 32], strides = [1, 1, 1]} : vector<3x3x32xf32> to vector<1x1x32xf32>
    %72 = vector.shape_cast %71 : vector<1x1x32xf32> to vector<1x32xf32>
    %73 = vector.shape_cast %72 : vector<1x32xf32> to vector<1x1x32xf32>
    %74 = vector.broadcast %73 : vector<1x1x32xf32> to vector<16x16x32xf32>
    %75 = arith.mulf %70, %74 : vector<16x16x32xf32>
    %76 = arith.addf %69, %75 : vector<16x16x32xf32>
    %c2_51 = arith.constant 2 : index
    %c2_52 = arith.constant 2 : index
    %c0_53 = arith.constant 0 : index
    %77 = tpu.strided_load %arg13[%c2_51, %c2_52, %c0_53] {strides = array<i32: 2, 2, 1>} : memref<34x34x32xf32, #tpu.memory_space<vmem>>, vector<16x16x32xf32>
    %78 = vector.extract_strided_slice %19 {offsets = [2, 2, 0], sizes = [1, 1, 32], strides = [1, 1, 1]} : vector<3x3x32xf32> to vector<1x1x32xf32>
    %79 = vector.shape_cast %78 : vector<1x1x32xf32> to vector<1x32xf32>
    %80 = vector.shape_cast %79 : vector<1x32xf32> to vector<1x1x32xf32>
    %81 = vector.broadcast %80 : vector<1x1x32xf32> to vector<16x16x32xf32>
    %82 = arith.mulf %77, %81 : vector<16x16x32xf32>
    %83 = arith.addf %76, %82 : vector<16x16x32xf32>
    %c0_54 = arith.constant 0 : index
    %c0_55 = arith.constant 0 : index
    %84 = vector.load %arg5[%c0_54, %c0_55] : memref<1x32xf32, #tpu.memory_space<vmem>>, vector<1x32xf32>
    %85 = vector.shape_cast %84 : vector<1x32xf32> to vector<1x1x32xf32>
    %86 = vector.broadcast %85 : vector<1x1x32xf32> to vector<16x16x32xf32>
    %87 = arith.addf %83, %86 : vector<16x16x32xf32>
    %cst_56 = arith.constant 0.000000e+00 : f32
    %88 = vector.broadcast %cst_56 : f32 to vector<16x16x32xf32>
    %89 = arith.maximumf %87, %88 : vector<16x16x32xf32>
    %90 = vector.shape_cast %89 : vector<16x16x32xf32> to vector<256x32xf32>
    %91 = arith.truncf %90 : vector<256x32xf32> to vector<256x32xbf16>
    %c0_57 = arith.constant 0 : index
    %c0_58 = arith.constant 0 : index
    %92 = vector.load %arg6[%c0_57, %c0_58] : memref<32x48xbf16, #tpu.memory_space<vmem>>, vector<32x48xbf16>
    %cst_59 = arith.constant dense<0.000000e+00> : vector<256x48xf32>
    %93 = tpu.matmul %91, %92, %cst_59 {dimension_numbers = #tpu.dot_dimension_numbers<[1], [0], [0], [1], [0, 0, 1, 1], [], []>} : vector<256x32xbf16>, vector<32x48xbf16>, vector<256x48xf32> -> vector<256x48xf32>
    %c0_60 = arith.constant 0 : index
    %c0_61 = arith.constant 0 : index
    %94 = vector.load %arg7[%c0_60, %c0_61] : memref<1x48xf32, #tpu.memory_space<vmem>>, vector<1x48xf32>
    %95 = vector.broadcast %94 : vector<1x48xf32> to vector<256x48xf32>
    %96 = arith.addf %93, %95 : vector<256x48xf32>
    %cst_62 = arith.constant 0.000000e+00 : f32
    %97 = vector.broadcast %cst_62 : f32 to vector<256x48xf32>
    %98 = arith.maximumf %96, %97 : vector<256x48xf32>
    %cst_63 = arith.constant 0.000000e+00 : f32
    %99 = vector.broadcast %cst_63 : f32 to vector<1x18x48xf32>
    %c0_64 = arith.constant 0 : index
    %c0_65 = arith.constant 0 : index
    %c0_66 = arith.constant 0 : index
    %100 = vector.load %arg14[%c0_64, %c0_65, %c0_66] : memref<18x18x48xf32, #tpu.memory_space<vmem>>, vector<1x18x48xf32>
    tpu.vector_store %arg14[%c0_64, %c0_65, %c0_66], %99 {strides = array<i32>} : memref<18x18x48xf32, #tpu.memory_space<vmem>>, vector<1x18x48xf32>,
    %cst_67 = arith.constant 0.000000e+00 : f32
    %101 = vector.broadcast %cst_67 : f32 to vector<1x18x48xf32>
    %c17 = arith.constant 17 : index
    %c0_68 = arith.constant 0 : index
    %c0_69 = arith.constant 0 : index
    %102 = vector.load %arg14[%c17, %c0_68, %c0_69] : memref<18x18x48xf32, #tpu.memory_space<vmem>>, vector<1x18x48xf32>
    tpu.vector_store %arg14[%c17, %c0_68, %c0_69], %101 {strides = array<i32>} : memref<18x18x48xf32, #tpu.memory_space<vmem>>, vector<1x18x48xf32>,
    %cst_70 = arith.constant 0.000000e+00 : f32
    %103 = vector.broadcast %cst_70 : f32 to vector<18x1x48xf32>
    %c0_71 = arith.constant 0 : index
    %c0_72 = arith.constant 0 : index
    %c0_73 = arith.constant 0 : index
    %104 = vector.load %arg14[%c0_71, %c0_72, %c0_73] : memref<18x18x48xf32, #tpu.memory_space<vmem>>, vector<18x1x48xf32>
    tpu.vector_store %arg14[%c0_71, %c0_72, %c0_73], %103 {strides = array<i32>} : memref<18x18x48xf32, #tpu.memory_space<vmem>>, vector<18x1x48xf32>,
    %cst_74 = arith.constant 0.000000e+00 : f32
    %105 = vector.broadcast %cst_74 : f32 to vector<18x1x48xf32>
    %c0_75 = arith.constant 0 : index
    %c17_76 = arith.constant 17 : index
    %c0_77 = arith.constant 0 : index
    %106 = vector.load %arg14[%c0_75, %c17_76, %c0_77] : memref<18x18x48xf32, #tpu.memory_space<vmem>>, vector<18x1x48xf32>
    tpu.vector_store %arg14[%c0_75, %c17_76, %c0_77], %105 {strides = array<i32>} : memref<18x18x48xf32, #tpu.memory_space<vmem>>, vector<18x1x48xf32>,
    %107 = vector.shape_cast %98 : vector<256x48xf32> to vector<16x16x48xf32>
    %c1_78 = arith.constant 1 : index
    %c1_79 = arith.constant 1 : index
    %c0_80 = arith.constant 0 : index
    %108 = vector.load %arg14[%c1_78, %c1_79, %c0_80] : memref<18x18x48xf32, #tpu.memory_space<vmem>>, vector<16x16x48xf32>
    tpu.vector_store %arg14[%c1_78, %c1_79, %c0_80], %107 {strides = array<i32>} : memref<18x18x48xf32, #tpu.memory_space<vmem>>, vector<16x16x48xf32>,
    %c0_81 = arith.constant 0 : index
    %c0_82 = arith.constant 0 : index
    %c0_83 = arith.constant 0 : index
    %109 = vector.load %arg8[%c0_81, %c0_82, %c0_83] : memref<3x3x48xf32, #tpu.memory_space<vmem>>, vector<3x3x48xf32>
    %cst_84 = arith.constant 0.000000e+00 : f32
    %110 = vector.broadcast %cst_84 : f32 to vector<8x8x48xf32>
    %c0_85 = arith.constant 0 : index
    %c0_86 = arith.constant 0 : index
    %c0_87 = arith.constant 0 : index
    %111 = tpu.strided_load %arg14[%c0_85, %c0_86, %c0_87] {strides = array<i32: 2, 2, 1>} : memref<18x18x48xf32, #tpu.memory_space<vmem>>, vector<8x8x48xf32>
    %112 = vector.extract_strided_slice %109 {offsets = [0, 0, 0], sizes = [1, 1, 48], strides = [1, 1, 1]} : vector<3x3x48xf32> to vector<1x1x48xf32>
    %113 = vector.shape_cast %112 : vector<1x1x48xf32> to vector<1x48xf32>
    %114 = vector.shape_cast %113 : vector<1x48xf32> to vector<1x1x48xf32>
    %115 = vector.broadcast %114 : vector<1x1x48xf32> to vector<8x8x48xf32>
    %116 = arith.mulf %111, %115 : vector<8x8x48xf32>
    %117 = arith.addf %110, %116 : vector<8x8x48xf32>
    %c0_88 = arith.constant 0 : index
    %c1_89 = arith.constant 1 : index
    %c0_90 = arith.constant 0 : index
    %118 = tpu.strided_load %arg14[%c0_88, %c1_89, %c0_90] {strides = array<i32: 2, 2, 1>} : memref<18x18x48xf32, #tpu.memory_space<vmem>>, vector<8x8x48xf32>
    %119 = vector.extract_strided_slice %109 {offsets = [0, 1, 0], sizes = [1, 1, 48], strides = [1, 1, 1]} : vector<3x3x48xf32> to vector<1x1x48xf32>
    %120 = vector.shape_cast %119 : vector<1x1x48xf32> to vector<1x48xf32>
    %121 = vector.shape_cast %120 : vector<1x48xf32> to vector<1x1x48xf32>
    %122 = vector.broadcast %121 : vector<1x1x48xf32> to vector<8x8x48xf32>
    %123 = arith.mulf %118, %122 : vector<8x8x48xf32>
    %124 = arith.addf %117, %123 : vector<8x8x48xf32>
    %c0_91 = arith.constant 0 : index
    %c2_92 = arith.constant 2 : index
    %c0_93 = arith.constant 0 : index
    %125 = tpu.strided_load %arg14[%c0_91, %c2_92, %c0_93] {strides = array<i32: 2, 2, 1>} : memref<18x18x48xf32, #tpu.memory_space<vmem>>, vector<8x8x48xf32>
    %126 = vector.extract_strided_slice %109 {offsets = [0, 2, 0], sizes = [1, 1, 48], strides = [1, 1, 1]} : vector<3x3x48xf32> to vector<1x1x48xf32>
    %127 = vector.shape_cast %126 : vector<1x1x48xf32> to vector<1x48xf32>
    %128 = vector.shape_cast %127 : vector<1x48xf32> to vector<1x1x48xf32>
    %129 = vector.broadcast %128 : vector<1x1x48xf32> to vector<8x8x48xf32>
    %130 = arith.mulf %125, %129 : vector<8x8x48xf32>
    %131 = arith.addf %124, %130 : vector<8x8x48xf32>
    %c1_94 = arith.constant 1 : index
    %c0_95 = arith.constant 0 : index
    %c0_96 = arith.constant 0 : index
    %132 = tpu.strided_load %arg14[%c1_94, %c0_95, %c0_96] {strides = array<i32: 2, 2, 1>} : memref<18x18x48xf32, #tpu.memory_space<vmem>>, vector<8x8x48xf32>
    %133 = vector.extract_strided_slice %109 {offsets = [1, 0, 0], sizes = [1, 1, 48], strides = [1, 1, 1]} : vector<3x3x48xf32> to vector<1x1x48xf32>
    %134 = vector.shape_cast %133 : vector<1x1x48xf32> to vector<1x48xf32>
    %135 = vector.shape_cast %134 : vector<1x48xf32> to vector<1x1x48xf32>
    %136 = vector.broadcast %135 : vector<1x1x48xf32> to vector<8x8x48xf32>
    %137 = arith.mulf %132, %136 : vector<8x8x48xf32>
    %138 = arith.addf %131, %137 : vector<8x8x48xf32>
    %c1_97 = arith.constant 1 : index
    %c1_98 = arith.constant 1 : index
    %c0_99 = arith.constant 0 : index
    %139 = tpu.strided_load %arg14[%c1_97, %c1_98, %c0_99] {strides = array<i32: 2, 2, 1>} : memref<18x18x48xf32, #tpu.memory_space<vmem>>, vector<8x8x48xf32>
    %140 = vector.extract_strided_slice %109 {offsets = [1, 1, 0], sizes = [1, 1, 48], strides = [1, 1, 1]} : vector<3x3x48xf32> to vector<1x1x48xf32>
    %141 = vector.shape_cast %140 : vector<1x1x48xf32> to vector<1x48xf32>
    %142 = vector.shape_cast %141 : vector<1x48xf32> to vector<1x1x48xf32>
    %143 = vector.broadcast %142 : vector<1x1x48xf32> to vector<8x8x48xf32>
    %144 = arith.mulf %139, %143 : vector<8x8x48xf32>
    %145 = arith.addf %138, %144 : vector<8x8x48xf32>
    %c1_100 = arith.constant 1 : index
    %c2_101 = arith.constant 2 : index
    %c0_102 = arith.constant 0 : index
    %146 = tpu.strided_load %arg14[%c1_100, %c2_101, %c0_102] {strides = array<i32: 2, 2, 1>} : memref<18x18x48xf32, #tpu.memory_space<vmem>>, vector<8x8x48xf32>
    %147 = vector.extract_strided_slice %109 {offsets = [1, 2, 0], sizes = [1, 1, 48], strides = [1, 1, 1]} : vector<3x3x48xf32> to vector<1x1x48xf32>
    %148 = vector.shape_cast %147 : vector<1x1x48xf32> to vector<1x48xf32>
    %149 = vector.shape_cast %148 : vector<1x48xf32> to vector<1x1x48xf32>
    %150 = vector.broadcast %149 : vector<1x1x48xf32> to vector<8x8x48xf32>
    %151 = arith.mulf %146, %150 : vector<8x8x48xf32>
    %152 = arith.addf %145, %151 : vector<8x8x48xf32>
    %c2_103 = arith.constant 2 : index
    %c0_104 = arith.constant 0 : index
    %c0_105 = arith.constant 0 : index
    %153 = tpu.strided_load %arg14[%c2_103, %c0_104, %c0_105] {strides = array<i32: 2, 2, 1>} : memref<18x18x48xf32, #tpu.memory_space<vmem>>, vector<8x8x48xf32>
    %154 = vector.extract_strided_slice %109 {offsets = [2, 0, 0], sizes = [1, 1, 48], strides = [1, 1, 1]} : vector<3x3x48xf32> to vector<1x1x48xf32>
    %155 = vector.shape_cast %154 : vector<1x1x48xf32> to vector<1x48xf32>
    %156 = vector.shape_cast %155 : vector<1x48xf32> to vector<1x1x48xf32>
    %157 = vector.broadcast %156 : vector<1x1x48xf32> to vector<8x8x48xf32>
    %158 = arith.mulf %153, %157 : vector<8x8x48xf32>
    %159 = arith.addf %152, %158 : vector<8x8x48xf32>
    %c2_106 = arith.constant 2 : index
    %c1_107 = arith.constant 1 : index
    %c0_108 = arith.constant 0 : index
    %160 = tpu.strided_load %arg14[%c2_106, %c1_107, %c0_108] {strides = array<i32: 2, 2, 1>} : memref<18x18x48xf32, #tpu.memory_space<vmem>>, vector<8x8x48xf32>
    %161 = vector.extract_strided_slice %109 {offsets = [2, 1, 0], sizes = [1, 1, 48], strides = [1, 1, 1]} : vector<3x3x48xf32> to vector<1x1x48xf32>
    %162 = vector.shape_cast %161 : vector<1x1x48xf32> to vector<1x48xf32>
    %163 = vector.shape_cast %162 : vector<1x48xf32> to vector<1x1x48xf32>
    %164 = vector.broadcast %163 : vector<1x1x48xf32> to vector<8x8x48xf32>
    %165 = arith.mulf %160, %164 : vector<8x8x48xf32>
    %166 = arith.addf %159, %165 : vector<8x8x48xf32>
    %c2_109 = arith.constant 2 : index
    %c2_110 = arith.constant 2 : index
    %c0_111 = arith.constant 0 : index
    %167 = tpu.strided_load %arg14[%c2_109, %c2_110, %c0_111] {strides = array<i32: 2, 2, 1>} : memref<18x18x48xf32, #tpu.memory_space<vmem>>, vector<8x8x48xf32>
    %168 = vector.extract_strided_slice %109 {offsets = [2, 2, 0], sizes = [1, 1, 48], strides = [1, 1, 1]} : vector<3x3x48xf32> to vector<1x1x48xf32>
    %169 = vector.shape_cast %168 : vector<1x1x48xf32> to vector<1x48xf32>
    %170 = vector.shape_cast %169 : vector<1x48xf32> to vector<1x1x48xf32>
    %171 = vector.broadcast %170 : vector<1x1x48xf32> to vector<8x8x48xf32>
    %172 = arith.mulf %167, %171 : vector<8x8x48xf32>
    %173 = arith.addf %166, %172 : vector<8x8x48xf32>
    %c0_112 = arith.constant 0 : index
    %c0_113 = arith.constant 0 : index
    %174 = vector.load %arg9[%c0_112, %c0_113] : memref<1x48xf32, #tpu.memory_space<vmem>>, vector<1x48xf32>
    %175 = vector.shape_cast %174 : vector<1x48xf32> to vector<1x1x48xf32>
    %176 = vector.broadcast %175 : vector<1x1x48xf32> to vector<8x8x48xf32>
    %177 = arith.addf %173, %176 : vector<8x8x48xf32>
    %cst_114 = arith.constant 0.000000e+00 : f32
    %178 = vector.broadcast %cst_114 : f32 to vector<8x8x48xf32>
    %179 = arith.maximumf %177, %178 : vector<8x8x48xf32>
    %180 = vector.shape_cast %179 : vector<8x8x48xf32> to vector<64x48xf32>
    %181 = arith.truncf %180 : vector<64x48xf32> to vector<64x48xbf16>
    %c0_115 = arith.constant 0 : index
    %c0_116 = arith.constant 0 : index
    %182 = vector.load %arg10[%c0_115, %c0_116] : memref<48x64xbf16, #tpu.memory_space<vmem>>, vector<48x64xbf16>
    %cst_117 = arith.constant dense<0.000000e+00> : vector<64x64xf32>
    %183 = tpu.matmul %181, %182, %cst_117 {dimension_numbers = #tpu.dot_dimension_numbers<[1], [0], [0], [1], [0, 0, 1, 1], [], []>} : vector<64x48xbf16>, vector<48x64xbf16>, vector<64x64xf32> -> vector<64x64xf32>
    %c0_118 = arith.constant 0 : index
    %c0_119 = arith.constant 0 : index
    %184 = vector.load %arg11[%c0_118, %c0_119] : memref<1x64xf32, #tpu.memory_space<vmem>>, vector<1x64xf32>
    %185 = vector.broadcast %184 : vector<1x64xf32> to vector<64x64xf32>
    %186 = arith.addf %183, %185 : vector<64x64xf32>
    %cst_120 = arith.constant 0.000000e+00 : f32
    %187 = vector.broadcast %cst_120 : f32 to vector<64x64xf32>
    %188 = arith.maximumf %186, %187 : vector<64x64xf32>
    %189 = vector.extract_strided_slice %188 {offsets = [0, 0], sizes = [32, 64], strides = [1, 1]} : vector<64x64xf32> to vector<32x64xf32>
    %190 = vector.extract_strided_slice %188 {offsets = [32, 0], sizes = [32, 64], strides = [1, 1]} : vector<64x64xf32> to vector<32x64xf32>
    %191 = tpu.concatenate %189, %190 in 1 : vector<32x64xf32>, vector<32x64xf32> -> vector<32x128xf32>
    %c0_121 = arith.constant 0 : index
    %c0_122 = arith.constant 0 : index
    %c0_123 = arith.constant 0 : index
    %192 = vector.load %arg12[%c0_121, %c0_122, %c0_123] : memref<1x32x128xf32, #tpu.memory_space<vmem>>, vector<1x32x128xf32>
    %193 = vector.shape_cast %192 : vector<1x32x128xf32> to vector<32x128xf32>
    %194 = vector.shape_cast %191 : vector<32x128xf32> to vector<1x32x128xf32>
    tpu.vector_store %arg12[%c0_121, %c0_122, %c0_123], %194 {strides = array<i32>} : memref<1x32x128xf32, #tpu.memory_space<vmem>>, vector<1x32x128xf32>,
    return
  }
  func.func @transform_0(%arg0: i32) -> (i32, i32, i32) {
    %c0_i32 = arith.constant 0 : i32
    %c0_i32_0 = arith.constant 0 : i32
    %c0_i32_1 = arith.constant 0 : i32
    return %arg0, %c0_i32, %c0_i32_0 : i32, i32, i32
  }
  func.func @transform_1(%arg0: i32) -> (i32, i32) {
    %c0_i32 = arith.constant 0 : i32
    %c0_i32_0 = arith.constant 0 : i32
    %c0_i32_1 = arith.constant 0 : i32
    return %c0_i32, %c0_i32_0 : i32, i32
  }
  func.func @transform_2(%arg0: i32) -> (i32, i32) {
    %c0_i32 = arith.constant 0 : i32
    %c0_i32_0 = arith.constant 0 : i32
    %c0_i32_1 = arith.constant 0 : i32
    return %c0_i32, %c0_i32_0 : i32, i32
  }
  func.func @transform_3(%arg0: i32) -> (i32, i32, i32) {
    %c0_i32 = arith.constant 0 : i32
    %c0_i32_0 = arith.constant 0 : i32
    %c0_i32_1 = arith.constant 0 : i32
    %c0_i32_2 = arith.constant 0 : i32
    return %c0_i32, %c0_i32_0, %c0_i32_1 : i32, i32, i32
  }
  func.func @transform_4(%arg0: i32) -> (i32, i32) {
    %c0_i32 = arith.constant 0 : i32
    %c0_i32_0 = arith.constant 0 : i32
    %c0_i32_1 = arith.constant 0 : i32
    return %c0_i32, %c0_i32_0 : i32, i32
  }
  func.func @transform_5(%arg0: i32) -> (i32, i32) {
    %c0_i32 = arith.constant 0 : i32
    %c0_i32_0 = arith.constant 0 : i32
    %c0_i32_1 = arith.constant 0 : i32
    return %c0_i32, %c0_i32_0 : i32, i32
  }
  func.func @transform_6(%arg0: i32) -> (i32, i32) {
    %c0_i32 = arith.constant 0 : i32
    %c0_i32_0 = arith.constant 0 : i32
    %c0_i32_1 = arith.constant 0 : i32
    return %c0_i32, %c0_i32_0 : i32, i32
  }
  func.func @transform_7(%arg0: i32) -> (i32, i32, i32) {
    %c0_i32 = arith.constant 0 : i32
    %c0_i32_0 = arith.constant 0 : i32
    %c0_i32_1 = arith.constant 0 : i32
    %c0_i32_2 = arith.constant 0 : i32
    return %c0_i32, %c0_i32_0, %c0_i32_1 : i32, i32, i32
  }
  func.func @transform_8(%arg0: i32) -> (i32, i32) {
    %c0_i32 = arith.constant 0 : i32
    %c0_i32_0 = arith.constant 0 : i32
    %c0_i32_1 = arith.constant 0 : i32
    return %c0_i32, %c0_i32_0 : i32, i32
  }
  func.func @transform_9(%arg0: i32) -> (i32, i32) {
    %c0_i32 = arith.constant 0 : i32
    %c0_i32_0 = arith.constant 0 : i32
    %c0_i32_1 = arith.constant 0 : i32
    return %c0_i32, %c0_i32_0 : i32, i32
  }
  func.func @transform_10(%arg0: i32) -> (i32, i32) {
    %c0_i32 = arith.constant 0 : i32
    %c0_i32_0 = arith.constant 0 : i32
    %c0_i32_1 = arith.constant 0 : i32
    return %c0_i32, %c0_i32_0 : i32, i32
  }
  func.func @transform_11(%arg0: i32) -> (i32, i32, i32) {
    %c0_i32 = arith.constant 0 : i32
    %c0_i32_0 = arith.constant 0 : i32
    %c0_i32_1 = arith.constant 0 : i32
    return %arg0, %c0_i32, %c0_i32_0 : i32, i32, i32
  }
}

</mosaic_0001>

<bundles_post_ra>
// kernel: tpu_custom_call.1
= control target key start
LH: loop header
LB: loop body
LE: loop exit
PB: predicated region body
PF: predicated region fallthrough
CT: control target
= control target key end

     0   :  { %s5837_s0 = inlined_call_operand.vmem [shape: bf16[2,1024,27], index: 0, kind: input, shape index: {}]   ;;  %s5838_s1 = inlined_call_operand.vmem [shape: bf16[27,32], index: 1, kind: input, shape index: {}]   ;;  %s5839_s2 = inlined_call_operand.vmem [shape: f32[1,32], index: 2, kind: input, shape index: {}]   ;;  %s5840_s3 = inlined_call_operand.vmem [shape: f32[3,3,32], index: 3, kind: input, shape index: {}]   ;;  %s5841_s4 = inlined_call_operand.vmem [shape: f32[1,32], index: 4, kind: input, shape index: {}]   ;;  %s5842_s5 = inlined_call_operand.vmem [shape: bf16[32,48], index: 5, kind: input, shape index: {}]   ;;  %s5843_s6 = inlined_call_operand.vmem [shape: f32[1,48], index: 6, kind: input, shape index: {}]   ;;  %s5844_s7 = inlined_call_operand.vmem [shape: f32[3,3,48], index: 7, kind: input, shape index: {}]   ;;  %s5845_s8 = inlined_call_operand.vmem [shape: f32[1,48], index: 8, kind: input, shape index: {}]   ;;  %s5846_s9 = inlined_call_operand.vmem [shape: bf16[48,64], index: 9, kind: input, shape index: {}]   ;;  %s5847_s10 = inlined_call_operand.vmem [shape: f32[1,64], index: 10, kind: input, shape index: {}]   ;;  %s5848_s11 = inlined_call_operand.hbm [shape: f32[2,32,128], index: 11, kind: output, shape index: {}]  }
   0x1   :  { %5849 = sst [smem:[#allocation7_spill]] %s5837_s0 }
   0x2   :  { %16 = vsyncpa [#allocation5], 0 }
   0x3   :  { %18 = vsyncpa [#allocation5 + $0x1], 0  ;;  %s4617_s17 = smov 0   ;;  %s4619_s18 = smov 0  }
   0x4   :  { %s4621_s19 = smov 0   ;;  %s4623_s20 = smov 0  }
   0x5 LB: > { %s4638_s21 = sadd.s32 4294967295, %s4550_s20   ;;  %s3973_s22 = sadd.s32 4294967294, %s4550_s20   ;;  %s4550_s20 = sphi %s4623_s20, %s5856_s20   ;;  %s4546_s19 = sphi %s4621_s19, %s5855_s19   ;;  %s4542_s18 = sphi %s4619_s18, %s5854_s18   ;;  %s4538_s17 = sphi %s4617_s17, %s5853_s17  }
   0x6   : > { %s4642_s23 = sadd.s32 1, %s4550_s20   ;;  %s267_s24 = sadd.s32 1, %s4546_s19 }
   0x7   : > { %s264_s25 = ssub.s32 %s4550_s20, %s4642_s23  ;;  %p277_p0 = scmp.ne.s32.totalorder %s4546_s19, %s4542_s18 }
   0x8   : > { %p265_p1 = scmp.eq.s32.totalorder %s264_s25, 0  ;;  %p278_p2 = scmp.eq.s32.totalorder %s4638_s21, 1 }
   0x9   : > { %p283_p3 = scmp.ne.s32.totalorder %s4542_s18, %s4538_s17  ;;  %p284_p4 = scmp.eq.s32.totalorder %s3973_s22, 1 }
   0xa   : > { %s4653_s26 = scalar_select %p265_p1, %s4546_s19, %s267_s24  }
   0xb   : > { %p4655_p5 = por %p278_p2, %p277_p0  ;;  %p4659_p6 = por %p284_p4, %p283_p3 }
   0xc   : > { %p3976_p7 = scmp.ge.s32.totalorder %s4550_s20, 1  ;;  %p340_p8 = scmp.lt.s32.totalorder %s4550_s20, 3 }
   0xe   : > { %p341_p9 = pnand %p3976_p7, %p340_p8 }
   0xf   : > { %p380_p10 = scmp.lt.s32.totalorder (!%p341_p9), %s4638_s21, 1  ;;  %s5852_s0 = sld [smem:[#allocation7_spill]] (!%p341_p9) }
  0x10   : > { %344 = sbr.rel (%p341_p9) target bundleno = 1104 (0x450), region = 64  ;;  %s4554_s24 = smov (!%p341_p9), 64  }
  0x11   : > { %s377_s25 = sand.u32 (!%p341_p9), 1, %s4542_s18   ;;  %s4425_s12 = sshll.u32 (!%p341_p9), %s4638_s21, 5 }
  0x15   : > { %v4242_v0 = vld [vmem:[%s5838_s1 + $0x8] sm:$0xf]  ;;  %v4419_v1 = vld [vmem:[%s5838_s1 + $0x8] sm:$0x30]  ;;  %vm1046_vm0 = vcmask 1044480   ;;  %vm1047_vm1 = vcmask 1045504  }
  0x16   : > { %v4243_v2 = vor.u32 %v4419_v1, %v4242_v0  ;;  %v4552_v3 = vmov 65535   ;;  %s381_s14 = scalar_select %p380_p10, %s4638_s21, 1  ;;  %v4418_v7 = vld [vmem:[%s5838_s1] sm:$0xff]  ;;  %vm853_vm2 = vcmask 220160   ;;  %vm1510_vm3 = vcmask 261120  }
  0x17   : > { %v1048_v4 = vsel %vm1046_vm0, 4294967295, %v4552_v3  ;;  %v4553_v31 = vmov 0.0   ;;  %vm1523_vm4 = vcmask 253952   ;;  %vm1515_vm5 = vcmask 254976   ;;  %v4751_v35 = vld [vmem:[%s5839_s2] ss:$0 sm:$0xff] }
  0x18   : > { %v1049_v5 = vsel %vm1047_vm1, %v1048_v4, 0  ;;  %s4353_s15 = sshll.u32 %s381_s14, 9  ;;  %1511 = vst.msk [vmem:[#allocation2] sm:$0xff] %vm1510_vm3, %v4553_v31  ;;  %vm3156_vm6 = vcmask 392192   ;;  %vm3165_vm7 = vcmask 385024   ;;  %vm3159_vm8 = vcmask 386048  }
  0x19   : > { %v1051_v6 = vand.u32 %v4243_v2, %v1049_v5  ;;  %s4679_s29 = scalar_lea.vmem %s5852_s0, %s4353_s15  ;;  %1512 = vst.msk [vmem:[#allocation2 + $0x8] sm:$0xff] %vm1510_vm3, %v4553_v31  ;;  %vm3650_vm9 = vcmask 523264   ;;  %s3671_s15 = scalar_lea.hbm %s5848_s11, %s4425_s12 }
  0x1a   : > { %v4354_v8 = vld [vmem:[%s4679_s29] sm:$0xff]  ;;  %v4380_v9 = vld [vmem:[%s4679_s29 + $0xd0] sm:$0xff]  ;;  %v4355_v10 = vld [vmem:[%s4679_s29 + $0x8] sm:$0xff]  ;;  %1513 = vst.msk [vmem:[#allocation2 + $0x10] sm:$0xff] %vm1510_vm3, %v4553_v31  ;;  %s3674_s22 = sshll.u32 %s3671_s15, 4  ;;  %s3660_s21 = scalar_lea.sflag [#allocation5], %s377_s25  ;;  %s3675_s22 = int_to_ptr.hbm [resolvable:$true] %s3674_s22 }
  0x1b   : > { %1059 = vmatpush.bf16.msra.mxu0 %v1051_v6  ;;  %4427 = vmatpush.bf16.msra.mxu2 %v1051_v6  ;;  %v4381_v11 = vld [vmem:[%s4679_s29 + $0xd8] sm:$0xff]  ;;  %v4356_v12 = vld [vmem:[%s4679_s29 + $0x10] sm:$0xff]  ;;  %v4382_v13 = vld [vmem:[%s4679_s29 + $0xe0] sm:$0xff]  ;;  %1514 = vst.msk [vmem:[#allocation2 + $0x18] sm:$0xff] %vm1510_vm3, %v4553_v31  ;;  %s4508_s14 = scalar_lea.hbm %s5848_s11, 64 }
  0x1c   : > { %4426 = vmatpush.bf16.msra.mxu1 %v1051_v6  ;;  %4428 = vmatpush.bf16.msra.mxu3 %v1051_v6  ;;  %v4375_v14 = vld [vmem:[%s4679_s29 + $0xa8] sm:$0xff]  ;;  %v4357_v15 = vld [vmem:[%s4679_s29 + $0x18] sm:$0xff]  ;;  %v4376_v18 = vld [vmem:[%s4679_s29 + $0xb0] sm:$0xff]  ;;  %1524 = vst.msk [vmem:[#allocation2] sm:$0x1] %vm1523_vm4, %v4553_v31 }
  0x1d   : > { %v4383_v16 = vld [vmem:[%s4679_s29 + $0xe8] sm:$0xff]  ;;  %v4397_v17 = vld [vmem:[%s4679_s29 + $0x158] sm:$0xff]  ;;  %v4358_v19 = vld [vmem:[%s4679_s29 + $0x20] sm:$0xff]  ;;  %1525 = vst.msk [vmem:[#allocation2 + $0x28] sm:$0x1] %vm1523_vm4, %v4553_v31 }
  0x1e   : > { %v4384_v20 = vld [vmem:[%s4679_s29 + $0xf0] sm:$0xff]  ;;  %v4398_v21 = vld [vmem:[%s4679_s29 + $0x160] sm:$0xff]  ;;  %v4377_v22 = vld [vmem:[%s4679_s29 + $0xb8] sm:$0xff]  ;;  %1526 = vst.msk [vmem:[#allocation2 + $0x50] sm:$0x1] %vm1523_vm4, %v4553_v31 }
  0x1f   : > { %1060 = vmatpush.bf16.msra.mxu0 %v4418_v7  ;;  %4430 = vmatpush.bf16.msra.mxu2 %v4418_v7  ;;  %v4359_v23 = vld [vmem:[%s4679_s29 + $0x28] sm:$0xff]  ;;  %v4385_v24 = vld [vmem:[%s4679_s29 + $0xf8] sm:$0xff]  ;;  %v4378_v26 = vld [vmem:[%s4679_s29 + $0xc0] sm:$0xff]  ;;  %1516 = vst.msk [vmem:[#allocation2 + $0x20] sm:$0x3] %vm1515_vm5, %v4553_v31 }
  0x20   : > { %4429 = vmatpush.bf16.msra.mxu1 %v4418_v7  ;;  %4431 = vmatpush.bf16.msra.mxu3 %v4418_v7  ;;  %v4399_v25 = vld [vmem:[%s4679_s29 + $0x168] sm:$0xff]  ;;  %v4360_v27 = vld [vmem:[%s4679_s29 + $0x30] sm:$0xff]  ;;  %v4386_v28 = vld [vmem:[%s4679_s29 + $0x100] sm:$0xff]  ;;  %1527 = vst.msk [vmem:[#allocation2 + $0x78] sm:$0x1] %vm1523_vm4, %v4553_v31 }
  0x21   : > { %v4400_v29 = vld [vmem:[%s4679_s29 + $0x170] sm:$0xff]  ;;  %v4379_v30 = vld [vmem:[%s4679_s29 + $0xc8] sm:$0xff]  ;;  %v4361_v32 = vld [vmem:[%s4679_s29 + $0x38] sm:$0xff]  ;;  %1528 = vst.msk [vmem:[#allocation2 + $0xa0] sm:$0x1] %vm1523_vm4, %v4553_v31 }
  0x22   : > { %4244 = vmatmul.msk.bf16.vlgmr.msra.gmra.mxu0 %vm853_vm2, %v4354_v8  ;;  %4270 = vmatmul.msk.bf16.vlgmr.msra.gmra.mxu2 %vm853_vm2, %v4380_v9  ;;  %v4387_v33 = vld [vmem:[%s4679_s29 + $0x108] sm:$0xff]  ;;  %v4401_v34 = vld [vmem:[%s4679_s29 + $0x178] sm:$0xff]  ;;  %v4362_v36 = vld [vmem:[%s4679_s29 + $0x40] sm:$0xff]  ;;  %1529 = vst.msk [vmem:[#allocation2 + $0xc8] sm:$0x1] %vm1523_vm4, %v4553_v31 }
  0x23   : > { %4265 = vmatmul.msk.bf16.vlgmr.msra.gmra.mxu1 %vm853_vm2, %v4375_v14  ;;  %4287 = vmatmul.msk.bf16.vlgmr.msra.gmra.mxu3 %vm853_vm2, %v4397_v17  ;;  %v4388_v37 = vld [vmem:[%s4679_s29 + $0x110] sm:$0xff]  ;;  %v4402_v40 = vld [vmem:[%s4679_s29 + $0x180] sm:$0xff]  ;;  %v4363_v50 = vld [vmem:[%s4679_s29 + $0x48] sm:$0xff]  ;;  %1530 = vst.msk [vmem:[#allocation2 + $0xf0] sm:$0x1] %vm1523_vm4, %v4553_v31 }
  0x24   : > { %v4389_v51 = vld [vmem:[%s4679_s29 + $0x118] sm:$0xff]  ;;  %v4403_v55 = vld [vmem:[%s4679_s29 + $0x188] sm:$0xff]  ;;  %v4364_v1 = vld [vmem:[%s4679_s29 + $0x50] sm:$0xff]  ;;  %1531 = vst.msk [vmem:[#allocation2 + $0x118] sm:$0x1] %vm1523_vm4, %v4553_v31 }
  0x25   : > { %v4390_v2 = vld [vmem:[%s4679_s29 + $0x120] sm:$0xff]  ;;  %v4404_v6 = vld [vmem:[%s4679_s29 + $0x190] sm:$0xff]  ;;  %1532 = vst.msk [vmem:[#allocation2 + $0x140] sm:$0x1] %vm1523_vm4, %v4553_v31 }
  0x26   : > { %v1721_v7 = vld [vmem:[%s5840_s3] sm:$0x7]  ;;  %1533 = vst.msk [vmem:[#allocation2 + $0x168] sm:$0x1] %vm1523_vm4, %v4553_v31 }
  0x27   : > { %v1853_v14 = vld [vmem:[#allocation2 + $0x1] ss:$2 sm:$0xff]  ;;  %1534 = vst.msk [vmem:[#allocation2 + $0x190] sm:$0x1] %vm1523_vm4, %v4553_v31 }
  0x28   : > { %1535 = vst.msk [vmem:[#allocation2 + $0x1b8] sm:$0x1] %vm1523_vm4, %v4553_v31 }
  0x29   : > { %1536 = vst.msk [vmem:[#allocation2 + $0x1e0] sm:$0x1] %vm1523_vm4, %v4553_v31 }
  0x2a   : > { %1537 = vst.msk [vmem:[#allocation2 + $0x208] sm:$0x1] %vm1523_vm4, %v4553_v31 }
  0x2b   : > { %1538 = vst.msk [vmem:[#allocation2 + $0x230] sm:$0x1] %vm1523_vm4, %v4553_v31 }
  0x2c   : > { %1539 = vst.msk [vmem:[#allocation2 + $0x258] sm:$0x1] %vm1523_vm4, %v4553_v31 }
  0x2d   : > { %1540 = vst.msk [vmem:[#allocation2 + $0x280] sm:$0x1] %vm1523_vm4, %v4553_v31 }
  0x2e   : > { %1541 = vst.msk [vmem:[#allocation2 + $0x2a8] sm:$0x1] %vm1523_vm4, %v4553_v31 }
  0x2f   : > { %1542 = vst.msk [vmem:[#allocation2 + $0x2d0] sm:$0x1] %vm1523_vm4, %v4553_v31 }
  0x30   : > { %1543 = vst.msk [vmem:[#allocation2 + $0x2f8] sm:$0x1] %vm1523_vm4, %v4553_v31 }
  0x31   : > { %1544 = vst.msk [vmem:[#allocation2 + $0x320] sm:$0x1] %vm1523_vm4, %v4553_v31 }
  0x32   : > { %4245 = vmatmul.msk.bf16.gmra.mxu0 %vm853_vm2, %v4355_v10  ;;  %4271 = vmatmul.msk.bf16.gmra.mxu2 %vm853_vm2, %v4381_v11  ;;  %v4799_v10 = vperm.slane %v1721_v7, 0  ;;  %v4801_v11 = vperm.slane %v1721_v7, 1  ;;  %1545 = vst.msk [vmem:[#allocation2 + $0x348] sm:$0x1] %vm1523_vm4, %v4553_v31 }
  0x33   : > { %4266 = vmatmul.msk.bf16.gmra.mxu1 %vm853_vm2, %v4376_v18  ;;  %4288 = vmatmul.msk.bf16.gmra.mxu3 %vm853_vm2, %v4398_v21  ;;  %v4812_v21 = vperm.slane %v1721_v7, 2  ;;  %1546 = vst.msk [vmem:[#allocation2 + $0x370] sm:$0x1] %vm1523_vm4, %v4553_v31 }
  0x34   : > { %1547 = vst.msk [vmem:[#allocation2 + $0x398] sm:$0x1] %vm1523_vm4, %v4553_v31 }
  0x35   : > { %1548 = vst.msk [vmem:[#allocation2 + $0x3c0] sm:$0x1] %vm1523_vm4, %v4553_v31 }
  0x36   : > { %1549 = vst.msk [vmem:[#allocation2 + $0x3e8] sm:$0x1] %vm1523_vm4, %v4553_v31 }
  0x37   : > { %1550 = vst.msk [vmem:[#allocation2 + $0x410] sm:$0x1] %vm1523_vm4, %v4553_v31 }
  0x38   : > { %1551 = vst.msk [vmem:[#allocation2 + $0x438] sm:$0x1] %vm1523_vm4, %v4553_v31 }
  0x39   : > { %1552 = vst.msk [vmem:[#allocation2 + $0x460] sm:$0x1] %vm1523_vm4, %v4553_v31 }
  0x3a   : > { %1553 = vst.msk [vmem:[#allocation2 + $0x488] sm:$0x1] %vm1523_vm4, %v4553_v31 }
  0x3b   : > { %1554 = vst.msk [vmem:[#allocation2 + $0x4b0] sm:$0x1] %vm1523_vm4, %v4553_v31 }
  0x3c   : > { %1555 = vst.msk [vmem:[#allocation2 + $0x4d8] sm:$0x1] %vm1523_vm4, %v4553_v31 }
  0x3d   : > { %1556 = vst.msk [vmem:[#allocation2 + $0x500] sm:$0x1] %vm1523_vm4, %v4553_v31 }
  0x3e   : > { %3157 = vst.msk [vmem:[#allocation3] sm:$0xff] %vm3156_vm6, %v4553_v31 }
  0x3f   : > { %3158 = vst.msk [vmem:[#allocation3 + $0x8] sm:$0xff] %vm3156_vm6, %v4553_v31 }
  0x40   : > { %3166 = vst.msk [vmem:[#allocation3] sm:$0x1] %vm3165_vm7, %v4553_v31 }
  0x41   : > { %3160 = vst.msk [vmem:[#allocation3 + $0x10] sm:$0x3] %vm3159_vm8, %v4553_v31 }
  0x42   : > { %4246 = vmatmul.msk.bf16.gmra.mxu0 %vm853_vm2, %v4356_v12  ;;  %4272 = vmatmul.msk.bf16.gmra.mxu2 %vm853_vm2, %v4382_v13  ;;  %v1724_v13 = vld [vmem:[#allocation2] ss:$2 sm:$0xff]  ;;  %3167 = vst.msk [vmem:[#allocation3 + $0x18] sm:$0x1] %vm3165_vm7, %v4553_v31 }
  0x43   : > { %4267 = vmatmul.msk.bf16.gmra.mxu1 %vm853_vm2, %v4377_v22  ;;  %4289 = vmatmul.msk.bf16.gmra.mxu3 %vm853_vm2, %v4399_v25  ;;  %v1982_v25 = vld [vmem:[#allocation2 + $0x2] ss:$2 sm:$0xff]  ;;  %3168 = vst.msk [vmem:[#allocation3 + $0x30] sm:$0x1] %vm3165_vm7, %v4553_v31 }
  0x44   : > { %3169 = vst.msk [vmem:[#allocation3 + $0x48] sm:$0x1] %vm3165_vm7, %v4553_v31 }
  0x45   : > { %3170 = vst.msk [vmem:[#allocation3 + $0x60] sm:$0x1] %vm3165_vm7, %v4553_v31 }
  0x46   : > { %3171 = vst.msk [vmem:[#allocation3 + $0x78] sm:$0x1] %vm3165_vm7, %v4553_v31 }
  0x47   : > { %3172 = vst.msk [vmem:[#allocation3 + $0x90] sm:$0x1] %vm3165_vm7, %v4553_v31 }
  0x48   : > { %3173 = vst.msk [vmem:[#allocation3 + $0xa8] sm:$0x1] %vm3165_vm7, %v4553_v31 }
  0x49   : > { %3174 = vst.msk [vmem:[#allocation3 + $0xc0] sm:$0x1] %vm3165_vm7, %v4553_v31 }
  0x4a   : > { %3175 = vst.msk [vmem:[#allocation3 + $0xd8] sm:$0x1] %vm3165_vm7, %v4553_v31 }
  0x4b   : > { %3176 = vst.msk [vmem:[#allocation3 + $0xf0] sm:$0x1] %vm3165_vm7, %v4553_v31 }
  0x4c   : > { %3177 = vst.msk [vmem:[#allocation3 + $0x108] sm:$0x1] %vm3165_vm7, %v4553_v31 }
  0x4d   : > { %3178 = vst.msk [vmem:[#allocation3 + $0x120] sm:$0x1] %vm3165_vm7, %v4553_v31 }
  0x4e   : > { %3179 = vst.msk [vmem:[#allocation3 + $0x138] sm:$0x1] %vm3165_vm7, %v4553_v31 }
  0x4f   : > { %3180 = vst.msk [vmem:[#allocation3 + $0x150] sm:$0x1] %vm3165_vm7, %v4553_v31 }
  0x50   : > { %3181 = vst.msk [vmem:[#allocation3 + $0x168] sm:$0x1] %vm3165_vm7, %v4553_v31 }
  0x51   : > { %3182 = vst.msk [vmem:[#allocation3 + $0x180] sm:$0x1] %vm3165_vm7, %v4553_v31 }
  0x52   : > { %4247 = vmatmul.msk.bf16.gmra.mxu0 %vm853_vm2, %v4357_v15  ;;  %4273 = vmatmul.msk.bf16.gmra.mxu2 %vm853_vm2, %v4383_v16 }
  0x53   : > { %4268 = vmatmul.msk.bf16.gmra.mxu1 %vm853_vm2, %v4378_v26  ;;  %4290 = vmatmul.msk.bf16.gmra.mxu3 %vm853_vm2, %v4400_v29  ;;  %v4421_v26 = vld [vmem:[%s5842_s5 + $0x8] sm:$0xff] }
  0x54   : > { %3041 = vmatpush.bf16.msrb.mxu1 %v4421_v26 }
  0x62   : > { %4248 = vmatmul.msk.bf16.gmra.mxu0 %vm853_vm2, %v4358_v19  ;;  %4274 = vmatmul.msk.bf16.gmra.mxu2 %vm853_vm2, %v4384_v20  ;;  %v1788_v19 = vmul.f32 %v4799_v10, %v1724_v13  ;;  %v1917_v20 = vmul.f32 %v4801_v11, %v1853_v14 }
  0x63   : > { %4269 = vmatmul.msk.bf16.gmra.mxu1 %vm853_vm2, %v4379_v30  ;;  %4291 = vmatmul.msk.bf16.gmra.mxu3 %vm853_vm2, %v4401_v34  ;;  %v2046_v30 = vmul.f32 %v4812_v21, %v1982_v25  ;;  %v1726_v34 = vld [vmem:[#allocation2 + $0x10] ss:$2 sm:$0xff] }
  0x64   : > { %v1949_v29 = vadd.f32 %v1917_v20, %v1788_v19 }
  0x72   : > { %4249 = vmatmul.msk.bf16.gmra.mxu0 %vm853_vm2, %v4359_v23  ;;  %4275 = vmatmul.msk.bf16.gmra.mxu2 %vm853_vm2, %v4385_v24  ;;  %v1722_v24 = vld [vmem:[%s5840_s3 + $0x4] sm:$0x7] }
  0x73   : > { %4292 = vmatmul.msk.bf16.gmra.mxu3 %vm853_vm2, %v4402_v40 }
  0x82   : > { %4250 = vmatmul.msk.bf16.gmra.mxu0 %vm853_vm2, %v4360_v27  ;;  %4276 = vmatmul.msk.bf16.gmra.mxu2 %vm853_vm2, %v4386_v28 }
  0x83   : > { %4293 = vmatmul.msk.bf16.gmra.mxu3 %vm853_vm2, %v4403_v55  ;;  %v1723_v55 = vld [vmem:[%s5840_s3 + $0x8] sm:$0x7] }
  0x84   : > { %v4890_v19 = vperm.slane %v1723_v55, 1 }
  0x92   : > { %4251 = vmatmul.msk.bf16.gmra.mxu0 %vm853_vm2, %v4361_v32  ;;  %4277 = vmatmul.msk.bf16.gmra.mxu2 %vm853_vm2, %v4387_v33  ;;  %v4828_v32 = vperm.slane %v1722_v24, 0 }
  0x93   : > { %4294 = vmatmul.msk.bf16.gmra.mxu3 %vm853_vm2, %v4404_v6 }
  0x9f   : > { %v1062_v38 = vpop.f32.mrf.mxu0 }
  0xa0   : > { %v1063_v39 = vadd.f32 %v4751_v35, %v1062_v38  ;;  %v1167_v9 = vpop.f32.mrf.mxu1  ;;  %v4420_v38 = vld [vmem:[%s5842_s5] sm:$0xff] }
  0xa1   : > { %v1168_v12 = vadd.f32 %v4751_v35, %v1167_v9  ;;  %3042 = vmatpush.bf16.msrb.mxu1 %v4420_v38 }
  0xa2   : > { %v1382_v41 = vmax.f32 %v1063_v39, 0.0  ;;  %4252 = vmatmul.msk.bf16.gmra.mxu0 %vm853_vm2, %v4362_v36  ;;  %4278 = vmatmul.msk.bf16.gmra.mxu2 %vm853_vm2, %v4388_v37  ;;  %v1855_v39 = vld [vmem:[#allocation2 + $0x11] ss:$2 sm:$0xff] }
  0xa3   : > { %v1424_v17 = vmax.f32 %v1168_v12, 0.0 }
  0xa4   : > { %1593 = vst.msk [vmem:[#allocation2 + $0x29] sm:$0xff] %vm1510_vm3, %v1382_v41  ;;  %v4365_v41 = vld [vmem:[%s4679_s29 + $0x58] sm:$0xff] }
  0xa5   : > { %v1192_v42 = vpop.f32.mrf.mxu2  ;;  %1635 = vst.msk [vmem:[#allocation2 + $0x1c9] sm:$0xff] %vm1510_vm3, %v1424_v17 }
  0xa6   : > { %v1193_v43 = vadd.f32 %v4751_v35, %v1192_v42  ;;  %v4391_v42 = vld [vmem:[%s4679_s29 + $0x128] sm:$0xff] }
  0xa7   : > { %v1064_v44 = vpop.f32.mrf.mxu0 }
  0xa8   : > { %v1434_v45 = vmax.f32 %v1193_v43, 0.0  ;;  %v1065_v46 = vadd.f32 %v4751_v35, %v1064_v44  ;;  %v1169_v28 = vpop.f32.mrf.mxu1 }
  0xa9   : > { %v1170_v33 = vadd.f32 %v4751_v35, %v1169_v28  ;;  %v4392_v28 = vld [vmem:[%s4679_s29 + $0x130] sm:$0xff] }
  0xaa   : > { %1645 = vst.msk [vmem:[#allocation2 + $0x231] sm:$0xff] %vm1510_vm3, %v1434_v45  ;;  %v1383_v47 = vmax.f32 %v1065_v46, 0.0  ;;  %v2078_v45 = vadd.f32 %v2046_v30, %v1949_v29 }
  0xab   : > { %v1425_v43 = vmax.f32 %v1170_v33, 0.0 }
  0xac   : > { %1594 = vst.msk [vmem:[#allocation2 + $0x31] sm:$0xff] %vm1510_vm3, %v1383_v47 }
  0xad   : > { %v1194_v48 = vpop.f32.mrf.mxu2  ;;  %1636 = vst.msk [vmem:[#allocation2 + $0x1d1] sm:$0xff] %vm1510_vm3, %v1425_v43  ;;  %v4406_v43 = vld [vmem:[%s4679_s29 + $0x1a0] sm:$0xff] }
  0xae   : > { %v1195_v49 = vadd.f32 %v4751_v35, %v1194_v48 }
  0xaf   : > { %v1067_v52 = vpop.f32.mrf.mxu0 }
  0xb0   : > { %v1435_v53 = vmax.f32 %v1195_v49, 0.0  ;;  %v1068_v54 = vadd.f32 %v4751_v35, %v1067_v52  ;;  %v4405_v49 = vld [vmem:[%s4679_s29 + $0x198] sm:$0xff] }
  0xb1   : > { %v1984_v52 = vld [vmem:[#allocation2 + $0x12] ss:$2 sm:$0xff]  ;;  %4295 = vmatmul.msk.bf16.gmra.mxu3 %vm853_vm2, %v4405_v49 }
  0xb2   : > { %1646 = vst.msk [vmem:[#allocation2 + $0x239] sm:$0xff] %vm1510_vm3, %v1435_v53  ;;  %v1384_v56 = vmax.f32 %v1068_v54, 0.0  ;;  %4253 = vmatmul.msk.bf16.gmra.mxu0 %vm853_vm2, %v4363_v50  ;;  %4279 = vmatmul.msk.bf16.gmra.mxu2 %vm853_vm2, %v4389_v51  ;;  %v1789_v50 = vmul.f32 %v4799_v10, %v1726_v34  ;;  %v1918_v51 = vmul.f32 %v4801_v11, %v1855_v39  ;;  %v4852_v53 = vperm.slane %v1722_v24, 1 }
  0xb3   : > { %v2110_v36 = vld [vmem:[#allocation2 + $0x28] ss:$2 sm:$0xff] }
  0xb4   : > { %1595 = vst.msk [vmem:[#allocation2 + $0x39] sm:$0xff] %vm1510_vm3, %v1384_v56  ;;  %v2174_v46 = vmul.f32 %v4828_v32, %v2110_v36  ;;  %v2239_v56 = vld [vmem:[#allocation2 + $0x29] ss:$2 sm:$0xff] }
  0xb5   : > { %v1197_v57 = vpop.f32.mrf.mxu2 }
  0xb6   : > { %v1198_v58 = vadd.f32 %v4751_v35, %v1197_v57  ;;  %v2206_v57 = vadd.f32 %v2174_v46, %v2078_v45 }
  0xb7   : > { %v1069_v59 = vpop.f32.mrf.mxu0 }
  0xb8   : > { %v1436_v60 = vmax.f32 %v1198_v58, 0.0  ;;  %v1070_v61 = vadd.f32 %v4751_v35, %v1069_v59  ;;  %v1950_v58 = vadd.f32 %v1918_v51, %v1789_v50  ;;  %v2047_v59 = vmul.f32 %v4812_v21, %v1984_v52 }
  0xba   : > { %1647 = vst.msk [vmem:[#allocation2 + $0x241] sm:$0xff] %vm1510_vm3, %v1436_v60  ;;  %v1385_v62 = vmax.f32 %v1070_v61, 0.0  ;;  %v4865_v60 = vpop.f32.mrf.mxu1  ;;  %v2079_v12 = vadd.f32 %v2047_v59, %v1950_v58 }
  0xbc   : > { %1596 = vst.msk [vmem:[#allocation2 + $0x41] sm:$0xff] %vm1510_vm3, %v1385_v62 }
  0xbd   : > { %v1199_v63 = vpop.f32.mrf.mxu2 }
  0xbe   : > { %v1200_v0 = vadd.f32 %v4751_v35, %v1199_v63  ;;  %v2303_v63 = vmul.f32 %v4852_v53, %v2239_v56  ;;  %v1173_v56 = vadd.f32 %v4751_v35, %v4865_v60 }
  0xbf   : > { %v1072_v3 = vpop.f32.mrf.mxu0 }
  0xc0   : > { %v1437_v4 = vmax.f32 %v1200_v0, 0.0  ;;  %v1073_v5 = vadd.f32 %v4751_v35, %v1072_v3  ;;  %v4868_v0 = vperm.slane %v1722_v24, 2  ;;  %v2368_v3 = vld [vmem:[#allocation2 + $0x2a] ss:$2 sm:$0xff]  ;;  %v2335_v7 = vadd.f32 %v2303_v63, %v2206_v57 }
  0xc1   : > { %4296 = vmatmul.msk.bf16.gmra.mxu3 %vm853_vm2, %v4406_v43 }
  0xc2   : > { %1648 = vst.msk [vmem:[#allocation2 + $0x249] sm:$0xff] %vm1510_vm3, %v1437_v4  ;;  %v1386_v8 = vmax.f32 %v1073_v5, 0.0  ;;  %4254 = vmatmul.msk.bf16.gmra.mxu0 %vm853_vm2, %v4364_v1  ;;  %4280 = vmatmul.msk.bf16.gmra.mxu2 %vm853_vm2, %v4390_v2  ;;  %v4870_v1 = vperm.slane %v1723_v55, 0  ;;  %v4877_v5 = vpop.f32.mrf.mxu3  ;;  %v2432_v14 = vmul.f32 %v4868_v0, %v2368_v3 }
  0xc3   : > { %v2112_v62 = vld [vmem:[#allocation2 + $0x38] ss:$2 sm:$0xff]  ;;  %v2241_v17 = vld [vmem:[#allocation2 + $0x39] ss:$2 sm:$0xff] }
  0xc4   : > { %1597 = vst.msk [vmem:[#allocation2 + $0x51] sm:$0xff] %vm1510_vm3, %v1386_v8  ;;  %v2175_v13 = vmul.f32 %v4828_v32, %v2112_v62  ;;  %v2304_v29 = vmul.f32 %v4852_v53, %v2241_v17  ;;  %v2370_v34 = vld [vmem:[#allocation2 + $0x3a] ss:$2 sm:$0xff]  ;;  %v1278_v62 = vadd.f32 %v4751_v35, %v4877_v5  ;;  %v1426_v5 = vmax.f32 %v1173_v56, 0.0 }
  0xc5   : > { %v1202_v15 = vpop.f32.mrf.mxu2  ;;  %v2433_v45 = vmul.f32 %v4868_v0, %v2370_v34 }
  0xc6   : > { %v1203_v16 = vadd.f32 %v4751_v35, %v1202_v15  ;;  %v2207_v20 = vadd.f32 %v2175_v13, %v2079_v12  ;;  %1637 = vst.msk [vmem:[#allocation2 + $0x1e1] sm:$0xff] %vm1510_vm3, %v1426_v5 }
  0xc7   : > { %v1074_v18 = vpop.f32.mrf.mxu0 }
  0xc8   : > { %v1438_v22 = vmax.f32 %v1203_v16, 0.0  ;;  %v1075_v23 = vadd.f32 %v4751_v35, %v1074_v18  ;;  %v2464_v18 = vadd.f32 %v2432_v14, %v2335_v7 }
  0xca   : > { %1649 = vst.msk [vmem:[#allocation2 + $0x259] sm:$0xff] %vm1510_vm3, %v1438_v22  ;;  %v1387_v27 = vmax.f32 %v1075_v23, 0.0  ;;  %v1174_v23 = vpop.f32.mrf.mxu1  ;;  %v1279_v30 = vpop.f32.mrf.mxu3 }
  0xcb   : > { %v1175_v60 = vadd.f32 %v4751_v35, %v1174_v23  ;;  %v1280_v3 = vadd.f32 %v4751_v35, %v1279_v30 }
  0xcc   : > { %1598 = vst.msk [vmem:[#allocation2 + $0x59] sm:$0xff] %vm1510_vm3, %v1387_v27  ;;  %v4366_v27 = vld [vmem:[%s4679_s29 + $0x60] sm:$0xff] }
  0xcd   : > { %v1204_v37 = vpop.f32.mrf.mxu2 }
  0xce   : > { %v1205_v40 = vadd.f32 %v4751_v35, %v1204_v37  ;;  %v4904_v37 = vperm.slane %v1723_v55, 2 }
  0xcf   : > { %v1077_v44 = vpop.f32.mrf.mxu0 }
  0xd0   : > { %v1439_v47 = vmax.f32 %v1205_v40, 0.0  ;;  %v1078_v48 = vadd.f32 %v4751_v35, %v1077_v44  ;;  %v2336_v40 = vadd.f32 %v2304_v29, %v2207_v20  ;;  %v1469_v20 = vmax.f32 %v1280_v3, 0.0  ;;  %v4394_v3 = vld [vmem:[%s4679_s29 + $0x140] sm:$0xff] }
  0xd2   : > { %1650 = vst.msk [vmem:[#allocation2 + $0x261] sm:$0xff] %vm1510_vm3, %v1439_v47  ;;  %v1388_v54 = vmax.f32 %v1078_v48, 0.0  ;;  %4255 = vmatmul.msk.bf16.gmra.mxu0 %vm853_vm2, %v4365_v41  ;;  %4281 = vmatmul.msk.bf16.gmra.mxu2 %vm853_vm2, %v4391_v42  ;;  %v2465_v49 = vadd.f32 %v2433_v45, %v2336_v40  ;;  %v1177_v51 = vpop.f32.mrf.mxu1  ;;  %v1282_v63 = vpop.f32.mrf.mxu3 }
  0xd3   : > { %v2497_v4 = vld [vmem:[#allocation2 + $0x50] ss:$2 sm:$0xff]  ;;  %v2626_v22 = vld [vmem:[#allocation2 + $0x51] ss:$2 sm:$0xff]  ;;  %v1283_v17 = vadd.f32 %v4751_v35, %v1282_v63  ;;  %1680 = vst.msk [vmem:[#allocation2 + $0x389] sm:$0xff] %vm1510_vm3, %v1469_v20 }
  0xd4   : > { %1599 = vst.msk [vmem:[#allocation2 + $0x61] sm:$0xff] %vm1510_vm3, %v1388_v54  ;;  %v2561_v15 = vmul.f32 %v4870_v1, %v2497_v4  ;;  %v2690_v36 = vmul.f32 %v4890_v19, %v2626_v22  ;;  %v2755_v41 = vld [vmem:[#allocation2 + $0x52] ss:$2 sm:$0xff] }
  0xd5   : > { %v1207_v61 = vpop.f32.mrf.mxu2  ;;  %v2819_v48 = vmul.f32 %v4904_v37, %v2755_v41 }
  0xd6   : > { %v1208_v2 = vadd.f32 %v4751_v35, %v1207_v61  ;;  %v2593_v25 = vadd.f32 %v2561_v15, %v2464_v18  ;;  %v4931_v61 = vld [vmem:[%s5841_s4] ss:$0 sm:$0xff]  ;;  %v1468_v15 = vmax.f32 %v1278_v62, 0.0 }
  0xd7   : > { %v1079_v6 = vpop.f32.mrf.mxu0 }
  0xd8   : > { %v1440_v8 = vmax.f32 %v1208_v2, 0.0  ;;  %v1080_v9 = vadd.f32 %v4751_v35, %v1079_v6  ;;  %v2722_v42 = vadd.f32 %v2690_v36, %v2593_v25  ;;  %1679 = vst.msk [vmem:[#allocation2 + $0x381] sm:$0xff] %vm1510_vm3, %v1468_v15  ;;  %v1470_v36 = vmax.f32 %v1283_v17, 0.0 }
  0xda   : > { %1651 = vst.msk [vmem:[#allocation2 + $0x269] sm:$0xff] %vm1510_vm3, %v1440_v8  ;;  %v1389_v16 = vmax.f32 %v1080_v9, 0.0  ;;  %v2851_v55 = vadd.f32 %v2819_v48, %v2722_v42  ;;  %v1178_v9 = vadd.f32 %v4751_v35, %v1177_v51  ;;  %v1179_v22 = vpop.f32.mrf.mxu1  ;;  %v4407_v42 = vld [vmem:[%s4679_s29 + $0x1a8] sm:$0xff] }
  0xdb   : > { %v1180_v25 = vadd.f32 %v4751_v35, %v1179_v22  ;;  %1681 = vst.msk [vmem:[#allocation2 + $0x399] sm:$0xff] %vm1510_vm3, %v1470_v36  ;;  %4297 = vmatmul.msk.bf16.gmra.mxu3 %vm853_vm2, %v4407_v42 }
  0xdc   : > { %1600 = vst.msk [vmem:[#allocation2 + $0x69] sm:$0xff] %vm1510_vm3, %v1389_v16  ;;  %v2887_v14 = vadd.f32 %v4931_v61, %v2851_v55  ;;  %v1427_v16 = vmax.f32 %v1175_v60, 0.0  ;;  %v4368_v60 = vld [vmem:[%s4679_s29 + $0x70] sm:$0xff] }
  0xdd   : > { %v1209_v24 = vpop.f32.mrf.mxu2  ;;  %v1429_v41 = vmax.f32 %v1180_v25, 0.0  ;;  %v1857_v25 = vld [vmem:[#allocation2 + $0x51] ss:$2 sm:$0xff] }
  0xde   : > { %v1210_v26 = vadd.f32 %v4751_v35, %v1209_v24  ;;  %v1428_v24 = vmax.f32 %v1178_v9, 0.0  ;;  %v2919_v29 = vmax.f32 %v2887_v14, 0.0  ;;  %1638 = vst.msk [vmem:[#allocation2 + $0x1e9] sm:$0xff] %vm1510_vm3, %v1427_v16  ;;  %v4408_v9 = vld [vmem:[%s4679_s29 + $0x1b0] sm:$0xff] }
  0xdf   : > { %v1082_v33 = vpop.f32.mrf.mxu0  ;;  %1640 = vst.msk [vmem:[#allocation2 + $0x1f9] sm:$0xff] %vm1510_vm3, %v1429_v41  ;;  %v1986_v41 = vld [vmem:[#allocation2 + $0x52] ss:$2 sm:$0xff] }
  0xe0   : > { %v1441_v38 = vmax.f32 %v1210_v26, 0.0  ;;  %v1083_v39 = vadd.f32 %v4751_v35, %v1082_v33  ;;  %v1284_v33 = vpop.f32.mrf.mxu3  ;;  %1639 = vst.msk [vmem:[#allocation2 + $0x1f1] sm:$0xff] %vm1510_vm3, %v1428_v24  ;;  %v1728_v24 = vld [vmem:[#allocation2 + $0x50] ss:$2 sm:$0xff] }
  0xe2   : > { %1652 = vst.msk [vmem:[#allocation2 + $0x271] sm:$0xff] %vm1510_vm3, %v1441_v38  ;;  %v1390_v44 = vmax.f32 %v1083_v39, 0.0  ;;  %4256 = vmatmul.msk.bf16.gmra.mxu0 %vm853_vm2, %v4366_v27  ;;  %4282 = vmatmul.msk.bf16.gmra.mxu2 %vm853_vm2, %v4392_v28  ;;  %v4367_v27 = vld [vmem:[%s4679_s29 + $0x68] sm:$0xff]  ;;  %v4393_v28 = vld [vmem:[%s4679_s29 + $0x138] sm:$0xff] }
  0xe3   : > { %v2499_v46 = vld [vmem:[#allocation2 + $0x60] ss:$2 sm:$0xff]  ;;  %v2628_v47 = vld [vmem:[#allocation2 + $0x61] ss:$2 sm:$0xff] }
  0xe4   : > { %1601 = vst.msk [vmem:[#allocation2 + $0x79] sm:$0xff] %vm1510_vm3, %v1390_v44  ;;  %v2562_v50 = vmul.f32 %v4870_v1, %v2499_v46  ;;  %v2757_v54 = vld [vmem:[#allocation2 + $0x62] ss:$2 sm:$0xff]  ;;  %v2691_v59 = vmul.f32 %v4890_v19, %v2628_v47  ;;  %v1285_v44 = vadd.f32 %v4751_v35, %v1284_v33  ;;  %v1182_v46 = vpop.f32.mrf.mxu1  ;;  %v1919_v33 = vmul.f32 %v4801_v11, %v1857_v25 }
  0xe5   : > { %v1212_v52 = vpop.f32.mrf.mxu2  ;;  %v2820_v8 = vmul.f32 %v4904_v37, %v2757_v54  ;;  %v1183_v48 = vadd.f32 %v4751_v35, %v1182_v46 }
  0xe6   : > { %v1213_v57 = vadd.f32 %v4751_v35, %v1212_v52  ;;  %v2594_v58 = vadd.f32 %v2562_v50, %v2465_v49  ;;  %v1471_v45 = vmax.f32 %v1285_v44, 0.0  ;;  %v4369_v44 = vld [vmem:[%s4679_s29 + $0x78] sm:$0xff] }
  0xe7   : > { %v1084_v2 = vpop.f32.mrf.mxu0  ;;  %v1430_v52 = vmax.f32 %v1183_v48, 0.0 }
  0xe8   : > { %v1442_v4 = vmax.f32 %v1213_v57, 0.0  ;;  %v1085_v6 = vadd.f32 %v4751_v35, %v1084_v2  ;;  %v2723_v7 = vadd.f32 %v2691_v59, %v2594_v58  ;;  %1682 = vst.msk [vmem:[#allocation2 + $0x3a1] sm:$0xff] %vm1510_vm3, %v1471_v45  ;;  %v1287_v50 = vpop.f32.mrf.mxu3  ;;  %v4395_v45 = vld [vmem:[%s4679_s29 + $0x148] sm:$0xff] }
  0xe9   : > { %1641 = vst.msk [vmem:[#allocation2 + $0x209] sm:$0xff] %vm1510_vm3, %v1430_v52  ;;  %v1288_v57 = vadd.f32 %v4751_v35, %v1287_v50 }
  0xea   : > { %1653 = vst.msk [vmem:[#allocation2 + $0x281] sm:$0xff] %vm1510_vm3, %v1442_v4  ;;  %v1391_v12 = vmax.f32 %v1085_v6, 0.0  ;;  %v2852_v13 = vadd.f32 %v2820_v8, %v2723_v7 }
  0xeb   : > { %v1472_v58 = vmax.f32 %v1288_v57, 0.0  ;;  %4298 = vmatmul.msk.bf16.gmra.mxu3 %vm853_vm2, %v4408_v9 }
  0xec   : > { %1602 = vst.msk [vmem:[#allocation2 + $0x81] sm:$0xff] %vm1510_vm3, %v1391_v12  ;;  %v2888_v18 = vadd.f32 %v4931_v61, %v2852_v13  ;;  %v1184_v59 = vpop.f32.mrf.mxu1 }
  0xed   : > { %v1214_v23 = vpop.f32.mrf.mxu2  ;;  %v1185_v63 = vadd.f32 %v4751_v35, %v1184_v59  ;;  %1683 = vst.msk [vmem:[#allocation2 + $0x3a9] sm:$0xff] %vm1510_vm3, %v1472_v58 }
  0xee   : > { %v1215_v26 = vadd.f32 %v4751_v35, %v1214_v23  ;;  %v2920_v30 = vmax.f32 %v2888_v18, 0.0 }
  0xef   : > { %v1087_v34 = vpop.f32.mrf.mxu0  ;;  %v1431_v7 = vmax.f32 %v1185_v63, 0.0 }
  0xf0   : > { %v1443_v38 = vmax.f32 %v1215_v26, 0.0  ;;  %v1088_v39 = vadd.f32 %v4751_v35, %v1087_v34  ;;  %v2951_v40 = vpack.c.bf16 %v2920_v30, %v2919_v29  ;;  %v1289_v4 = vpop.f32.mrf.mxu3  ;;  %v1790_v30 = vmul.f32 %v4799_v10, %v1728_v24 }
  0xf1   : > { %1642 = vst.msk [vmem:[#allocation2 + $0x211] sm:$0xff] %vm1510_vm3, %v1431_v7  ;;  %v1290_v13 = vadd.f32 %v4751_v35, %v1289_v4 }
  0xf2   : > { %1654 = vst.msk [vmem:[#allocation2 + $0x289] sm:$0xff] %vm1510_vm3, %v1443_v38  ;;  %v1392_v43 = vmax.f32 %v1088_v39, 0.0  ;;  %4257 = vmatmul.msk.bf16.gmra.mxu0 %vm853_vm2, %v4367_v27  ;;  %4283 = vmatmul.msk.bf16.gmra.mxu2 %vm853_vm2, %v4393_v28  ;;  %v1951_v48 = vadd.f32 %v1919_v33, %v1790_v30 }
  0xf3   : > { %4316 = vmatmul.msk.bf16.vlgmr.msrb.gmra.mxu1 %vm1510_vm3, %v2951_v40  ;;  %v1473_v14 = vmax.f32 %v1290_v13, 0.0  ;;  %v1730_v40 = vld [vmem:[#allocation2 + $0x60] ss:$2 sm:$0xff] }
  0xf4   : > { %1603 = vst.msk [vmem:[#allocation2 + $0x89] sm:$0xff] %vm1510_vm3, %v1392_v43  ;;  %v1187_v15 = vpop.f32.mrf.mxu1  ;;  %v2114_v42 = vld [vmem:[#allocation2 + $0x78] ss:$2 sm:$0xff]  ;;  %v1791_v57 = vmul.f32 %v4799_v10, %v1730_v40  ;;  %v4396_v40 = vld [vmem:[%s4679_s29 + $0x150] sm:$0xff] }
  0xf5   : > { %v1217_v47 = vpop.f32.mrf.mxu2  ;;  %v1188_v17 = vadd.f32 %v4751_v35, %v1187_v15  ;;  %1684 = vst.msk [vmem:[#allocation2 + $0x3b1] sm:$0xff] %vm1510_vm3, %v1473_v14  ;;  %v2372_v14 = vld [vmem:[#allocation2 + $0x7a] ss:$2 sm:$0xff] }
  0xf6   : > { %v1218_v49 = vadd.f32 %v4751_v35, %v1217_v47  ;;  %v1859_v47 = vld [vmem:[#allocation2 + $0x61] ss:$2 sm:$0xff]  ;;  %v2434_v25 = vmul.f32 %v4868_v0, %v2372_v14 }
  0xf7   : > { %v1089_v51 = vpop.f32.mrf.mxu0  ;;  %v1432_v23 = vmax.f32 %v1188_v17, 0.0  ;;  %v1920_v58 = vmul.f32 %v4801_v11, %v1859_v47 }
  0xf8   : > { %v1444_v54 = vmax.f32 %v1218_v49, 0.0  ;;  %v1090_v55 = vadd.f32 %v4751_v35, %v1089_v51  ;;  %v1292_v20 = vpop.f32.mrf.mxu3 }
  0xf9   : > { %1643 = vst.msk [vmem:[#allocation2 + $0x219] sm:$0xff] %vm1510_vm3, %v1432_v23  ;;  %v1293_v29 = vadd.f32 %v4751_v35, %v1292_v20  ;;  %v1952_v7 = vadd.f32 %v1920_v58, %v1791_v57 }
  0xfa   : > { %1655 = vst.msk [vmem:[#allocation2 + $0x291] sm:$0xff] %vm1510_vm3, %v1444_v54  ;;  %v1393_v56 = vmax.f32 %v1090_v55, 0.0  ;;  %v2048_v54 = vmul.f32 %v4812_v21, %v1986_v41  ;;  %v2176_v55 = vmul.f32 %v4828_v32, %v2114_v42 }
  0xfb   : > { %v1474_v34 = vmax.f32 %v1293_v29, 0.0 }
  0xfc   : > { %1604 = vst.msk [vmem:[#allocation2 + $0x91] sm:$0xff] %vm1510_vm3, %v1393_v56  ;;  %v1189_v36 = vpop.f32.mrf.mxu1  ;;  %v4409_v56 = vld [vmem:[%s4679_s29 + $0x1b8] sm:$0xff]  ;;  %v2080_v63 = vadd.f32 %v2048_v54, %v1951_v48 }
  0xfd   : > { %v1219_v62 = vpop.f32.mrf.mxu2  ;;  %v1190_v39 = vadd.f32 %v4751_v35, %v1189_v36  ;;  %1685 = vst.msk [vmem:[#allocation2 + $0x3c1] sm:$0xff] %vm1510_vm3, %v1474_v34  ;;  %4299 = vmatmul.msk.bf16.gmra.mxu3 %vm853_vm2, %v4409_v56  ;;  %v4410_v56 = vld [vmem:[%s4679_s29 + $0x1c0] sm:$0xff] }
  0xfe   : > { %v1220_v2 = vadd.f32 %v4751_v35, %v1219_v62  ;;  %v2208_v4 = vadd.f32 %v2176_v55, %v2080_v63 }
  0xff   : > { %v1092_v6 = vpop.f32.mrf.mxu0  ;;  %v1433_v50 = vmax.f32 %v1190_v39, 0.0  ;;  %v4370_v39 = vld [vmem:[%s4679_s29 + $0x80] sm:$0xff] }
 0x100   : > { %v1445_v8 = vmax.f32 %v1220_v2, 0.0  ;;  %v1093_v5 = vadd.f32 %v4751_v35, %v1092_v6  ;;  %v1294_v46 = vpop.f32.mrf.mxu3  ;;  %v2243_v2 = vld [vmem:[#allocation2 + $0x79] ss:$2 sm:$0xff] }
 0x101   : > { %1644 = vst.msk [vmem:[#allocation2 + $0x221] sm:$0xff] %vm1510_vm3, %v1433_v50  ;;  %v1295_v62 = vadd.f32 %v4751_v35, %v1294_v46  ;;  %v2305_v9 = vmul.f32 %v4852_v53, %v2243_v2 }
 0x102   : > { %1656 = vst.msk [vmem:[#allocation2 + $0x299] sm:$0xff] %vm1510_vm3, %v1445_v8  ;;  %v1394_v12 = vmax.f32 %v1093_v5, 0.0  ;;  %4258 = vmatmul.msk.bf16.gmra.mxu0 %vm853_vm2, %v4368_v60  ;;  %4284 = vmatmul.msk.bf16.gmra.mxu2 %vm853_vm2, %v4394_v3  ;;  %v1988_v3 = vld [vmem:[#allocation2 + $0x62] ss:$2 sm:$0xff] }
 0x103   : > { %v1475_v60 = vmax.f32 %v1295_v62, 0.0  ;;  %v2116_v8 = vld [vmem:[#allocation2 + $0x88] ss:$2 sm:$0xff]  ;;  %v2049_v13 = vmul.f32 %v4812_v21, %v1988_v3 }
 0x104   : > { %1605 = vst.msk [vmem:[#allocation2 + $0xa1] sm:$0xff] %vm1510_vm3, %v1394_v12  ;;  %v2177_v20 = vmul.f32 %v4828_v32, %v2116_v8  ;;  %v2374_v42 = vld [vmem:[#allocation2 + $0x8a] ss:$2 sm:$0xff] }
 0x105   : > { %v1222_v16 = vpop.f32.mrf.mxu2  ;;  %1686 = vst.msk [vmem:[#allocation2 + $0x3c9] sm:$0xff] %vm1510_vm3, %v1475_v60  ;;  %v2081_v23 = vadd.f32 %v2049_v13, %v1952_v7  ;;  %v2435_v50 = vmul.f32 %v4868_v0, %v2374_v42 }
 0x106   : > { %v1223_v18 = vadd.f32 %v4751_v35, %v1222_v16 }
 0x107   : > { %v1094_v22 = vpop.f32.mrf.mxu0  ;;  %v2209_v29 = vadd.f32 %v2177_v20, %v2081_v23 }
 0x108   : > { %v1446_v26 = vmax.f32 %v1223_v18, 0.0  ;;  %v1095_v27 = vadd.f32 %v4751_v35, %v1094_v22  ;;  %v1297_v16 = vpop.f32.mrf.mxu3  ;;  %v2337_v22 = vadd.f32 %v2305_v9, %v2208_v4 }
 0x10a   : > { %1657 = vst.msk [vmem:[#allocation2 + $0x2a9] sm:$0xff] %vm1510_vm3, %v1446_v26  ;;  %v1395_v28 = vmax.f32 %v1095_v27, 0.0  ;;  %v1298_v27 = vadd.f32 %v4751_v35, %v1297_v16  ;;  %v2466_v30 = vadd.f32 %v2434_v25, %v2337_v22 }
 0x10c   : > { %1606 = vst.msk [vmem:[#allocation2 + $0xa9] sm:$0xff] %vm1510_vm3, %v1395_v28  ;;  %v2245_v28 = vld [vmem:[#allocation2 + $0x89] ss:$2 sm:$0xff]  ;;  %v1476_v33 = vmax.f32 %v1298_v27, 0.0 }
 0x10d   : > { %v1224_v38 = vpop.f32.mrf.mxu2  ;;  %v2306_v41 = vmul.f32 %v4852_v53, %v2245_v28  ;;  %4300 = vmatmul.msk.bf16.gmra.mxu3 %vm853_vm2, %v4410_v56 }
 0x10e   : > { %v1225_v43 = vadd.f32 %v4751_v35, %v1224_v38  ;;  %1687 = vst.msk [vmem:[#allocation2 + $0x3d1] sm:$0xff] %vm1510_vm3, %v1476_v33 }
 0x10f   : > { %v1097_v49 = vpop.f32.mrf.mxu0  ;;  %v2338_v48 = vadd.f32 %v2306_v41, %v2209_v29 }
 0x110   : > { %v1447_v51 = vmax.f32 %v1225_v43, 0.0  ;;  %v1098_v52 = vadd.f32 %v4751_v35, %v1097_v49 }
 0x112   : > { %1658 = vst.msk [vmem:[#allocation2 + $0x2b1] sm:$0xff] %vm1510_vm3, %v1447_v51  ;;  %v1396_v59 = vmax.f32 %v1098_v52, 0.0  ;;  %4259 = vmatmul.msk.bf16.gmra.mxu0 %vm853_vm2, %v4369_v44  ;;  %4285 = vmatmul.msk.bf16.gmra.mxu2 %vm853_vm2, %v4395_v45  ;;  %v1299_v45 = vpop.f32.mrf.mxu3 }
 0x113   : > { %v2501_v15 = vld [vmem:[#allocation2 + $0xa0] ss:$2 sm:$0xff]  ;;  %v2630_v36 = vld [vmem:[#allocation2 + $0xa1] ss:$2 sm:$0xff]  ;;  %v1300_v55 = vadd.f32 %v4751_v35, %v1299_v45 }
 0x114   : > { %1607 = vst.msk [vmem:[#allocation2 + $0xb1] sm:$0xff] %vm1510_vm3, %v1396_v59  ;;  %v2563_v26 = vmul.f32 %v4870_v1, %v2501_v15  ;;  %v2692_v49 = vmul.f32 %v4890_v19, %v2630_v36  ;;  %v2759_v51 = vld [vmem:[#allocation2 + $0xa2] ss:$2 sm:$0xff]  ;;  %v2467_v59 = vadd.f32 %v2435_v50, %v2338_v48 }
 0x115   : > { %v1227_v6 = vpop.f32.mrf.mxu2  ;;  %v2821_v63 = vmul.f32 %v4904_v37, %v2759_v51  ;;  %v1477_v2 = vmax.f32 %v1300_v55, 0.0 }
 0x116   : > { %v1228_v5 = vadd.f32 %v4751_v35, %v1227_v6  ;;  %v2595_v43 = vadd.f32 %v2563_v26, %v2466_v30  ;;  %v4371_v26 = vld [vmem:[%s4679_s29 + $0x88] sm:$0xff] }
 0x117   : > { %v1099_v12 = vpop.f32.mrf.mxu0  ;;  %1688 = vst.msk [vmem:[#allocation2 + $0x3d9] sm:$0xff] %vm1510_vm3, %v1477_v2 }
 0x118   : > { %v1448_v17 = vmax.f32 %v1228_v5, 0.0  ;;  %v1100_v18 = vadd.f32 %v4751_v35, %v1099_v12  ;;  %v2724_v54 = vadd.f32 %v2692_v49, %v2595_v43 }
 0x11a   : > { %1659 = vst.msk [vmem:[#allocation2 + $0x2b9] sm:$0xff] %vm1510_vm3, %v1448_v17  ;;  %v1397_v24 = vmax.f32 %v1100_v18, 0.0  ;;  %v2853_v8 = vadd.f32 %v2821_v63, %v2724_v54  ;;  %v1302_v9 = vpop.f32.mrf.mxu3  ;;  %v4372_v54 = vld [vmem:[%s4679_s29 + $0x90] sm:$0xff] }
 0x11b   : > { %v1303_v20 = vadd.f32 %v4751_v35, %v1302_v9  ;;  %v4412_v63 = vld [vmem:[%s4679_s29 + $0x1d0] sm:$0xff] }
 0x11c   : > { %1608 = vst.msk [vmem:[#allocation2 + $0xb9] sm:$0xff] %vm1510_vm3, %v1397_v24  ;;  %v2889_v18 = vadd.f32 %v4931_v61, %v2853_v8  ;;  %v1861_v8 = vld [vmem:[#allocation2 + $0xa1] ss:$2 sm:$0xff] }
 0x11d   : > { %v1229_v34 = vpop.f32.mrf.mxu2  ;;  %v1478_v23 = vmax.f32 %v1303_v20, 0.0 }
 0x11e   : > { %v1230_v38 = vadd.f32 %v4751_v35, %v1229_v34  ;;  %v2921_v27 = vmax.f32 %v2889_v18, 0.0  ;;  %v1990_v18 = vld [vmem:[#allocation2 + $0xa2] ss:$2 sm:$0xff] }
 0x11f   : > { %v1102_v44 = vpop.f32.mrf.mxu0  ;;  %1689 = vst.msk [vmem:[#allocation2 + $0x3e9] sm:$0xff] %vm1510_vm3, %v1478_v23  ;;  %v4373_v23 = vld [vmem:[%s4679_s29 + $0x98] sm:$0xff] }
 0x120   : > { %v1449_v46 = vmax.f32 %v1230_v38, 0.0  ;;  %v1103_v47 = vadd.f32 %v4751_v35, %v1102_v44 }
 0x122   : > { %1660 = vst.msk [vmem:[#allocation2 + $0x2c1] sm:$0xff] %vm1510_vm3, %v1449_v46  ;;  %v1398_v52 = vmax.f32 %v1103_v47, 0.0  ;;  %4260 = vmatmul.msk.bf16.gmra.mxu0 %vm853_vm2, %v4370_v39  ;;  %4286 = vmatmul.msk.bf16.gmra.mxu2 %vm853_vm2, %v4396_v40  ;;  %v1304_v30 = vpop.f32.mrf.mxu3  ;;  %v4411_v40 = vld [vmem:[%s4679_s29 + $0x1c8] sm:$0xff] }
 0x123   : > { %v2503_v57 = vld [vmem:[#allocation2 + $0xb0] ss:$2 sm:$0xff]  ;;  %v2632_v58 = vld [vmem:[#allocation2 + $0xb1] ss:$2 sm:$0xff]  ;;  %v1305_v39 = vadd.f32 %v4751_v35, %v1304_v30  ;;  %4301 = vmatmul.msk.bf16.gmra.mxu3 %vm853_vm2, %v4411_v40 }
 0x124   : > { %1609 = vst.msk [vmem:[#allocation2 + $0xc9] sm:$0xff] %vm1510_vm3, %v1398_v52  ;;  %v2564_v62 = vmul.f32 %v4870_v1, %v2503_v57  ;;  %v2761_v3 = vld [vmem:[#allocation2 + $0xb2] ss:$2 sm:$0xff]  ;;  %v2693_v7 = vmul.f32 %v4890_v19, %v2632_v58 }
 0x125   : > { %v1232_v60 = vpop.f32.mrf.mxu2  ;;  %v2822_v15 = vmul.f32 %v4904_v37, %v2761_v3  ;;  %v1479_v41 = vmax.f32 %v1305_v39, 0.0  ;;  %v5093_v3 = vld [vmem:[%s5839_s2] ss:$0 sm:$0xff] }
 0x126   : > { %v1233_v4 = vadd.f32 %v4751_v35, %v1232_v60  ;;  %v2596_v6 = vadd.f32 %v2564_v62, %v2467_v59 }
 0x127   : > { %v1104_v5 = vpop.f32.mrf.mxu0  ;;  %1690 = vst.msk [vmem:[#allocation2 + $0x3f1] sm:$0xff] %vm1510_vm3, %v1479_v41  ;;  %v4413_v41 = vld [vmem:[%s4679_s29 + $0x1d8] sm:$0xff] }
 0x128   : > { %v1450_v12 = vmax.f32 %v1233_v4, 0.0  ;;  %v1105_v13 = vadd.f32 %v4751_v35, %v1104_v5  ;;  %v2725_v14 = vadd.f32 %v2693_v7, %v2596_v6 }
 0x12a   : > { %1661 = vst.msk [vmem:[#allocation2 + $0x2d1] sm:$0xff] %vm1510_vm3, %v1450_v12  ;;  %v1399_v16 = vmax.f32 %v1105_v13, 0.0  ;;  %v2854_v17 = vadd.f32 %v2822_v15, %v2725_v14  ;;  %v1307_v45 = vpop.f32.mrf.mxu3  ;;  %v1921_v15 = vmul.f32 %v4801_v11, %v1861_v8 }
 0x12b   : > { %v1308_v49 = vadd.f32 %v4751_v35, %v1307_v45 }
 0x12c   : > { %1610 = vst.msk [vmem:[#allocation2 + $0xd1] sm:$0xff] %vm1510_vm3, %v1399_v16  ;;  %v2890_v22 = vadd.f32 %v4931_v61, %v2854_v17 }
 0x12d   : > { %v1234_v24 = vpop.f32.mrf.mxu2  ;;  %v1480_v50 = vmax.f32 %v1308_v49, 0.0 }
 0x12e   : > { %v1235_v25 = vadd.f32 %v4751_v35, %v1234_v24  ;;  %v2922_v28 = vmax.f32 %v2890_v22, 0.0  ;;  %v1734_v24 = vld [vmem:[#allocation2 + $0xb0] ss:$2 sm:$0xff] }
 0x12f   : > { %v1107_v29 = vpop.f32.mrf.mxu0  ;;  %1691 = vst.msk [vmem:[#allocation2 + $0x3f9] sm:$0xff] %vm1510_vm3, %v1480_v50 }
 0x130   : > { %v1451_v33 = vmax.f32 %v1235_v25, 0.0  ;;  %v1108_v34 = vadd.f32 %v4751_v35, %v1107_v29  ;;  %v2952_v36 = vpack.c.bf16 %v2922_v28, %v2921_v27  ;;  %v1863_v25 = vld [vmem:[#allocation2 + $0xb1] ss:$2 sm:$0xff] }
 0x132   : > { %1662 = vst.msk [vmem:[#allocation2 + $0x2d9] sm:$0xff] %vm1510_vm3, %v1451_v33  ;;  %v1400_v38 = vmax.f32 %v1108_v34, 0.0  ;;  %4261 = vmatmul.msk.bf16.gmra.mxu0 %vm853_vm2, %v4371_v26  ;;  %4317 = vmatmul.msk.bf16.gmra.mxu1 %vm1510_vm3, %v2952_v36  ;;  %v1309_v56 = vpop.f32.mrf.mxu3  ;;  %v2050_v33 = vmul.f32 %v4812_v21, %v1990_v18  ;;  %v1793_v36 = vmul.f32 %v4799_v10, %v1734_v24 }
 0x133   : > { %v1310_v62 = vadd.f32 %v4751_v35, %v1309_v56  ;;  %4302 = vmatmul.msk.bf16.gmra.mxu3 %vm853_vm2, %v4412_v63  ;;  %v2118_v20 = vld [vmem:[#allocation2 + $0xc8] ss:$2 sm:$0xff] }
 0x134   : > { %1611 = vst.msk [vmem:[#allocation2 + $0xd9] sm:$0xff] %vm1510_vm3, %v1400_v38  ;;  %v2178_v34 = vmul.f32 %v4828_v32, %v2118_v20  ;;  %v1922_v38 = vmul.f32 %v4801_v11, %v1863_v25  ;;  %v2376_v56 = vld [vmem:[#allocation2 + $0xca] ss:$2 sm:$0xff] }
 0x135   : > { %v1237_v42 = vpop.f32.mrf.mxu2  ;;  %v1481_v2 = vmax.f32 %v1310_v62, 0.0 }
 0x136   : > { %v1238_v43 = vadd.f32 %v4751_v35, %v1237_v42  ;;  %v1954_v49 = vadd.f32 %v1922_v38, %v1793_v36  ;;  %v4414_v36 = vld [vmem:[%s4679_s29 + $0x1e0] sm:$0xff] }
 0x137   : > { %v1109_v44 = vpop.f32.mrf.mxu0  ;;  %1692 = vst.msk [vmem:[#allocation2 + $0x401] sm:$0xff] %vm1510_vm3, %v1481_v2 }
 0x138   : > { %v1452_v46 = vmax.f32 %v1238_v43, 0.0  ;;  %v1110_v47 = vadd.f32 %v4751_v35, %v1109_v44  ;;  %v1992_v43 = vld [vmem:[#allocation2 + $0xb2] ss:$2 sm:$0xff]  ;;  %v2247_v44 = vld [vmem:[#allocation2 + $0xc9] ss:$2 sm:$0xff] }
 0x13a   : > { %1663 = vst.msk [vmem:[#allocation2 + $0x2e1] sm:$0xff] %vm1510_vm3, %v1452_v46  ;;  %v1401_v48 = vmax.f32 %v1110_v47, 0.0  ;;  %v1312_v7 = vpop.f32.mrf.mxu3 }
 0x13b   : > { %v1313_v13 = vadd.f32 %v5093_v3, %v1312_v7 }
 0x13c   : > { %1612 = vst.msk [vmem:[#allocation2 + $0xe1] sm:$0xff] %vm1510_vm3, %v1401_v48 }
 0x13d   : > { %v1239_v51 = vpop.f32.mrf.mxu2  ;;  %v1482_v16 = vmax.f32 %v1313_v13, 0.0 }
 0x13e   : > { %v1240_v52 = vadd.f32 %v4751_v35, %v1239_v51  ;;  %v2307_v51 = vmul.f32 %v4852_v53, %v2247_v44 }
 0x13f   : > { %v1112_v55 = vpop.f32.mrf.mxu0  ;;  %1693 = vst.msk [vmem:[#allocation2 + $0x411] sm:$0xff] %vm1510_vm3, %v1482_v16  ;;  %v4374_v16 = vld [vmem:[%s4679_s29 + $0xa0] sm:$0xff] }
 0x140   : > { %v1453_v57 = vmax.f32 %v1240_v52, 0.0  ;;  %v1113_v58 = vadd.f32 %v4751_v35, %v1112_v55  ;;  %v1732_v35 = vld [vmem:[#allocation2 + $0xa0] ss:$2 sm:$0xff] }
 0x141   : > { %v1792_v14 = vmul.f32 %v4799_v10, %v1732_v35 }
 0x142   : > { %1664 = vst.msk [vmem:[#allocation2 + $0x2e9] sm:$0xff] %vm1510_vm3, %v1453_v57  ;;  %v1402_v59 = vmax.f32 %v1113_v58, 0.0  ;;  %4262 = vmatmul.msk.bf16.gmra.mxu0 %vm853_vm2, %v4372_v54  ;;  %v1314_v28 = vpop.f32.mrf.mxu3  ;;  %v2051_v54 = vmul.f32 %v4812_v21, %v1992_v43 }
 0x143   : > { %v1953_v26 = vadd.f32 %v1921_v15, %v1792_v14  ;;  %v1315_v40 = vadd.f32 %v5093_v3, %v1314_v28  ;;  %4303 = vmatmul.msk.bf16.gmra.mxu3 %vm853_vm2, %v4413_v41  ;;  %v2120_v46 = vld [vmem:[#allocation2 + $0xd8] ss:$2 sm:$0xff] }
 0x144   : > { %1613 = vst.msk [vmem:[#allocation2 + $0xf1] sm:$0xff] %vm1510_vm3, %v1402_v59  ;;  %v2179_v55 = vmul.f32 %v4828_v32, %v2120_v46  ;;  %v2083_v2 = vadd.f32 %v2051_v54, %v1954_v49 }
 0x145   : > { %v1242_v60 = vpop.f32.mrf.mxu2  ;;  %v2082_v42 = vadd.f32 %v2050_v33, %v1953_v26  ;;  %v1483_v45 = vmax.f32 %v1315_v40, 0.0 }
 0x146   : > { %v1243_v4 = vadd.f32 %v5093_v3, %v1242_v60  ;;  %v2211_v8 = vadd.f32 %v2179_v55, %v2083_v2 }
 0x147   : > { %v1114_v6 = vpop.f32.mrf.mxu0  ;;  %v2210_v47 = vadd.f32 %v2178_v34, %v2082_v42  ;;  %1694 = vst.msk [vmem:[#allocation2 + $0x419] sm:$0xff] %vm1510_vm3, %v1483_v45 }
 0x148   : > { %v1454_v5 = vmax.f32 %v1243_v4, 0.0  ;;  %v1115_v9 = vadd.f32 %v5093_v3, %v1114_v6  ;;  %v2249_v4 = vld [vmem:[#allocation2 + $0xd9] ss:$2 sm:$0xff]  ;;  %v2436_v6 = vmul.f32 %v4868_v0, %v2376_v56 }
 0x149   : > { %v2339_v63 = vadd.f32 %v2307_v51, %v2210_v47  ;;  %v2308_v13 = vmul.f32 %v4852_v53, %v2249_v4 }
 0x14a   : > { %1665 = vst.msk [vmem:[#allocation2 + $0x2f9] sm:$0xff] %vm1510_vm3, %v1454_v5  ;;  %v1403_v12 = vmax.f32 %v1115_v9, 0.0  ;;  %v1317_v58 = vpop.f32.mrf.mxu3 }
 0x14b   : > { %v1318_v35 = vadd.f32 %v5093_v3, %v1317_v58  ;;  %v2468_v5 = vadd.f32 %v2436_v6, %v2339_v63  ;;  %v2340_v20 = vadd.f32 %v2308_v13, %v2211_v8 }
 0x14c   : > { %1614 = vst.msk [vmem:[#allocation2 + $0xf9] sm:$0xff] %vm1510_vm3, %v1403_v12 }
 0x14d   : > { %v1244_v17 = vpop.f32.mrf.mxu2  ;;  %v1484_v9 = vmax.f32 %v1318_v35, 0.0 }
 0x14e   : > { %v1245_v22 = vadd.f32 %v5093_v3, %v1244_v17 }
 0x14f   : > { %v1117_v27 = vpop.f32.mrf.mxu0  ;;  %1695 = vst.msk [vmem:[#allocation2 + $0x421] sm:$0xff] %vm1510_vm3, %v1484_v9 }
 0x150   : > { %v1455_v29 = vmax.f32 %v1245_v22, 0.0  ;;  %v1118_v30 = vadd.f32 %v5093_v3, %v1117_v27  ;;  %v2378_v22 = vld [vmem:[#allocation2 + $0xda] ss:$2 sm:$0xff] }
 0x152   : > { %1666 = vst.msk [vmem:[#allocation2 + $0x301] sm:$0xff] %vm1510_vm3, %v1455_v29  ;;  %v1404_v39 = vmax.f32 %v1118_v30, 0.0  ;;  %4263 = vmatmul.msk.bf16.gmra.mxu0 %vm853_vm2, %v4373_v23  ;;  %v1319_v23 = vpop.f32.mrf.mxu3  ;;  %v2437_v30 = vmul.f32 %v4868_v0, %v2378_v22 }
 0x153   : > { %v2505_v57 = vld [vmem:[#allocation2 + $0xf0] ss:$2 sm:$0xff]  ;;  %v2634_v14 = vld [vmem:[#allocation2 + $0xf1] ss:$2 sm:$0xff]  ;;  %v1320_v27 = vadd.f32 %v5093_v3, %v1319_v23  ;;  %4304 = vmatmul.msk.bf16.gmra.mxu3 %vm853_vm2, %v4414_v36 }
 0x154   : > { %1615 = vst.msk [vmem:[#allocation2 + $0x101] sm:$0xff] %vm1510_vm3, %v1404_v39  ;;  %v2565_v7 = vmul.f32 %v4870_v1, %v2505_v57  ;;  %v2694_v26 = vmul.f32 %v4890_v19, %v2634_v14  ;;  %v2763_v28 = vld [vmem:[#allocation2 + $0xf2] ss:$2 sm:$0xff]  ;;  %v2469_v40 = vadd.f32 %v2437_v30, %v2340_v20 }
 0x155   : > { %v1247_v48 = vpop.f32.mrf.mxu2  ;;  %v1485_v34 = vmax.f32 %v1320_v27, 0.0  ;;  %v2823_v42 = vmul.f32 %v4904_v37, %v2763_v28 }
 0x156   : > { %v1248_v50 = vadd.f32 %v5093_v3, %v1247_v48  ;;  %v2597_v17 = vadd.f32 %v2565_v7, %v2468_v5 }
 0x157   : > { %v1119_v52 = vpop.f32.mrf.mxu0  ;;  %1696 = vst.msk [vmem:[#allocation2 + $0x429] sm:$0xff] %vm1510_vm3, %v1485_v34 }
 0x158   : > { %v1456_v59 = vmax.f32 %v1248_v50, 0.0  ;;  %v1120_v62 = vadd.f32 %v5093_v3, %v1119_v52  ;;  %v2726_v33 = vadd.f32 %v2694_v26, %v2597_v17 }
 0x15a   : > { %1667 = vst.msk [vmem:[#allocation2 + $0x309] sm:$0xff] %vm1510_vm3, %v1456_v59  ;;  %v1405_v60 = vmax.f32 %v1120_v62, 0.0  ;;  %v2855_v48 = vadd.f32 %v2823_v42, %v2726_v33  ;;  %v1322_v50 = vpop.f32.mrf.mxu3 }
 0x15b   : > { %v1323_v59 = vadd.f32 %v5093_v3, %v1322_v50 }
 0x15c   : > { %1616 = vst.msk [vmem:[#allocation2 + $0x109] sm:$0xff] %vm1510_vm3, %v1405_v60  ;;  %v2891_v58 = vadd.f32 %v4931_v61, %v2855_v48  ;;  %v5171_v60 = vld [vmem:[%s5843_s6] ss:$0 sm:$0xff] }
 0x15d   : > { %v1249_v12 = vpop.f32.mrf.mxu2  ;;  %v1486_v63 = vmax.f32 %v1323_v59, 0.0 }
 0x15e   : > { %v1250_v15 = vadd.f32 %v5093_v3, %v1249_v12  ;;  %v2923_v6 = vmax.f32 %v2891_v58, 0.0 }
 0x15f   : > { %v1122_v18 = vpop.f32.mrf.mxu0  ;;  %1697 = vst.msk [vmem:[#allocation2 + $0x439] sm:$0xff] %vm1510_vm3, %v1486_v63 }
 0x160   : > { %v1457_v24 = vmax.f32 %v1250_v15, 0.0  ;;  %v1123_v25 = vadd.f32 %v5093_v3, %v1122_v18 }
 0x162   : > { %1668 = vst.msk [vmem:[#allocation2 + $0x311] sm:$0xff] %vm1510_vm3, %v1457_v24  ;;  %v1406_v29 = vmax.f32 %v1123_v25, 0.0  ;;  %4264 = vmatmul.msk.bf16.gmra.mxu0 %vm853_vm2, %v4374_v16  ;;  %v1324_v8 = vpop.f32.mrf.mxu3  ;;  %v4415_v16 = vld [vmem:[%s4679_s29 + $0x1e8] sm:$0xff] }
 0x163   : > { %v2507_v38 = vld [vmem:[#allocation2 + $0x100] ss:$2 sm:$0xff]  ;;  %v2636_v39 = vld [vmem:[#allocation2 + $0x101] ss:$2 sm:$0xff]  ;;  %v1325_v15 = vadd.f32 %v5093_v3, %v1324_v8  ;;  %4305 = vmatmul.msk.bf16.gmra.mxu3 %vm853_vm2, %v4415_v16 }
 0x164   : > { %1617 = vst.msk [vmem:[#allocation2 + $0x119] sm:$0xff] %vm1510_vm3, %v1406_v29  ;;  %v2566_v41 = vmul.f32 %v4870_v1, %v2507_v38  ;;  %v2765_v44 = vld [vmem:[#allocation2 + $0x102] ss:$2 sm:$0xff]  ;;  %v2695_v47 = vmul.f32 %v4890_v19, %v2636_v39 }
 0x165   : > { %v1252_v43 = vpop.f32.mrf.mxu2  ;;  %v2824_v55 = vmul.f32 %v4904_v37, %v2765_v44  ;;  %v1487_v18 = vmax.f32 %v1325_v15, 0.0 }
 0x166   : > { %v1253_v45 = vadd.f32 %v5093_v3, %v1252_v43  ;;  %v2598_v46 = vadd.f32 %v2566_v41, %v2469_v40 }
 0x167   : > { %v1124_v49 = vpop.f32.mrf.mxu0  ;;  %1698 = vst.msk [vmem:[#allocation2 + $0x441] sm:$0xff] %vm1510_vm3, %v1487_v18 }
 0x168   : > { %v1458_v51 = vmax.f32 %v1253_v45, 0.0  ;;  %v1125_v52 = vadd.f32 %v5093_v3, %v1124_v49  ;;  %v2727_v54 = vadd.f32 %v2695_v47, %v2598_v46  ;;  %v4416_v45 = vld [vmem:[%s4679_s29 + $0x1f0] sm:$0xff] }
 0x16a   : > { %1669 = vst.msk [vmem:[#allocation2 + $0x321] sm:$0xff] %vm1510_vm3, %v1458_v51  ;;  %v1407_v56 = vmax.f32 %v1125_v52, 0.0  ;;  %v2856_v57 = vadd.f32 %v2824_v55, %v2727_v54  ;;  %v1327_v24 = vpop.f32.mrf.mxu3  ;;  %v1736_v51 = vld [vmem:[#allocation2 + $0xf0] ss:$2 sm:$0xff]  ;;  %v1865_v52 = vld [vmem:[#allocation2 + $0xf1] ss:$2 sm:$0xff] }
 0x16b   : > { %v1328_v30 = vadd.f32 %v5093_v3, %v1327_v24  ;;  %v1794_v58 = vmul.f32 %v4799_v10, %v1736_v51  ;;  %v1923_v59 = vmul.f32 %v4801_v11, %v1865_v52 }
 0x16c   : > { %1618 = vst.msk [vmem:[#allocation2 + $0x121] sm:$0xff] %vm1510_vm3, %v1407_v56  ;;  %v2892_v62 = vadd.f32 %v4931_v61, %v2856_v57 }
 0x16d   : > { %v1254_v2 = vpop.f32.mrf.mxu2  ;;  %v1488_v34 = vmax.f32 %v1328_v30, 0.0  ;;  %v1955_v8 = vadd.f32 %v1923_v59, %v1794_v58 }
 0x16e   : > { %v1255_v4 = vadd.f32 %v5093_v3, %v1254_v2  ;;  %v2924_v7 = vmax.f32 %v2892_v62, 0.0  ;;  %v1994_v2 = vld [vmem:[#allocation2 + $0xf2] ss:$2 sm:$0xff] }
 0x16f   : > { %v1127_v35 = vpop.f32.mrf.mxu0  ;;  %1699 = vst.msk [vmem:[#allocation2 + $0x449] sm:$0xff] %vm1510_vm3, %v1488_v34 }
 0x170   : > { %v1459_v5 = vmax.f32 %v1255_v4, 0.0  ;;  %v1128_v9 = vadd.f32 %v5093_v3, %v1127_v35  ;;  %v3044_v61 = vpop.f32.mrf.mxu1  ;;  %v2953_v12 = vpack.c.bf16 %v2924_v7, %v2923_v6  ;;  %v1738_v7 = vld [vmem:[#allocation2 + $0x100] ss:$2 sm:$0xff]  ;;  %v1867_v35 = vld [vmem:[#allocation2 + $0x101] ss:$2 sm:$0xff] }
 0x171   : > { %v3045_v13 = vadd.f32 %v5171_v60, %v3044_v61  ;;  %v1795_v15 = vmul.f32 %v4799_v10, %v1738_v7  ;;  %v1924_v16 = vmul.f32 %v4801_v11, %v1867_v35 }
 0x172   : > { %1670 = vst.msk [vmem:[#allocation2 + $0x329] sm:$0xff] %vm1510_vm3, %v1459_v5  ;;  %v1408_v14 = vmax.f32 %v1128_v9, 0.0  ;;  %4318 = vmatmul.msk.bf16.gmra.mxu1 %vm1510_vm3, %v2953_v12  ;;  %v1329_v40 = vpop.f32.mrf.mxu3 }
 0x173   : > { %v3124_v17 = vmax.f32 %v3045_v13, 0.0  ;;  %v1330_v44 = vadd.f32 %v5093_v3, %v1329_v40  ;;  %4306 = vmatmul.msk.bf16.gmra.mxu3 %vm853_vm2, %v4416_v45  ;;  %v2122_v4 = vld [vmem:[#allocation2 + $0x118] ss:$2 sm:$0xff]  ;;  %v2052_v13 = vmul.f32 %v4812_v21, %v1994_v2 }
 0x174   : > { %1619 = vst.msk [vmem:[#allocation2 + $0x129] sm:$0xff] %vm1510_vm3, %v1408_v14  ;;  %v2180_v14 = vmul.f32 %v4828_v32, %v2122_v4 }
 0x175   : > { %3203 = vst.msk [vmem:[#allocation3 + $0x19] sm:$0xff] %vm3156_vm6, %v3124_v17  ;;  %v1257_v20 = vpop.f32.mrf.mxu2  ;;  %v1489_v46 = vmax.f32 %v1330_v44, 0.0 }
 0x176   : > { %v1258_v22 = vadd.f32 %v5093_v3, %v1257_v20  ;;  %v4417_v20 = vld [vmem:[%s4679_s29 + $0x1f8] sm:$0xff]  ;;  %s3977_s29 = sshll.u32 %s377_s25, 5 }
 0x177   : > { %v1129_v23 = vpop.f32.mrf.mxu0  ;;  %1700 = vst.msk [vmem:[#allocation2 + $0x451] sm:$0xff] %vm1510_vm3, %v1489_v46  ;;  %s379_s30 = scalar_lea.vmem [#allocation4], %s3977_s29 }
 0x178   : > { %v1460_v25 = vmax.f32 %v1258_v22, 0.0  ;;  %v1130_v26 = vadd.f32 %v5093_v3, %v1129_v23  ;;  %v3046_v27 = vpop.f32.mrf.mxu1  ;;  %v2084_v22 = vadd.f32 %v2052_v13, %v1955_v8  ;;  %v2251_v23 = vld [vmem:[#allocation2 + $0x119] ss:$2 sm:$0xff]  ;;  %s3672_s16 = sshll.u32 %s379_s30, 4  ;;  %s3673_s16 = int_to_ptr.vmem [resolvable:$true] %s3672_s16 }
 0x179   : > { %v3047_v28 = vadd.f32 %v5171_v60, %v3046_v27 }
 0x17a   : > { %1671 = vst.msk [vmem:[#allocation2 + $0x331] sm:$0xff] %vm1510_vm3, %v1460_v25  ;;  %v1409_v29 = vmax.f32 %v1130_v26, 0.0  ;;  %v1332_v50 = vpop.f32.mrf.mxu3  ;;  %v1996_v25 = vld [vmem:[#allocation2 + $0x102] ss:$2 sm:$0xff]  ;;  %v2212_v27 = vadd.f32 %v2180_v14, %v2084_v22 }
 0x17b   : > { %v3125_v33 = vmax.f32 %v3047_v28, 0.0  ;;  %v1333_v57 = vadd.f32 %v5093_v3, %v1332_v50 }
 0x17c   : > { %1620 = vst.msk [vmem:[#allocation2 + $0x131] sm:$0xff] %vm1510_vm3, %v1409_v29  ;;  %v1956_v29 = vadd.f32 %v1924_v16, %v1795_v15 }
 0x17d   : > { %3204 = vst.msk [vmem:[#allocation3 + $0x21] sm:$0xff] %vm3156_vm6, %v3125_v33  ;;  %v1259_v36 = vpop.f32.mrf.mxu2  ;;  %v1490_v62 = vmax.f32 %v1333_v57, 0.0  ;;  %v2309_v33 = vmul.f32 %v4852_v53, %v2251_v23 }
 0x17e   : > { %v1260_v38 = vadd.f32 %v5093_v3, %v1259_v36  ;;  %v2053_v36 = vmul.f32 %v4812_v21, %v1996_v25 }
 0x17f   : > { %v1132_v39 = vpop.f32.mrf.mxu0  ;;  %1701 = vst.msk [vmem:[#allocation2 + $0x461] sm:$0xff] %vm1510_vm3, %v1490_v62  ;;  %v2341_v44 = vadd.f32 %v2309_v33, %v2212_v27 }
 0x180   : > { %v1461_v41 = vmax.f32 %v1260_v38, 0.0  ;;  %v1133_v42 = vadd.f32 %v5093_v3, %v1132_v39  ;;  %v2380_v39 = vld [vmem:[#allocation2 + $0x11a] ss:$2 sm:$0xff]  ;;  %v2085_v46 = vadd.f32 %v2053_v36, %v1956_v29 }
 0x182   : > { %1672 = vst.msk [vmem:[#allocation2 + $0x339] sm:$0xff] %vm1510_vm3, %v1461_v41  ;;  %v1410_v43 = vmax.f32 %v1133_v42, 0.0  ;;  %v1334_v9 = vpop.f32.mrf.mxu3 }
 0x183   : > { %v1335_v18 = vadd.f32 %v5093_v3, %v1334_v9  ;;  %4307 = vmatmul.msk.bf16.gmra.mxu3 %vm853_vm2, %v4417_v20  ;;  %v2124_v26 = vld [vmem:[#allocation2 + $0x128] ss:$2 sm:$0xff] }
 0x184   : > { %1621 = vst.msk [vmem:[#allocation2 + $0x141] sm:$0xff] %vm1510_vm3, %v1410_v43  ;;  %v2181_v38 = vmul.f32 %v4828_v32, %v2124_v26  ;;  %v2382_v2 = vld [vmem:[#allocation2 + $0x12a] ss:$2 sm:$0xff] }
 0x185   : > { %v1262_v47 = vpop.f32.mrf.mxu2  ;;  %v1491_v24 = vmax.f32 %v1335_v18, 0.0 }
 0x186   : > { %v1263_v48 = vadd.f32 %v5093_v3, %v1262_v47  ;;  %v2213_v52 = vadd.f32 %v2181_v38, %v2085_v46 }
 0x187   : > { %v1134_v49 = vpop.f32.mrf.mxu0  ;;  %1702 = vst.msk [vmem:[#allocation2 + $0x469] sm:$0xff] %vm1510_vm3, %v1491_v24 }
 0x188   : > { %v1462_v54 = vmax.f32 %v1263_v48, 0.0  ;;  %v1135_v55 = vadd.f32 %v5093_v3, %v1134_v49  ;;  %v2253_v48 = vld [vmem:[#allocation2 + $0x129] ss:$2 sm:$0xff]  ;;  %v2438_v49 = vmul.f32 %v4868_v0, %v2380_v39 }
 0x18a   : > { %1673 = vst.msk [vmem:[#allocation2 + $0x349] sm:$0xff] %vm1510_vm3, %v1462_v54  ;;  %v1411_v56 = vmax.f32 %v1135_v55, 0.0  ;;  %v1337_v41 = vpop.f32.mrf.mxu3  ;;  %v2470_v54 = vadd.f32 %v2438_v49, %v2341_v44 }
 0x18b   : > { %v1338_v45 = vadd.f32 %v5093_v3, %v1337_v41 }
 0x18c   : > { %1622 = vst.msk [vmem:[#allocation2 + $0x149] sm:$0xff] %vm1510_vm3, %v1411_v56  ;;  %v2310_v56 = vmul.f32 %v4852_v53, %v2253_v48 }
 0x18d   : > { %v1264_v63 = vpop.f32.mrf.mxu2  ;;  %v1492_v51 = vmax.f32 %v1338_v45, 0.0 }
 0x18e   : > { %v1265_v6 = vadd.f32 %v5093_v3, %v1264_v63  ;;  %v2342_v63 = vadd.f32 %v2310_v56, %v2213_v52 }
 0x18f   : > { %v1137_v5 = vpop.f32.mrf.mxu0  ;;  %1703 = vst.msk [vmem:[#allocation2 + $0x471] sm:$0xff] %vm1510_vm3, %v1492_v51 }
 0x190   : > { %v1463_v61 = vmax.f32 %v1265_v6, 0.0  ;;  %v1138_v12 = vadd.f32 %v5093_v3, %v1137_v5 }
 0x192   : > { %1674 = vst.msk [vmem:[#allocation2 + $0x351] sm:$0xff] %vm1510_vm3, %v1463_v61  ;;  %v1412_v17 = vmax.f32 %v1138_v12, 0.0  ;;  %v1339_v4 = vpop.f32.mrf.mxu3  ;;  %v2439_v61 = vmul.f32 %v4868_v0, %v2382_v2 }
 0x193   : > { %v2509_v40 = vld [vmem:[#allocation2 + $0x140] ss:$2 sm:$0xff]  ;;  %v2638_v57 = vld [vmem:[#allocation2 + $0x141] ss:$2 sm:$0xff]  ;;  %v1340_v8 = vadd.f32 %v5093_v3, %v1339_v4 }
 0x194   : > { %1623 = vst.msk [vmem:[#allocation2 + $0x151] sm:$0xff] %vm1510_vm3, %v1412_v17  ;;  %v2567_v50 = vmul.f32 %v4870_v1, %v2509_v40  ;;  %v2696_v35 = vmul.f32 %v4890_v19, %v2638_v57  ;;  %v2767_v5 = vld [vmem:[#allocation2 + $0x142] ss:$2 sm:$0xff]  ;;  %v2471_v16 = vadd.f32 %v2439_v61, %v2342_v63  ;;  %v5276_v40 = vld [vmem:[%s5841_s4] ss:$0 sm:$0xff] }
 0x195   : > { %v1267_v28 = vpop.f32.mrf.mxu2  ;;  %v1493_v13 = vmax.f32 %v1340_v8, 0.0  ;;  %v2825_v20 = vmul.f32 %v4904_v37, %v2767_v5 }
 0x196   : > { %v1268_v30 = vadd.f32 %v5093_v3, %v1267_v28  ;;  %v2599_v59 = vadd.f32 %v2567_v50, %v2470_v54 }
 0x197   : > { %v1139_v34 = vpop.f32.mrf.mxu0  ;;  %1704 = vst.msk [vmem:[#allocation2 + $0x479] sm:$0xff] %vm1510_vm3, %v1493_v13 }
 0x198   : > { %v1464_v42 = vmax.f32 %v1268_v30, 0.0  ;;  %v1140_v43 = vadd.f32 %v5093_v3, %v1139_v34  ;;  %v2728_v12 = vadd.f32 %v2696_v35, %v2599_v59 }
 0x19a   : > { %1675 = vst.msk [vmem:[#allocation2 + $0x359] sm:$0xff] %vm1510_vm3, %v1464_v42  ;;  %v1413_v47 = vmax.f32 %v1140_v43, 0.0  ;;  %v2857_v26 = vadd.f32 %v2825_v20, %v2728_v12  ;;  %v1342_v29 = vpop.f32.mrf.mxu3 }
 0x19b   : > { %v1343_v36 = vadd.f32 %v5093_v3, %v1342_v29 }
 0x19c   : > { %1624 = vst.msk [vmem:[#allocation2 + $0x159] sm:$0xff] %vm1510_vm3, %v1413_v47  ;;  %v2893_v41 = vadd.f32 %v5276_v40, %v2857_v26 }
 0x19d   : > { %v1269_v55 = vpop.f32.mrf.mxu2  ;;  %v1494_v42 = vmax.f32 %v1343_v36, 0.0 }
 0x19e   : > { %v1270_v58 = vadd.f32 %v5093_v3, %v1269_v55  ;;  %v2925_v45 = vmax.f32 %v2893_v41, 0.0 }
 0x19f   : > { %v1142_v62 = vpop.f32.mrf.mxu0  ;;  %1705 = vst.msk [vmem:[#allocation2 + $0x489] sm:$0xff] %vm1510_vm3, %v1494_v42 }
 0x1a0   : > { %v1465_v6 = vmax.f32 %v1270_v58, 0.0  ;;  %v1143_v7 = vadd.f32 %v5093_v3, %v1142_v62 }
 0x1a2   : > { %1676 = vst.msk [vmem:[#allocation2 + $0x361] sm:$0xff] %vm1510_vm3, %v1465_v6  ;;  %v1414_v9 = vmax.f32 %v1143_v7, 0.0  ;;  %v1344_v54 = vpop.f32.mrf.mxu3 }
 0x1a3   : > { %v2511_v14 = vld [vmem:[#allocation2 + $0x150] ss:$2 sm:$0xff]  ;;  %v2640_v15 = vld [vmem:[#allocation2 + $0x151] ss:$2 sm:$0xff]  ;;  %v1345_v55 = vadd.f32 %v5093_v3, %v1344_v54 }
 0x1a4   : > { %1625 = vst.msk [vmem:[#allocation2 + $0x169] sm:$0xff] %vm1510_vm3, %v1414_v9  ;;  %v2568_v17 = vmul.f32 %v4870_v1, %v2511_v14  ;;  %v2769_v18 = vld [vmem:[#allocation2 + $0x152] ss:$2 sm:$0xff]  ;;  %v2697_v25 = vmul.f32 %v4890_v19, %v2640_v15 }
 0x1a5   : > { %v1272_v22 = vpop.f32.mrf.mxu2  ;;  %v2826_v28 = vmul.f32 %v4904_v37, %v2769_v18  ;;  %v1495_v58 = vmax.f32 %v1345_v55, 0.0 }
 0x1a6   : > { %v1273_v23 = vadd.f32 %v5093_v3, %v1272_v22  ;;  %v2600_v24 = vadd.f32 %v2568_v17, %v2471_v16  ;;  %v1740_v16 = vld [vmem:[#allocation2 + $0x140] ss:$2 sm:$0xff]  ;;  %v1869_v17 = vld [vmem:[#allocation2 + $0x141] ss:$2 sm:$0xff] }
 0x1a7   : > { %v1144_v27 = vpop.f32.mrf.mxu0  ;;  %1706 = vst.msk [vmem:[#allocation2 + $0x491] sm:$0xff] %vm1510_vm3, %v1495_v58 }
 0x1a8   : > { %v1466_v30 = vmax.f32 %v1273_v23, 0.0  ;;  %v1145_v33 = vadd.f32 %v5093_v3, %v1144_v27  ;;  %v2729_v34 = vadd.f32 %v2697_v25, %v2600_v24  ;;  %v1796_v24 = vmul.f32 %v4799_v10, %v1740_v16  ;;  %v1998_v27 = vld [vmem:[#allocation2 + $0x142] ss:$2 sm:$0xff] }
 0x1a9   : > { %v1925_v25 = vmul.f32 %v4801_v11, %v1869_v17 }
 0x1aa   : > { %1677 = vst.msk [vmem:[#allocation2 + $0x371] sm:$0xff] %vm1510_vm3, %v1466_v30  ;;  %v1415_v38 = vmax.f32 %v1145_v33, 0.0  ;;  %v2858_v39 = vadd.f32 %v2826_v28, %v2729_v34  ;;  %v1347_v4 = vpop.f32.mrf.mxu3  ;;  %v1742_v33 = vld [vmem:[#allocation2 + $0x150] ss:$2 sm:$0xff]  ;;  %v1871_v34 = vld [vmem:[#allocation2 + $0x151] ss:$2 sm:$0xff] }
 0x1ab   : > { %v1348_v6 = vadd.f32 %v5093_v3, %v1347_v4  ;;  %v1957_v29 = vadd.f32 %v1925_v25, %v1796_v24  ;;  %v1748_v25 = vld [vmem:[#allocation2 + $0x1e0] ss:$2 sm:$0xff] }
 0x1ac   : > { %1626 = vst.msk [vmem:[#allocation2 + $0x171] sm:$0xff] %vm1510_vm3, %v1415_v38  ;;  %v2894_v43 = vadd.f32 %v5276_v40, %v2858_v39  ;;  %v2054_v39 = vmul.f32 %v4812_v21, %v1998_v27 }
 0x1ad   : > { %v1274_v44 = vpop.f32.mrf.mxu2  ;;  %v1496_v8 = vmax.f32 %v1348_v6, 0.0 }
 0x1ae   : > { %v1275_v31 = vadd.f32 %v5093_v3, %v1274_v44  ;;  %v2926_v46 = vmax.f32 %v2894_v43, 0.0  ;;  %v1797_v44 = vmul.f32 %v4799_v10, %v1742_v33 }
 0x1af   : > { %v1147_v47 = vpop.f32.mrf.mxu0  ;;  %v3049_v48 = vpop.f32.mrf.mxu1  ;;  %1707 = vst.msk [vmem:[#allocation2 + $0x499] sm:$0xff] %vm1510_vm3, %v1496_v8 }
 0x1b0   : > { %v1467_v49 = vmax.f32 %v1275_v31, 0.0  ;;  %v1148_v50 = vadd.f32 %v5093_v3, %v1147_v47  ;;  %v3050_v51 = vadd.f32 %v5171_v60, %v3049_v48  ;;  %v2954_v52 = vpack.c.bf16 %v2926_v46, %v2925_v45 }
 0x1b1   : > { %v1926_v31 = vmul.f32 %v4801_v11, %v1871_v34  ;;  %v2086_v45 = vadd.f32 %v2054_v39, %v1957_v29  ;;  %v1750_v29 = vld [vmem:[#allocation2 + $0x1f0] ss:$2 sm:$0xff] }
 0x1b2   : > { %1678 = vst.msk [vmem:[#allocation2 + $0x379] sm:$0xff] %vm1510_vm3, %v1467_v49  ;;  %v1416_v56 = vmax.f32 %v1148_v50, 0.0  ;;  %v3126_v57 = vmax.f32 %v3050_v51, 0.0  ;;  %4319 = vmatmul.msk.bf16.gmra.mxu1 %vm1510_vm3, %v2954_v52  ;;  %v1349_v61 = vpop.f32.mrf.mxu3  ;;  %v2000_v49 = vld [vmem:[#allocation2 + $0x152] ss:$2 sm:$0xff] }
 0x1b3   : > { %v1350_v12 = vadd.f32 %v5093_v3, %v1349_v61  ;;  %v2126_v28 = vld [vmem:[#allocation2 + $0x168] ss:$2 sm:$0xff]  ;;  %v2255_v47 = vld [vmem:[#allocation2 + $0x169] ss:$2 sm:$0xff]  ;;  %v1958_v51 = vadd.f32 %v1926_v31, %v1797_v44  ;;  %v2055_v58 = vmul.f32 %v4812_v21, %v2000_v49  ;;  %v1800_v44 = vmul.f32 %v4799_v10, %v1748_v25 }
 0x1b4   : > { %1627 = vst.msk [vmem:[#allocation2 + $0x179] sm:$0xff] %vm1510_vm3, %v1416_v56  ;;  %v2182_v41 = vmul.f32 %v4828_v32, %v2126_v28  ;;  %v2311_v52 = vmul.f32 %v4852_v53, %v2255_v47  ;;  %v2384_v55 = vld [vmem:[#allocation2 + $0x16a] ss:$2 sm:$0xff]  ;;  %v1801_v31 = vmul.f32 %v4799_v10, %v1750_v29 }
 0x1b5   : > { %3205 = vst.msk [vmem:[#allocation3 + $0x31] sm:$0xff] %vm3156_vm6, %v3126_v57  ;;  %v1497_v14 = vmax.f32 %v1350_v12, 0.0  ;;  %v2087_v6 = vadd.f32 %v2055_v58, %v1958_v51 }
 0x1b6   : > { %v2214_v48 = vadd.f32 %v2182_v41, %v2086_v45 }
 0x1b7   : > { %v1149_v59 = vpop.f32.mrf.mxu0  ;;  %v3051_v62 = vpop.f32.mrf.mxu1  ;;  %1708 = vst.msk [vmem:[#allocation2 + $0x4a1] sm:$0xff] %vm1510_vm3, %v1497_v14 }
 0x1b8   : > { %v1150_v63 = vadd.f32 %v5093_v3, %v1149_v59  ;;  %v3052_v2 = vadd.f32 %v5171_v60, %v3051_v62  ;;  %v2343_v62 = vadd.f32 %v2311_v52, %v2214_v48  ;;  %v2008_v52 = vld [vmem:[#allocation2 + $0x1f2] ss:$2 sm:$0xff] }
 0x1ba   : > { %v1417_v7 = vmax.f32 %v1150_v63, 0.0  ;;  %v3127_v35 = vmax.f32 %v3052_v2, 0.0  ;;  %v1352_v20 = vpop.f32.mrf.mxu3 }
 0x1bb   : > { %v1353_v22 = vadd.f32 %v5093_v3, %v1352_v20 }
 0x1bc   : > { %1628 = vst.msk [vmem:[#allocation2 + $0x181] sm:$0xff] %vm1510_vm3, %v1417_v7  ;;  %v2440_v7 = vmul.f32 %v4868_v0, %v2384_v55 }
 0x1bd   : > { %3206 = vst.msk [vmem:[#allocation3 + $0x39] sm:$0xff] %vm3156_vm6, %v3127_v35  ;;  %v1498_v26 = vmax.f32 %v1353_v22, 0.0 }
 0x1be   : > { %v2472_v61 = vadd.f32 %v2440_v7, %v2343_v62  ;;  %v4424_v62 = vld [vmem:[%s5846_s9 + $0x10] sm:$0xff] }
 0x1bf   : > { %v1152_v5 = vpop.f32.mrf.mxu0  ;;  %1709 = vst.msk [vmem:[#allocation2 + $0x4b1] sm:$0xff] %vm1510_vm3, %v1498_v26  ;;  %3602 = vmatpush.bf16.msrb.mxu2 %v4424_v62 }
 0x1c0   : > { %v1153_v9 = vadd.f32 %v5093_v3, %v1152_v5 }
 0x1c2   : > { %v1418_v13 = vmax.f32 %v1153_v9, 0.0  ;;  %v1354_v38 = vpop.f32.mrf.mxu3 }
 0x1c3   : > { %v1355_v42 = vadd.f32 %v5093_v3, %v1354_v38  ;;  %v2128_v50 = vld [vmem:[#allocation2 + $0x178] ss:$2 sm:$0xff]  ;;  %v2257_v8 = vld [vmem:[#allocation2 + $0x179] ss:$2 sm:$0xff] }
 0x1c4   : > { %1629 = vst.msk [vmem:[#allocation2 + $0x191] sm:$0xff] %vm1510_vm3, %v1418_v13  ;;  %v2183_v59 = vmul.f32 %v4828_v32, %v2128_v50  ;;  %v2312_v13 = vmul.f32 %v4852_v53, %v2257_v8  ;;  %v2386_v16 = vld [vmem:[#allocation2 + $0x17a] ss:$2 sm:$0xff] }
 0x1c5   : > { %v1499_v46 = vmax.f32 %v1355_v42, 0.0  ;;  %v2441_v27 = vmul.f32 %v4868_v0, %v2386_v16  ;;  %v2006_v50 = vld [vmem:[#allocation2 + $0x1e2] ss:$2 sm:$0xff] }
 0x1c6   : > { %v2215_v9 = vadd.f32 %v2183_v59, %v2087_v6  ;;  %v2058_v7 = vmul.f32 %v4812_v21, %v2006_v50 }
 0x1c7   : > { %v1154_v15 = vpop.f32.mrf.mxu0  ;;  %1710 = vst.msk [vmem:[#allocation2 + $0x4b9] sm:$0xff] %vm1510_vm3, %v1499_v46 }
 0x1c8   : > { %v1155_v18 = vadd.f32 %v5093_v3, %v1154_v15 }
 0x1ca   : > { %v1419_v23 = vmax.f32 %v1155_v18, 0.0  ;;  %v1357_v63 = vpop.f32.mrf.mxu3  ;;  %v2344_v18 = vadd.f32 %v2312_v13, %v2215_v9 }
 0x1cb   : > { %v1358_v2 = vadd.f32 %v5093_v3, %v1357_v63 }
 0x1cc   : > { %1630 = vst.msk [vmem:[#allocation2 + $0x199] sm:$0xff] %vm1510_vm3, %v1419_v23  ;;  %v2473_v38 = vadd.f32 %v2441_v27, %v2344_v18  ;;  %v2136_v18 = vld [vmem:[#allocation2 + $0x218] ss:$2 sm:$0xff] }
 0x1cd   : > { %v1500_v5 = vmax.f32 %v1358_v2, 0.0 }
 0x1cf   : > { %v1157_v30 = vpop.f32.mrf.mxu0  ;;  %1711 = vst.msk [vmem:[#allocation2 + $0x4c1] sm:$0xff] %vm1510_vm3, %v1500_v5 }
 0x1d0   : > { %v1158_v36 = vadd.f32 %v5093_v3, %v1157_v30  ;;  %v1877_v30 = vld [vmem:[#allocation2 + $0x1e1] ss:$2 sm:$0xff] }
 0x1d1   : > { %v1929_v45 = vmul.f32 %v4801_v11, %v1877_v30  ;;  %v2187_v30 = vmul.f32 %v4828_v32, %v2136_v18 }
 0x1d2   : > { %v1420_v43 = vmax.f32 %v1158_v36, 0.0  ;;  %v1359_v22 = vpop.f32.mrf.mxu3  ;;  %v1879_v36 = vld [vmem:[#allocation2 + $0x1f1] ss:$2 sm:$0xff] }
 0x1d3   : > { %v2513_v56 = vld [vmem:[#allocation2 + $0x190] ss:$2 sm:$0xff]  ;;  %v2642_v12 = vld [vmem:[#allocation2 + $0x191] ss:$2 sm:$0xff]  ;;  %v1360_v24 = vadd.f32 %v5093_v3, %v1359_v22  ;;  %v1930_v49 = vmul.f32 %v4801_v11, %v1879_v36  ;;  %v1961_v6 = vadd.f32 %v1929_v45, %v1800_v44 }
 0x1d4   : > { %1631 = vst.msk [vmem:[#allocation2 + $0x1a1] sm:$0xff] %vm1510_vm3, %v1420_v43  ;;  %v2569_v35 = vmul.f32 %v4870_v1, %v2513_v56  ;;  %v2698_v20 = vmul.f32 %v4890_v19, %v2642_v12  ;;  %v2771_v23 = vld [vmem:[#allocation2 + $0x192] ss:$2 sm:$0xff]  ;;  %v1873_v59 = vld [vmem:[#allocation2 + $0x191] ss:$2 sm:$0xff] }
 0x1d5   : > { %v2827_v41 = vmul.f32 %v4904_v37, %v2771_v23  ;;  %v1501_v42 = vmax.f32 %v1360_v24, 0.0  ;;  %v1744_v58 = vld [vmem:[#allocation2 + $0x190] ss:$2 sm:$0xff]  ;;  %v1962_v9 = vadd.f32 %v1930_v49, %v1801_v31  ;;  %v1927_v13 = vmul.f32 %v4801_v11, %v1873_v59  ;;  %v2261_v49 = vld [vmem:[#allocation2 + $0x1c9] ss:$2 sm:$0xff] }
 0x1d6   : > { %v2601_v14 = vadd.f32 %v2569_v35, %v2472_v61  ;;  %v1798_v12 = vmul.f32 %v4799_v10, %v1744_v58  ;;  %v2002_v23 = vld [vmem:[#allocation2 + $0x192] ss:$2 sm:$0xff] }
 0x1d7   : > { %v1159_v54 = vpop.f32.mrf.mxu0  ;;  %1712 = vst.msk [vmem:[#allocation2 + $0x4c9] sm:$0xff] %vm1510_vm3, %v1501_v42  ;;  %v2056_v42 = vmul.f32 %v4812_v21, %v2002_v23  ;;  %v2392_v31 = vld [vmem:[#allocation2 + $0x20a] ss:$2 sm:$0xff]  ;;  %v2394_v45 = vld [vmem:[#allocation2 + $0x21a] ss:$2 sm:$0xff] }
 0x1d8   : > { %v1160_v57 = vadd.f32 %v5093_v3, %v1159_v54  ;;  %v2730_v28 = vadd.f32 %v2698_v20, %v2601_v14  ;;  %v2059_v14 = vmul.f32 %v4812_v21, %v2008_v52  ;;  %v1881_v52 = vld [vmem:[#allocation2 + $0x231] ss:$2 sm:$0xff] }
 0x1da   : > { %v1421_v4 = vmax.f32 %v1160_v57, 0.0  ;;  %v2859_v48 = vadd.f32 %v2827_v41, %v2730_v28  ;;  %v1362_v57 = vpop.f32.mrf.mxu3  ;;  %v2090_v28 = vadd.f32 %v2058_v7, %v1961_v6  ;;  %v2091_v29 = vadd.f32 %v2059_v14, %v1962_v9  ;;  %v2265_v41 = vld [vmem:[#allocation2 + $0x219] ss:$2 sm:$0xff]  ;;  %v2390_v6 = vld [vmem:[#allocation2 + $0x1ca] ss:$2 sm:$0xff] }
 0x1db   : > { %v1363_v63 = vadd.f32 %v5093_v3, %v1362_v57  ;;  %v2316_v62 = vmul.f32 %v4852_v53, %v2265_v41  ;;  %v2445_v9 = vmul.f32 %v4868_v0, %v2394_v45  ;;  %v2443_v18 = vmul.f32 %v4868_v0, %v2390_v6  ;;  %v2140_v6 = vld [vmem:[#allocation2 + $0x268] ss:$2 sm:$0xff] }
 0x1dc   : > { %1632 = vst.msk [vmem:[#allocation2 + $0x1a9] sm:$0xff] %vm1510_vm3, %v1421_v4  ;;  %v2895_v5 = vadd.f32 %v5276_v40, %v2859_v48  ;;  %v2219_v59 = vadd.f32 %v2187_v30, %v2091_v29  ;;  %v2010_v30 = vld [vmem:[#allocation2 + $0x232] ss:$2 sm:$0xff] }
 0x1dd   : > { %v1502_v61 = vmax.f32 %v1363_v63, 0.0 }
 0x1de   : > { %v2927_v20 = vmax.f32 %v2895_v5, 0.0  ;;  %v2444_v5 = vmul.f32 %v4868_v0, %v2392_v31  ;;  %v2348_v41 = vadd.f32 %v2316_v62, %v2219_v59  ;;  %v2138_v59 = vld [vmem:[#allocation2 + $0x258] ss:$2 sm:$0xff] }
 0x1df   : > { %v1162_v15 = vpop.f32.mrf.mxu0  ;;  %1713 = vst.msk [vmem:[#allocation2 + $0x4d9] sm:$0xff] %vm1510_vm3, %v1502_v61 }
 0x1e0   : > { %v1163_v17 = vadd.f32 %v5093_v3, %v1162_v15  ;;  %v2134_v15 = vld [vmem:[#allocation2 + $0x208] ss:$2 sm:$0xff] }
 0x1e1   : > { %v2186_v24 = vmul.f32 %v4828_v32, %v2134_v15 }
 0x1e2   : > { %v1422_v26 = vmax.f32 %v1163_v17, 0.0 }
 0x1e3   : > { %v2515_v33 = vld [vmem:[#allocation2 + $0x1a0] ss:$2 sm:$0xff]  ;;  %v2644_v34 = vld [vmem:[#allocation2 + $0x1a1] ss:$2 sm:$0xff]  ;;  %v2218_v58 = vadd.f32 %v2186_v24, %v2090_v28 }
 0x1e4   : > { %1633 = vst.msk [vmem:[#allocation2 + $0x1b9] sm:$0xff] %vm1510_vm3, %v1422_v26  ;;  %v2570_v39 = vmul.f32 %v4870_v1, %v2515_v33  ;;  %v2773_v43 = vld [vmem:[#allocation2 + $0x1a2] ss:$2 sm:$0xff]  ;;  %v2699_v47 = vmul.f32 %v4890_v19, %v2644_v34  ;;  %v1875_v4 = vld [vmem:[#allocation2 + $0x1a1] ss:$2 sm:$0xff]  ;;  %v1959_v26 = vadd.f32 %v1927_v13, %v1798_v12  ;;  %v1931_v12 = vmul.f32 %v4801_v11, %v1881_v52 }
 0x1e5   : > { %v2828_v56 = vmul.f32 %v4904_v37, %v2773_v43  ;;  %v1746_v2 = vld [vmem:[#allocation2 + $0x1a0] ss:$2 sm:$0xff]  ;;  %v1928_v17 = vmul.f32 %v4801_v11, %v1875_v4  ;;  %v2263_v33 = vld [vmem:[#allocation2 + $0x209] ss:$2 sm:$0xff]  ;;  %v2060_v52 = vmul.f32 %v4812_v21, %v2010_v30 }
 0x1e6   : > { %v2602_v46 = vadd.f32 %v2570_v39, %v2473_v38  ;;  %v1799_v16 = vmul.f32 %v4799_v10, %v1746_v2  ;;  %v2004_v27 = vld [vmem:[#allocation2 + $0x1a2] ss:$2 sm:$0xff]  ;;  %v1364_v39 = vpop.f32.mrf.mxu3  ;;  %v5361_v43 = vld [vmem:[%s5839_s2] ss:$0 sm:$0xff]  ;;  %v2315_v50 = vmul.f32 %v4852_v53, %v2263_v33 }
 0x1e7   : > { %v1164_v51 = vpop.f32.mrf.mxu0  ;;  %v1365_v44 = vadd.f32 %v5361_v43, %v1364_v39  ;;  %v2057_v48 = vmul.f32 %v4812_v21, %v2004_v27  ;;  %v2012_v33 = vld [vmem:[#allocation2 + $0x242] ss:$2 sm:$0xff] }
 0x1e8   : > { %v1165_v54 = vadd.f32 %v5093_v3, %v1164_v51  ;;  %v2731_v55 = vadd.f32 %v2699_v47, %v2602_v46  ;;  %v1960_v38 = vadd.f32 %v1928_v17, %v1799_v16  ;;  %v1752_v46 = vld [vmem:[#allocation2 + $0x230] ss:$2 sm:$0xff]  ;;  %v1754_v51 = vld [vmem:[#allocation2 + $0x240] ss:$2 sm:$0xff] }
 0x1e9   : > { %v1503_v7 = vmax.f32 %v1365_v44, 0.0  ;;  %v1802_v61 = vmul.f32 %v4799_v10, %v1752_v46  ;;  %v2517_v16 = vld [vmem:[#allocation2 + $0x1e0] ss:$2 sm:$0xff]  ;;  %v1803_v23 = vmul.f32 %v4799_v10, %v1754_v51  ;;  %v2521_v46 = vld [vmem:[#allocation2 + $0x230] ss:$2 sm:$0xff] }
 0x1ea   : > { %v1423_v35 = vmax.f32 %v1165_v54, 0.0  ;;  %v2860_v8 = vadd.f32 %v2828_v56, %v2731_v55  ;;  %v2088_v54 = vadd.f32 %v2056_v42, %v1959_v26  ;;  %v2089_v63 = vadd.f32 %v2057_v48, %v1960_v38  ;;  %v2648_v38 = vld [vmem:[#allocation2 + $0x1f1] ss:$2 sm:$0xff]  ;;  %v2775_v48 = vld [vmem:[#allocation2 + $0x1e2] ss:$2 sm:$0xff] }
 0x1eb   : > { %1714 = vst.msk [vmem:[#allocation2 + $0x4e1] sm:$0xff] %vm1510_vm3, %v1503_v7  ;;  %v1963_v42 = vadd.f32 %v1931_v12, %v1802_v61  ;;  %v2650_v12 = vld [vmem:[#allocation2 + $0x231] ss:$2 sm:$0xff]  ;;  %v2781_v30 = vld [vmem:[#allocation2 + $0x242] ss:$2 sm:$0xff] }
 0x1ec   : > { %1634 = vst.msk [vmem:[#allocation2 + $0x1c1] sm:$0xff] %vm1510_vm3, %v1423_v35  ;;  %v2896_v3 = vadd.f32 %v5276_v40, %v2860_v8  ;;  %v1883_v35 = vld [vmem:[#allocation2 + $0x241] ss:$2 sm:$0xff] }
 0x1ed   : > { %v1932_v24 = vmul.f32 %v4801_v11, %v1883_v35 }
 0x1ee   : > { %v2928_v22 = vmax.f32 %v2896_v3, 0.0  ;;  %v2314_v3 = vmul.f32 %v4852_v53, %v2261_v49  ;;  %v1367_v29 = vpop.f32.mrf.mxu3  ;;  %v2777_v49 = vld [vmem:[#allocation2 + $0x1f2] ss:$2 sm:$0xff] }
 0x1ef   : > { %v3054_v25 = vpop.f32.mrf.mxu1  ;;  %v1368_v39 = vadd.f32 %v5361_v43, %v1367_v29  ;;  %v1964_v51 = vadd.f32 %v1932_v24, %v1803_v23  ;;  %v2830_v61 = vmul.f32 %v4904_v37, %v2777_v49  ;;  %v2269_v24 = vld [vmem:[#allocation2 + $0x269] ss:$2 sm:$0xff]  ;;  %v2779_v29 = vld [vmem:[#allocation2 + $0x232] ss:$2 sm:$0xff]  ;;  %v2832_v49 = vmul.f32 %v4904_v37, %v2781_v30 }
 0x1f0   : > { %v3055_v34 = vadd.f32 %v5171_v60, %v3054_v25  ;;  %v2955_v36 = vpack.c.bf16 %v2928_v22, %v2927_v20  ;;  %v2519_v20 = vld [vmem:[#allocation2 + $0x1f0] ss:$2 sm:$0xff]  ;;  %v2347_v22 = vadd.f32 %v2315_v50, %v2218_v58  ;;  %v2701_v58 = vmul.f32 %v4890_v19, %v2648_v38 }
 0x1f1   : > { %v1504_v50 = vmax.f32 %v1368_v39, 0.0 }
 0x1f2   : > { %v3128_v47 = vmax.f32 %v3055_v34, 0.0  ;;  %4320 = vmatmul.msk.bf16.gmra.mxu1 %vm1510_vm3, %v2955_v36  ;;  %v2571_v34 = vmul.f32 %v4870_v1, %v2517_v16  ;;  %v2646_v36 = vld [vmem:[#allocation2 + $0x1e1] ss:$2 sm:$0xff]  ;;  %v2476_v62 = vadd.f32 %v2444_v5, %v2347_v22  ;;  %v2702_v22 = vmul.f32 %v4890_v19, %v2650_v12  ;;  %v2016_v12 = vld [vmem:[#allocation2 + $0x292] ss:$2 sm:$0xff] }
 0x1f3   : > { %v2130_v55 = vld [vmem:[#allocation2 + $0x1b8] ss:$2 sm:$0xff]  ;;  %v2132_v56 = vld [vmem:[#allocation2 + $0x1c8] ss:$2 sm:$0xff]  ;;  %v2259_v57 = vld [vmem:[#allocation2 + $0x1b9] ss:$2 sm:$0xff] }
 0x1f4   : > { %3207 = vst.msk [vmem:[#allocation3 + $0x49] sm:$0xff] %vm3156_vm6, %v3128_v47  ;;  %v2184_v2 = vmul.f32 %v4828_v32, %v2130_v55  ;;  %v2185_v4 = vmul.f32 %v4828_v32, %v2132_v56  ;;  %v2388_v8 = vld [vmem:[#allocation2 + $0x1ba] ss:$2 sm:$0xff]  ;;  %v2313_v15 = vmul.f32 %v4852_v53, %v2259_v57  ;;  %v2700_v57 = vmul.f32 %v4890_v19, %v2646_v36 }
 0x1f5   : > { %v2442_v28 = vmul.f32 %v4868_v0, %v2388_v8  ;;  %v2523_v47 = vld [vmem:[#allocation2 + $0x240] ss:$2 sm:$0xff]  ;;  %1715 = vst.msk [vmem:[#allocation2 + $0x4e9] sm:$0xff] %vm1510_vm3, %v1504_v50  ;;  %v2829_v8 = vmul.f32 %v4904_v37, %v2775_v48  ;;  %v2831_v48 = vmul.f32 %v4904_v37, %v2779_v29  ;;  %v1758_v50 = vld [vmem:[#allocation2 + $0x290] ss:$2 sm:$0xff] }
 0x1f6   : > { %v2216_v13 = vadd.f32 %v2184_v2, %v2088_v54  ;;  %v2217_v14 = vadd.f32 %v2185_v4, %v2089_v63  ;;  %v2061_v54 = vmul.f32 %v4812_v21, %v2012_v33  ;;  %v2477_v63 = vadd.f32 %v2445_v9, %v2348_v41  ;;  %v1369_v5 = vpop.f32.mrf.mxu3 }
 0x1f7   : > { %v3056_v17 = vpop.f32.mrf.mxu1  ;;  %v2573_v2 = vmul.f32 %v4870_v1, %v2521_v46  ;;  %v2574_v4 = vmul.f32 %v4870_v1, %v2523_v47  ;;  %v1370_v23 = vadd.f32 %v5361_v43, %v1369_v5  ;;  %v2654_v5 = vld [vmem:[#allocation2 + $0x281] ss:$2 sm:$0xff] }
 0x1f8   : > { %v3057_v25 = vadd.f32 %v5171_v60, %v3056_v17  ;;  %v2345_v26 = vadd.f32 %v2313_v15, %v2216_v13  ;;  %v2346_v27 = vadd.f32 %v2314_v3, %v2217_v14  ;;  %v2572_v60 = vmul.f32 %v4870_v1, %v2519_v20  ;;  %v2652_v13 = vld [vmem:[#allocation2 + $0x241] ss:$2 sm:$0xff] }
 0x1f9   : > { %v2092_v14 = vadd.f32 %v2060_v52, %v1963_v42  ;;  %v2188_v15 = vmul.f32 %v4828_v32, %v2138_v59  ;;  %v2093_v9 = vadd.f32 %v2061_v54, %v1964_v51  ;;  %v2189_v17 = vmul.f32 %v4828_v32, %v2140_v6  ;;  %v1885_v51 = vld [vmem:[#allocation2 + $0x281] ss:$2 sm:$0xff]  ;;  %v1887_v52 = vld [vmem:[#allocation2 + $0x291] ss:$2 sm:$0xff]  ;;  %v2525_v59 = vld [vmem:[#allocation2 + $0x280] ss:$2 sm:$0xff] }
 0x1fa   : > { %v3129_v44 = vmax.f32 %v3057_v25, 0.0  ;;  %v2474_v31 = vadd.f32 %v2442_v28, %v2345_v26  ;;  %v2475_v45 = vadd.f32 %v2443_v18, %v2346_v27  ;;  %v2267_v18 = vld [vmem:[#allocation2 + $0x259] ss:$2 sm:$0xff]  ;;  %v2605_v20 = vadd.f32 %v2573_v2, %v2476_v62  ;;  %v2527_v2 = vld [vmem:[#allocation2 + $0x290] ss:$2 sm:$0xff] }
 0x1fb   : > { %v2606_v27 = vadd.f32 %v2574_v4, %v2477_v63  ;;  %v2703_v28 = vmul.f32 %v4890_v19, %v2652_v13  ;;  %v1505_v33 = vmax.f32 %v1370_v23, 0.0  ;;  %v2317_v36 = vmul.f32 %v4852_v53, %v2267_v18  ;;  %v2142_v23 = vld [vmem:[#allocation2 + $0x2a8] ss:$2 sm:$0xff] }
 0x1fc   : > { %3208 = vst.msk [vmem:[#allocation3 + $0x51] sm:$0xff] %vm3156_vm6, %v3129_v44  ;;  %v2603_v55 = vadd.f32 %v2571_v34, %v2474_v31  ;;  %v2604_v56 = vadd.f32 %v2572_v60, %v2475_v45  ;;  %v2220_v34 = vadd.f32 %v2188_v15, %v2092_v14  ;;  %v2221_v41 = vadd.f32 %v2189_v17, %v2093_v9  ;;  %v2396_v44 = vld [vmem:[#allocation2 + $0x25a] ss:$2 sm:$0xff]  ;;  %v2398_v45 = vld [vmem:[#allocation2 + $0x26a] ss:$2 sm:$0xff] }
 0x1fd   : > { %v2318_v42 = vmul.f32 %v4852_v53, %v2269_v24  ;;  %v2734_v31 = vadd.f32 %v2702_v22, %v2605_v20  ;;  %1716 = vst.msk [vmem:[#allocation2 + $0x4f1] sm:$0xff] %vm1510_vm3, %v1505_v33  ;;  %v1756_v60 = vld [vmem:[#allocation2 + $0x280] ss:$2 sm:$0xff]  ;;  %v2735_v47 = vadd.f32 %v2703_v28, %v2606_v27  ;;  %v1805_v4 = vmul.f32 %v4799_v10, %v1758_v50  ;;  %v2656_v9 = vld [vmem:[#allocation2 + $0x291] ss:$2 sm:$0xff] }
 0x1fe   : > { %v2732_v7 = vadd.f32 %v2700_v57, %v2603_v55  ;;  %v2733_v35 = vadd.f32 %v2701_v58, %v2604_v56  ;;  %v2349_v54 = vadd.f32 %v2317_v36, %v2220_v34  ;;  %v2446_v55 = vmul.f32 %v4868_v0, %v2396_v44  ;;  %v1372_v56 = vpop.f32.mrf.mxu3  ;;  %v2783_v33 = vld [vmem:[#allocation2 + $0x282] ss:$2 sm:$0xff] }
 0x1ff   : > { %v2350_v57 = vadd.f32 %v2318_v42, %v2221_v41  ;;  %v2447_v58 = vmul.f32 %v4868_v0, %v2398_v45  ;;  %v1804_v62 = vmul.f32 %v4799_v10, %v1756_v60  ;;  %v1373_v63 = vadd.f32 %v5361_v43, %v1372_v56  ;;  %v2271_v60 = vld [vmem:[#allocation2 + $0x2a9] ss:$2 sm:$0xff] }
 0x200   : > { %v2861_v3 = vadd.f32 %v2829_v8, %v2732_v7  ;;  %v2862_v16 = vadd.f32 %v2830_v61, %v2733_v35  ;;  %v1933_v6 = vmul.f32 %v4801_v11, %v1885_v51  ;;  %v1934_v7 = vmul.f32 %v4801_v11, %v1887_v52  ;;  %v2014_v61 = vld [vmem:[#allocation2 + $0x282] ss:$2 sm:$0xff] }
 0x201   : > { %v2863_v35 = vadd.f32 %v2831_v48, %v2734_v31  ;;  %v2864_v8 = vadd.f32 %v2832_v49, %v2735_v47  ;;  %v1506_v13 = vmax.f32 %v1373_v63, 0.0  ;;  %v2478_v14 = vadd.f32 %v2446_v55, %v2349_v54  ;;  %v2400_v52 = vld [vmem:[#allocation2 + $0x2aa] ss:$2 sm:$0xff]  ;;  %v1889_v55 = vld [vmem:[#allocation2 + $0x2d1] ss:$2 sm:$0xff] }
 0x202   : > { %v2897_v25 = vadd.f32 %v5276_v40, %v2861_v3  ;;  %v2898_v26 = vadd.f32 %v5276_v40, %v2862_v16  ;;  %v2575_v15 = vmul.f32 %v4870_v1, %v2525_v59  ;;  %v2479_v3 = vadd.f32 %v2447_v58, %v2350_v57  ;;  %v1760_v54 = vld [vmem:[#allocation2 + $0x2d0] ss:$2 sm:$0xff]  ;;  %v1891_v63 = vld [vmem:[#allocation2 + $0x2e1] ss:$2 sm:$0xff] }
 0x203   : > { %v2576_v16 = vmul.f32 %v4870_v1, %v2527_v2  ;;  %1717 = vst.msk [vmem:[#allocation2 + $0x501] sm:$0xff] %vm1510_vm3, %v1506_v13  ;;  %v1965_v17 = vadd.f32 %v1933_v6, %v1804_v62  ;;  %v1966_v18 = vadd.f32 %v1934_v7, %v1805_v4  ;;  %v2062_v20 = vmul.f32 %v4812_v21, %v2014_v61  ;;  %v1762_v62 = vld [vmem:[#allocation2 + $0x2e0] ss:$2 sm:$0xff] }
 0x204   : > { %v2929_v38 = vmax.f32 %v2897_v25, 0.0  ;;  %v2930_v39 = vmax.f32 %v2898_v26, 0.0  ;;  %v2063_v22 = vmul.f32 %v4812_v21, %v2016_v12  ;;  %v2899_v24 = vadd.f32 %v5276_v40, %v2863_v35  ;;  %v2144_v26 = vld [vmem:[#allocation2 + $0x2b8] ss:$2 sm:$0xff] }
 0x205   : > { %v2900_v25 = vadd.f32 %v5276_v40, %v2864_v8  ;;  %v2607_v27 = vadd.f32 %v2575_v15, %v2478_v14  ;;  %v2704_v28 = vmul.f32 %v4890_v19, %v2654_v5  ;;  %v2608_v29 = vadd.f32 %v2576_v16, %v2479_v3  ;;  %v2402_v4 = vld [vmem:[#allocation2 + $0x2ba] ss:$2 sm:$0xff] }
 0x206   : > { %v2956_v46 = vpack.c.bf16 %v2930_v39, %v2929_v38  ;;  %v2705_v30 = vmul.f32 %v4890_v19, %v2656_v9  ;;  %v1374_v34 = vpop.f32.mrf.mxu3  ;;  %v2190_v36 = vmul.f32 %v4828_v32, %v2142_v23  ;;  %v2785_v38 = vld [vmem:[#allocation2 + $0x292] ss:$2 sm:$0xff]  ;;  %v2094_v41 = vadd.f32 %v2062_v20, %v1965_v17  ;;  %v2020_v17 = vld [vmem:[#allocation2 + $0x2e2] ss:$2 sm:$0xff] }
 0x207   : > { %v1375_v39 = vadd.f32 %v5361_v43, %v1374_v34  ;;  %v2095_v42 = vadd.f32 %v2063_v22, %v1966_v18  ;;  %v2191_v44 = vmul.f32 %v4828_v32, %v2144_v26  ;;  %v2931_v31 = vmax.f32 %v2899_v24, 0.0  ;;  %v2018_v15 = vld [vmem:[#allocation2 + $0x2d2] ss:$2 sm:$0xff] }
 0x208   : > { %4321 = vmatmul.msk.bf16.gmra.mxu1 %vm1510_vm3, %v2956_v46  ;;  %v2932_v45 = vmax.f32 %v2900_v25, 0.0  ;;  %v2273_v46 = vld [vmem:[#allocation2 + $0x2b9] ss:$2 sm:$0xff]  ;;  %v2736_v47 = vadd.f32 %v2704_v28, %v2607_v27  ;;  %v2833_v48 = vmul.f32 %v4904_v37, %v2783_v33  ;;  %v2737_v50 = vadd.f32 %v2705_v30, %v2608_v29  ;;  %v2529_v18 = vld [vmem:[#allocation2 + $0x2d0] ss:$2 sm:$0xff] }
 0x209   : > { %v1507_v49 = vmax.f32 %v1375_v39, 0.0  ;;  %v2834_v51 = vmul.f32 %v4904_v37, %v2785_v38  ;;  %v2222_v56 = vadd.f32 %v2190_v36, %v2094_v41  ;;  %v2223_v57 = vadd.f32 %v2191_v44, %v2095_v42  ;;  %v2531_v20 = vld [vmem:[#allocation2 + $0x2e0] ss:$2 sm:$0xff]  ;;  %v2658_v38 = vld [vmem:[#allocation2 + $0x2d1] ss:$2 sm:$0xff] }
 0x20a   : > { %v2319_v58 = vmul.f32 %v4852_v53, %v2271_v60  ;;  %v2320_v59 = vmul.f32 %v4852_v53, %v2273_v46  ;;  %v2957_v2 = vpack.c.bf16 %v2932_v45, %v2931_v31  ;;  %v2865_v6 = vadd.f32 %v2833_v48, %v2736_v47  ;;  %v2146_v29 = vld [vmem:[#allocation2 + $0x2f8] ss:$2 sm:$0xff]  ;;  %v2148_v39 = vld [vmem:[#allocation2 + $0x308] ss:$2 sm:$0xff]  ;;  %v2660_v41 = vld [vmem:[#allocation2 + $0x2e1] ss:$2 sm:$0xff] }
 0x20b   : > { %1718 = vst.msk [vmem:[#allocation2 + $0x509] sm:$0xff] %vm1510_vm3, %v1507_v49  ;;  %v1806_v7 = vmul.f32 %v4799_v10, %v1760_v54  ;;  %v1935_v35 = vmul.f32 %v4801_v11, %v1889_v55  ;;  %v2866_v8 = vadd.f32 %v2834_v51, %v2737_v50  ;;  %v2448_v12 = vmul.f32 %v4868_v0, %v2400_v52  ;;  %v3235_v45 = vld [vmem:[%s5844_s7] sm:$0x7] }
 0x20c   : > { %v1807_v13 = vmul.f32 %v4799_v10, %v1762_v62  ;;  %v1936_v14 = vmul.f32 %v4801_v11, %v1891_v63  ;;  %v2351_v16 = vadd.f32 %v2319_v58, %v2222_v56  ;;  %v2352_v5 = vadd.f32 %v2320_v59, %v2223_v57  ;;  %v2275_v50 = vld [vmem:[#allocation2 + $0x2f9] ss:$2 sm:$0xff]  ;;  %v2277_v56 = vld [vmem:[#allocation2 + $0x309] ss:$2 sm:$0xff]  ;;  %v2787_v57 = vld [vmem:[#allocation2 + $0x2d2] ss:$2 sm:$0xff] }
 0x20d   : > { %v2449_v9 = vmul.f32 %v4868_v0, %v2402_v4  ;;  %v2901_v22 = vadd.f32 %v5276_v40, %v2865_v6  ;;  %v1967_v24 = vadd.f32 %v1935_v35, %v1806_v7  ;;  %v2064_v25 = vmul.f32 %v4812_v21, %v2018_v15  ;;  %v2789_v58 = vld [vmem:[#allocation2 + $0x2e2] ss:$2 sm:$0xff]  ;;  %v3271_v7 = vld [vmem:[#allocation3 + $0x1] ss:$2 sm:$0xff] }
 0x20e   : > { %v1377_v61 = vpop.f32.mrf.mxu3  ;;  %v2902_v26 = vadd.f32 %v5276_v40, %v2866_v8  ;;  %v1968_v27 = vadd.f32 %v1936_v14, %v1807_v13  ;;  %v2065_v28 = vmul.f32 %v4812_v21, %v2020_v17  ;;  %v2480_v30 = vadd.f32 %v2448_v12, %v2351_v16  ;;  %v3238_v6 = vld [vmem:[#allocation3] ss:$2 sm:$0xff]  ;;  %v1764_v12 = vld [vmem:[#allocation2 + $0x320] ss:$2 sm:$0xff]  ;;  %v1893_v13 = vld [vmem:[#allocation2 + $0x321] ss:$2 sm:$0xff] }
 0x20f   : > { %v1378_v3 = vadd.f32 %v5361_v43, %v1377_v61  ;;  %v2481_v33 = vadd.f32 %v2449_v9, %v2352_v5  ;;  %v2577_v34 = vmul.f32 %v4870_v1, %v2529_v18  ;;  %v2578_v36 = vmul.f32 %v4870_v1, %v2531_v20  ;;  %v2404_v61 = vld [vmem:[#allocation2 + $0x2fa] ss:$2 sm:$0xff]  ;;  %v2406_v16 = vld [vmem:[#allocation2 + $0x30a] ss:$2 sm:$0xff] }
 0x210   : > { %v2933_v42 = vmax.f32 %v2901_v22, 0.0  ;;  %v2096_v44 = vadd.f32 %v2064_v25, %v1967_v24  ;;  %v2192_v31 = vmul.f32 %v4828_v32, %v2146_v29  ;;  %v2934_v60 = vmax.f32 %v2902_v26, 0.0  ;;  %v1766_v20 = vld [vmem:[#allocation2 + $0x330] ss:$2 sm:$0xff]  ;;  %v1895_v22 = vld [vmem:[#allocation2 + $0x331] ss:$2 sm:$0xff] }
 0x211   : > { %v1508_v23 = vmax.f32 %v1378_v3, 0.0  ;;  %v2706_v46 = vmul.f32 %v4890_v19, %v2658_v38  ;;  %v2097_v48 = vadd.f32 %v2065_v28, %v1968_v27  ;;  %v2193_v49 = vmul.f32 %v4828_v32, %v2148_v39  ;;  %v3236_v25 = vld [vmem:[%s5844_s7 + $0x4] sm:$0x7]  ;;  %v3304_v26 = vld [vmem:[#allocation3 + $0x2] ss:$2 sm:$0xff] }
 0x212   : > { %v2609_v51 = vadd.f32 %v2577_v34, %v2480_v30  ;;  %v2610_v52 = vadd.f32 %v2578_v36, %v2481_v33  ;;  %v2707_v54 = vmul.f32 %v4890_v19, %v2660_v41  ;;  %v5456_v59 = vperm.slane %v3235_v45, 0  ;;  %v2533_v33 = vld [vmem:[#allocation2 + $0x320] ss:$2 sm:$0xff]  ;;  %v2535_v41 = vld [vmem:[#allocation2 + $0x330] ss:$2 sm:$0xff] }
 0x213   : > { %1719 = vst.msk [vmem:[#allocation2 + $0x511] sm:$0xff] %vm1510_vm3, %v1508_v23  ;;  %v5458_v62 = vperm.slane %v3235_v45, 1  ;;  %v2321_v4 = vmul.f32 %v4852_v53, %v2275_v50  ;;  %v2225_v35 = vadd.f32 %v2193_v49, %v2097_v48  ;;  %v2322_v8 = vmul.f32 %v4852_v53, %v2277_v56  ;;  %v4423_v34 = vld [vmem:[%s5846_s9 + $0x8] sm:$0xff] }
 0x214   : > { %v2739_v14 = vadd.f32 %v2707_v54, %v2610_v52  ;;  %v2835_v15 = vmul.f32 %v4904_v37, %v2787_v57  ;;  %v2836_v3 = vmul.f32 %v4904_v37, %v2789_v58  ;;  %v2958_v5 = vpack.c.bf16 %v2934_v60, %v2933_v42  ;;  %v2022_v36 = vld [vmem:[#allocation2 + $0x322] ss:$2 sm:$0xff]  ;;  %3603 = vmatpush.bf16.msrb.mxu2 %v4423_v34  ;;  %v2662_v56 = vld [vmem:[#allocation2 + $0x321] ss:$2 sm:$0xff] }
 0x215   : > { %v3254_v9 = vmul.f32 %v5456_v59, %v3238_v6  ;;  %v3287_v17 = vmul.f32 %v5458_v62, %v3271_v7  ;;  %v5467_v18 = vperm.slane %v3235_v45, 2  ;;  %v2450_v24 = vmul.f32 %v4868_v0, %v2404_v61  ;;  %v3336_v50 = vld [vmem:[#allocation3 + $0x18] ss:$2 sm:$0xff]  ;;  %v2152_v61 = vld [vmem:[#allocation2 + $0x358] ss:$2 sm:$0xff] }
 0x216   : > { %v1379_v47 = vpop.f32.mrf.mxu3  ;;  %v1808_v27 = vmul.f32 %v4799_v10, %v1764_v12  ;;  %v1937_v28 = vmul.f32 %v4801_v11, %v1893_v13  ;;  %v2354_v29 = vadd.f32 %v2322_v8, %v2225_v35  ;;  %v2451_v30 = vmul.f32 %v4868_v0, %v2406_v16  ;;  %v2150_v57 = vld [vmem:[#allocation2 + $0x348] ss:$2 sm:$0xff]  ;;  %v5502_v16 = vld [vmem:[%s5843_s6] ss:$0 sm:$0xff] }
 0x217   : > { %v1380_v55 = vadd.f32 %v5361_v43, %v1379_v47  ;;  %v2738_v43 = vadd.f32 %v2706_v46, %v2609_v51  ;;  %v2868_v39 = vadd.f32 %v2836_v3, %v2739_v14  ;;  %v1809_v42 = vmul.f32 %v4799_v10, %v1766_v20  ;;  %v2024_v47 = vld [vmem:[#allocation2 + $0x332] ss:$2 sm:$0xff]  ;;  %v2791_v20 = vld [vmem:[#allocation2 + $0x322] ss:$2 sm:$0xff] }
 0x218   : > { %4322 = vmatmul.msk.bf16.gmra.mxu1 %vm1510_vm3, %v2957_v2  ;;  %v2224_v2 = vadd.f32 %v2192_v31, %v2096_v44  ;;  %v1938_v44 = vmul.f32 %v4801_v11, %v1895_v22  ;;  %v4422_v31 = vld [vmem:[%s5846_s9] sm:$0xff]  ;;  %v3295_v45 = vadd.f32 %v3287_v17, %v3254_v9  ;;  %v3320_v60 = vmul.f32 %v5467_v18, %v3304_v26  ;;  %v5512_v34 = vld [vmem:[%s5844_s7 + $0x8] sm:$0x7] }
 0x219   : > { %v1509_v63 = vmax.f32 %v1380_v55, 0.0  ;;  %v2867_v38 = vadd.f32 %v2835_v15, %v2738_v43  ;;  %v5486_v46 = vperm.slane %v3236_v25, 0  ;;  %v2579_v49 = vmul.f32 %v4870_v1, %v2533_v33  ;;  %3604 = vmatpush.bf16.msrb.mxu2 %v4422_v31  ;;  %v3240_v14 = vld [vmem:[#allocation3 + $0x30] ss:$2 sm:$0xff]  ;;  %v3273_v15 = vld [vmem:[#allocation3 + $0x31] ss:$2 sm:$0xff] }
 0x21a   : > { %v2353_v23 = vadd.f32 %v2321_v4, %v2224_v2  ;;  %v1969_v51 = vadd.f32 %v1937_v28, %v1808_v27  ;;  %v2066_v52 = vmul.f32 %v4812_v21, %v2022_v36  ;;  %v2483_v54 = vadd.f32 %v2451_v30, %v2354_v29  ;;  %v2664_v2 = vld [vmem:[#allocation2 + $0x331] ss:$2 sm:$0xff]  ;;  %v2793_v27 = vld [vmem:[#allocation2 + $0x332] ss:$2 sm:$0xff] }
 0x21b   : > { %1720 = vst.msk [vmem:[#allocation2 + $0x519] sm:$0xff] %vm1510_vm3, %v1509_v63  ;;  %v2580_v55 = vmul.f32 %v4870_v1, %v2535_v41  ;;  %v2903_v58 = vadd.f32 %v5276_v40, %v2867_v38  ;;  %v2904_v63 = vadd.f32 %v5276_v40, %v2868_v39  ;;  %v1970_v4 = vadd.f32 %v1938_v44, %v1809_v42  ;;  %v3369_v28 = vld [vmem:[#allocation3 + $0x19] ss:$2 sm:$0xff]  ;;  %v2281_v39 = vld [vmem:[#allocation2 + $0x359] ss:$2 sm:$0xff] }
 0x21c   : > { %v2482_v48 = vadd.f32 %v2450_v24, %v2353_v23  ;;  %v2067_v6 = vmul.f32 %v4812_v21, %v2024_v47  ;;  %v3328_v7 = vadd.f32 %v3320_v60, %v3295_v45  ;;  %v3352_v35 = vmul.f32 %v5486_v46, %v3336_v50  ;;  %v2279_v23 = vld [vmem:[#allocation2 + $0x349] ss:$2 sm:$0xff]  ;;  %v3402_v44 = vld [vmem:[#allocation3 + $0x1a] ss:$2 sm:$0xff] }
 0x21d   : > { %v5495_v8 = vperm.slane %v3236_v25, 1  ;;  %v2708_v43 = vmul.f32 %v4890_v19, %v2662_v56  ;;  %v2098_v3 = vadd.f32 %v2066_v52, %v1969_v51  ;;  %v2194_v40 = vmul.f32 %v4828_v32, %v2150_v57  ;;  %v3338_v50 = vld [vmem:[#allocation3 + $0x48] ss:$2 sm:$0xff] }
 0x21e   : > { %v2611_v13 = vadd.f32 %v2579_v49, %v2482_v48  ;;  %v2612_v9 = vadd.f32 %v2580_v55, %v2483_v54  ;;  %v2709_v17 = vmul.f32 %v4890_v19, %v2664_v2  ;;  %v5506_v22 = vperm.slane %v3236_v25, 2  ;;  %v2408_v48 = vld [vmem:[#allocation2 + $0x34a] ss:$2 sm:$0xff] }
 0x21f   : > { %v2935_v24 = vmax.f32 %v2903_v58, 0.0  ;;  %v2936_v26 = vmax.f32 %v2904_v63, 0.0  ;;  %v2099_v29 = vadd.f32 %v2067_v6, %v1970_v4  ;;  %v2195_v30 = vmul.f32 %v4828_v32, %v2152_v61  ;;  %v3306_v49 = vld [vmem:[#allocation3 + $0x32] ss:$2 sm:$0xff] }
 0x220   : > { %v3255_v36 = vmul.f32 %v5456_v59, %v3240_v14  ;;  %v3288_v38 = vmul.f32 %v5458_v62, %v3273_v15  ;;  %v3360_v25 = vadd.f32 %v3352_v35, %v3328_v7  ;;  %v2740_v41 = vadd.f32 %v2708_v43, %v2611_v13  ;;  %v2410_v63 = vld [vmem:[#allocation2 + $0x35a] ss:$2 sm:$0xff]  ;;  %v1897_v43 = vld [vmem:[#allocation2 + $0x371] ss:$2 sm:$0xff] }
 0x221   : > { %v2837_v42 = vmul.f32 %v4904_v37, %v2791_v20  ;;  %v2226_v31 = vadd.f32 %v2194_v40, %v2098_v3  ;;  %v2323_v45 = vmul.f32 %v4852_v53, %v2279_v23  ;;  %v2741_v60 = vadd.f32 %v2709_v17, %v2612_v9  ;;  %v1768_v2 = vld [vmem:[#allocation2 + $0x370] ss:$2 sm:$0xff]  ;;  %v1770_v4 = vld [vmem:[#allocation2 + $0x380] ss:$2 sm:$0xff] }
 0x222   : > { %v2838_v47 = vmul.f32 %v4904_v37, %v2793_v27  ;;  %v3385_v51 = vmul.f32 %v5495_v8, %v3369_v28  ;;  %v5522_v52 = vperm.slane %v5512_v34, 0  ;;  %v2227_v54 = vadd.f32 %v2195_v30, %v2099_v29  ;;  %v3435_v61 = vld [vmem:[#allocation3 + $0x30] ss:$2 sm:$0xff]  ;;  %v2537_v28 = vld [vmem:[#allocation2 + $0x370] ss:$2 sm:$0xff] }
 0x223   : > { %v2324_v55 = vmul.f32 %v4852_v53, %v2281_v39  ;;  %v2959_v56 = vpack.c.bf16 %v2936_v26, %v2935_v24  ;;  %v3296_v57 = vadd.f32 %v3288_v38, %v3255_v36  ;;  %v3418_v58 = vmul.f32 %v5506_v22, %v3402_v44  ;;  %v2539_v29 = vld [vmem:[#allocation2 + $0x380] ss:$2 sm:$0xff] }
 0x224   : > { %v2869_v7 = vadd.f32 %v2837_v42, %v2740_v41  ;;  %v3393_v35 = vadd.f32 %v3385_v51, %v3360_v25  ;;  %v2452_v13 = vmul.f32 %v4868_v0, %v2408_v48  ;;  %v2870_v15 = vadd.f32 %v2838_v47, %v2741_v60  ;;  %v2026_v39 = vld [vmem:[#allocation2 + $0x372] ss:$2 sm:$0xff]  ;;  %v2028_v60 = vld [vmem:[#allocation2 + $0x382] ss:$2 sm:$0xff]  ;;  %v3468_v47 = vld [vmem:[#allocation3 + $0x31] ss:$2 sm:$0xff] }
 0x225   : > { %v3321_v3 = vmul.f32 %v5467_v18, %v3306_v49  ;;  %v3353_v40 = vmul.f32 %v5486_v46, %v3338_v50  ;;  %v2356_v9 = vadd.f32 %v2324_v55, %v2227_v54  ;;  %v2453_v17 = vmul.f32 %v4868_v0, %v2410_v63  ;;  %v5541_v41 = vld [vmem:[%s5841_s4] ss:$0 sm:$0xff] }
 0x226   : > { %v1810_v20 = vmul.f32 %v4799_v10, %v1768_v2  ;;  %v1811_v23 = vmul.f32 %v4799_v10, %v1770_v4  ;;  %v3451_v27 = vmul.f32 %v5522_v52, %v3435_v61  ;;  %v1939_v30 = vmul.f32 %v4801_v11, %v1897_v43  ;;  %v3404_v63 = vld [vmem:[#allocation3 + $0x4a] ss:$2 sm:$0xff]  ;;  %v2668_v4 = vld [vmem:[#allocation2 + $0x381] ss:$2 sm:$0xff] }
 0x227   : > { %v3329_v26 = vadd.f32 %v3321_v3, %v3296_v57  ;;  %v3426_v36 = vadd.f32 %v3418_v58, %v3393_v35  ;;  %v2905_v42 = vadd.f32 %v5541_v41, %v2869_v7  ;;  %v2906_v44 = vadd.f32 %v5541_v41, %v2870_v15  ;;  %v2156_v43 = vld [vmem:[#allocation2 + $0x3a8] ss:$2 sm:$0xff] }
 0x228   : > { %4323 = vmatmul.msk.bf16.gmra.mxu1 %vm1510_vm3, %v2958_v5  ;;  %v2485_v48 = vadd.f32 %v2453_v17, %v2356_v9  ;;  %v2581_v49 = vmul.f32 %v4870_v1, %v2537_v28  ;;  %v2582_v50 = vmul.f32 %v4870_v1, %v2539_v29  ;;  %v1971_v57 = vadd.f32 %v1939_v30, %v1810_v20  ;;  %v2795_v17 = vld [vmem:[#allocation2 + $0x372] ss:$2 sm:$0xff] }
 0x229   : > { %v3459_v55 = vadd.f32 %v3451_v27, %v3426_v36  ;;  %v2068_v58 = vmul.f32 %v4812_v21, %v2026_v39  ;;  %v5553_v2 = vperm.slane %v5512_v34, 2  ;;  %v2937_v7 = vmax.f32 %v2905_v42, 0.0  ;;  %v2285_v39 = vld [vmem:[#allocation2 + $0x3a9] ss:$2 sm:$0xff] }
 0x22a   : > { %v2938_v35 = vmax.f32 %v2906_v44, 0.0  ;;  %v2614_v3 = vadd.f32 %v2582_v50, %v2485_v48  ;;  %v3419_v9 = vmul.f32 %v5506_v22, %v3404_v63  ;;  %v2197_v28 = vmul.f32 %v4828_v32, %v2156_v43  ;;  %v1772_v48 = vld [vmem:[#allocation2 + $0x3c0] ss:$2 sm:$0xff] }
 0x22b   : > { %v2100_v20 = vadd.f32 %v2068_v58, %v1971_v57  ;;  %v1774_v57 = vld [vmem:[#allocation2 + $0x3d0] ss:$2 sm:$0xff]  ;;  %v1903_v58 = vld [vmem:[#allocation2 + $0x3d1] ss:$2 sm:$0xff] }
 0x22c   : > { %v2960_v29 = vpack.c.bf16 %v2938_v35, %v2937_v7 }
 0x22f   : > { %v3059_v12 = vpop.f32.mrf.mxu1 }
 0x230   : > { %v3060_v5 = vadd.f32 %v5502_v16, %v3059_v12  ;;  %v2355_v12 = vadd.f32 %v2323_v45, %v2226_v31  ;;  %v3361_v31 = vadd.f32 %v3353_v40, %v3329_v26  ;;  %v5546_v45 = vperm.slane %v5512_v34, 1 }
 0x231   : > { %v2711_v26 = vmul.f32 %v4890_v19, %v2668_v4 }
 0x232   : > { %v3130_v33 = vmax.f32 %v3060_v5, 0.0  ;;  %v1899_v5 = vld [vmem:[#allocation2 + $0x381] ss:$2 sm:$0xff]  ;;  %v2484_v38 = vadd.f32 %v2452_v13, %v2355_v12  ;;  %v3484_v12 = vmul.f32 %v5546_v45, %v3468_v47  ;;  %v2154_v13 = vld [vmem:[#allocation2 + $0x398] ss:$2 sm:$0xff] }
 0x233   : > { %v1940_v25 = vmul.f32 %v4801_v11, %v1899_v5  ;;  %v2196_v27 = vmul.f32 %v4828_v32, %v2154_v13 }
 0x234   : > { %3209 = vst.msk [vmem:[#allocation3 + $0x61] sm:$0xff] %vm3156_vm6, %v3130_v33  ;;  %v3371_v33 = vld [vmem:[#allocation3 + $0x49] ss:$2 sm:$0xff]  ;;  %v2613_v15 = vadd.f32 %v2581_v49, %v2484_v38  ;;  %v3492_v34 = vadd.f32 %v3484_v12, %v3459_v55  ;;  %v2797_v38 = vld [vmem:[#allocation2 + $0x382] ss:$2 sm:$0xff]  ;;  %v1812_v12 = vmul.f32 %v4799_v10, %v1772_v48 }
 0x235   : > { %v1972_v51 = vadd.f32 %v1940_v25, %v1811_v23  ;;  %v3386_v54 = vmul.f32 %v5495_v8, %v3371_v33  ;;  %v2283_v25 = vld [vmem:[#allocation2 + $0x399] ss:$2 sm:$0xff]  ;;  %v5569_v55 = vld [vmem:[%s5845_s8] ss:$0 sm:$0xff]  ;;  %v2840_v63 = vmul.f32 %v4904_v37, %v2797_v38  ;;  %v2543_v38 = vld [vmem:[#allocation2 + $0x3d0] ss:$2 sm:$0xff] }
 0x236   : > { %v1901_v49 = vld [vmem:[#allocation2 + $0x3c1] ss:$2 sm:$0xff]  ;;  %v2325_v4 = vmul.f32 %v4852_v53, %v2283_v25  ;;  %v2160_v48 = vld [vmem:[#allocation2 + $0x3f8] ss:$2 sm:$0xff] }
 0x237   : > { %v3061_v6 = vpop.f32.mrf.mxu1  ;;  %v3394_v61 = vadd.f32 %v3386_v54, %v3361_v31  ;;  %v2743_v31 = vadd.f32 %v2711_v26, %v2614_v3  ;;  %v1941_v13 = vmul.f32 %v4801_v11, %v1901_v49  ;;  %v1813_v3 = vmul.f32 %v4799_v10, %v1774_v57  ;;  %v2670_v57 = vld [vmem:[#allocation2 + $0x3c1] ss:$2 sm:$0xff] }
 0x238   : > { %v3062_v14 = vadd.f32 %v5502_v16, %v3061_v6  ;;  %4324 = vmatmul.msk.bf16.gmra.mxu1 %vm1510_vm3, %v2959_v56  ;;  %v2666_v56 = vld [vmem:[#allocation2 + $0x371] ss:$2 sm:$0xff]  ;;  %v2069_v6 = vmul.f32 %v4812_v21, %v2028_v60  ;;  %v2839_v60 = vmul.f32 %v4904_v37, %v2795_v17 }
 0x239   : > { %v2710_v40 = vmul.f32 %v4890_v19, %v2666_v56  ;;  %v3427_v30 = vadd.f32 %v3419_v9, %v3394_v61  ;;  %v2228_v56 = vadd.f32 %v2196_v27, %v2100_v20  ;;  %v2412_v61 = vld [vmem:[#allocation2 + $0x39a] ss:$2 sm:$0xff] }
 0x23a   : > { %v3131_v24 = vmax.f32 %v3062_v14, 0.0  ;;  %v3501_v14 = vld [vmem:[#allocation3 + $0x32] ss:$2 sm:$0xff]  ;;  %v2101_v5 = vadd.f32 %v2069_v6, %v1972_v51  ;;  %v2326_v6 = vmul.f32 %v4852_v53, %v2285_v39 }
 0x23b   : > { %v3517_v36 = vmul.f32 %v5553_v2, %v3501_v14  ;;  %v2742_v44 = vadd.f32 %v2710_v40, %v2613_v15  ;;  %v2872_v14 = vadd.f32 %v2840_v63, %v2743_v31  ;;  %v2414_v15 = vld [vmem:[#allocation2 + $0x3aa] ss:$2 sm:$0xff]  ;;  %v1942_v40 = vmul.f32 %v4801_v11, %v1903_v58  ;;  %v2672_v58 = vld [vmem:[#allocation2 + $0x3d1] ss:$2 sm:$0xff] }
 0x23c   : > { %3210 = vst.msk [vmem:[#allocation3 + $0x69] sm:$0xff] %vm3156_vm6, %v3131_v24  ;;  %v2229_v47 = vadd.f32 %v2197_v28, %v2101_v5  ;;  %v2030_v5 = vld [vmem:[#allocation2 + $0x3c2] ss:$2 sm:$0xff]  ;;  %v2357_v17 = vadd.f32 %v2325_v4, %v2228_v56  ;;  %v2455_v27 = vmul.f32 %v4868_v0, %v2414_v15  ;;  %v2199_v4 = vmul.f32 %v4828_v32, %v2160_v48 }
 0x23d   : > { %v3525_v54 = vadd.f32 %v3517_v36, %v3492_v34  ;;  %v2871_v43 = vadd.f32 %v2839_v60, %v2742_v44  ;;  %v2541_v28 = vld [vmem:[#allocation2 + $0x3c0] ss:$2 sm:$0xff]  ;;  %v2908_v36 = vadd.f32 %v5541_v41, %v2872_v14  ;;  %v1974_v25 = vadd.f32 %v1942_v40, %v1813_v3 }
 0x23e   : > { %v2358_v20 = vadd.f32 %v2326_v6, %v2229_v47  ;;  %v2583_v49 = vmul.f32 %v4870_v1, %v2541_v28  ;;  %v2287_v6 = vld [vmem:[#allocation2 + $0x3e9] ss:$2 sm:$0xff]  ;;  %v2713_v14 = vmul.f32 %v4890_v19, %v2672_v58  ;;  %v2799_v15 = vld [vmem:[#allocation2 + $0x3c2] ss:$2 sm:$0xff]  ;;  %v2801_v3 = vld [vmem:[#allocation2 + $0x3d2] ss:$2 sm:$0xff] }
 0x23f   : > { %v3537_v34 = vadd.f32 %v5569_v55, %v3525_v54  ;;  %v2418_v28 = vld [vmem:[#allocation2 + $0x3fa] ss:$2 sm:$0xff] }
 0x240   : > { %v2487_v47 = vadd.f32 %v2455_v27, %v2358_v20  ;;  %v1776_v20 = vld [vmem:[#allocation2 + $0x410] ss:$2 sm:$0xff] }
 0x241   : > { %v3545_v44 = vmax.f32 %v3537_v34, 0.0 }
 0x243   : > { %v3437_v23 = vld [vmem:[#allocation3 + $0x60] ss:$2 sm:$0xff]  ;;  %v3470_v24 = vld [vmem:[#allocation3 + $0x61] ss:$2 sm:$0xff] }
 0x244   : > { %v3452_v33 = vmul.f32 %v5522_v52, %v3437_v23  ;;  %v3503_v42 = vld [vmem:[#allocation3 + $0x62] ss:$2 sm:$0xff]  ;;  %v3485_v51 = vmul.f32 %v5546_v45, %v3470_v24  ;;  %v2454_v24 = vmul.f32 %v4868_v0, %v2412_v61 }
 0x245   : > { %v3518_v35 = vmul.f32 %v5553_v2, %v3503_v42  ;;  %v2032_v23 = vld [vmem:[#allocation2 + $0x3d2] ss:$2 sm:$0xff] }
 0x246   : > { %v3460_v50 = vadd.f32 %v3452_v33, %v3427_v30  ;;  %v2070_v30 = vmul.f32 %v4812_v21, %v2030_v5  ;;  %v2907_v33 = vadd.f32 %v5541_v41, %v2871_v43  ;;  %v2071_v39 = vmul.f32 %v4812_v21, %v2032_v23  ;;  %v2158_v42 = vld [vmem:[#allocation2 + $0x3e8] ss:$2 sm:$0xff]  ;;  %v1905_v23 = vld [vmem:[#allocation2 + $0x411] ss:$2 sm:$0xff] }
 0x247   : > { %v2486_v60 = vadd.f32 %v2454_v24, %v2357_v17  ;;  %v2198_v56 = vmul.f32 %v4828_v32, %v2158_v42  ;;  %v2712_v43 = vmul.f32 %v4890_v19, %v2670_v57  ;;  %v2327_v5 = vmul.f32 %v4852_v53, %v2287_v6  ;;  %v2416_v17 = vld [vmem:[#allocation2 + $0x3ea] ss:$2 sm:$0xff] }
 0x248   : > { %4325 = vmatmul.msk.bf16.gmra.mxu1 %vm1510_vm3, %v2960_v29  ;;  %v3493_v7 = vadd.f32 %v3485_v51, %v3460_v50  ;;  %v1973_v29 = vadd.f32 %v1941_v13, %v1812_v12  ;;  %v2584_v51 = vmul.f32 %v4870_v1, %v2543_v38  ;;  %v2103_v63 = vadd.f32 %v2071_v39, %v1974_v25  ;;  %v2289_v13 = vld [vmem:[#allocation2 + $0x3f9] ss:$2 sm:$0xff] }
 0x249   : > { %v2615_v61 = vadd.f32 %v2583_v49, %v2486_v60  ;;  %v2328_v34 = vmul.f32 %v4852_v53, %v2289_v13  ;;  %v2456_v25 = vmul.f32 %v4868_v0, %v2416_v17  ;;  %v1814_v39 = vmul.f32 %v4799_v10, %v1776_v20  ;;  %v2545_v60 = vld [vmem:[#allocation2 + $0x410] ss:$2 sm:$0xff] }
 0x24a   : > { %v3526_v9 = vadd.f32 %v3518_v35, %v3493_v7  ;;  %v2102_v54 = vadd.f32 %v2070_v30, %v1973_v29  ;;  %v2939_v7 = vmax.f32 %v2907_v33, 0.0  ;;  %v2940_v35 = vmax.f32 %v2908_v36, 0.0  ;;  %v1778_v33 = vld [vmem:[#allocation2 + $0x420] ss:$2 sm:$0xff]  ;;  %v1907_v36 = vld [vmem:[#allocation2 + $0x421] ss:$2 sm:$0xff] }
 0x24b   : > { %v2616_v12 = vadd.f32 %v2584_v51, %v2487_v47  ;;  %v2841_v29 = vmul.f32 %v4904_v37, %v2799_v15  ;;  %v2842_v30 = vmul.f32 %v4904_v37, %v2801_v3  ;;  %v1943_v42 = vmul.f32 %v4801_v11, %v1905_v23  ;;  %v2034_v47 = vld [vmem:[#allocation2 + $0x412] ss:$2 sm:$0xff] }
 0x24c   : > { %v3538_v26 = vadd.f32 %v5569_v55, %v3526_v9  ;;  %v2230_v40 = vadd.f32 %v2198_v56, %v2102_v54  ;;  %v2231_v9 = vadd.f32 %v2199_v4, %v2103_v63  ;;  %v2961_v24 = vpack.c.bf16 %v2940_v35, %v2939_v7  ;;  %v2036_v56 = vld [vmem:[#allocation2 + $0x422] ss:$2 sm:$0xff]  ;;  %v2674_v35 = vld [vmem:[#allocation2 + $0x411] ss:$2 sm:$0xff]  ;;  %v2803_v23 = vld [vmem:[#allocation2 + $0x412] ss:$2 sm:$0xff] }
 0x24d   : > { %v2745_v27 = vadd.f32 %v2713_v14, %v2616_v12  ;;  %v1815_v51 = vmul.f32 %v4799_v10, %v1778_v33  ;;  %v1944_v54 = vmul.f32 %v4801_v11, %v1907_v36  ;;  %v2585_v58 = vmul.f32 %v4870_v1, %v2545_v60  ;;  %v2164_v3 = vld [vmem:[#allocation2 + $0x448] ss:$2 sm:$0xff]  ;;  %v2293_v33 = vld [vmem:[#allocation2 + $0x449] ss:$2 sm:$0xff] }
 0x24e   : > { %v3546_v31 = vmax.f32 %v3538_v26, 0.0  ;;  %v2744_v26 = vadd.f32 %v2712_v43, %v2615_v61  ;;  %v2359_v38 = vadd.f32 %v2327_v5, %v2230_v40  ;;  %v1975_v63 = vadd.f32 %v1943_v42, %v1814_v39  ;;  %v2162_v61 = vld [vmem:[#allocation2 + $0x438] ss:$2 sm:$0xff]  ;;  %v2676_v43 = vld [vmem:[#allocation2 + $0x421] ss:$2 sm:$0xff] }
 0x24f   : > { %v2874_v49 = vadd.f32 %v2842_v30, %v2745_v27  ;;  %v2072_v4 = vmul.f32 %v4812_v21, %v2034_v47  ;;  %v1976_v14 = vadd.f32 %v1944_v54, %v1815_v51  ;;  %v2073_v15 = vmul.f32 %v4812_v21, %v2036_v56  ;;  %v1909_v51 = vld [vmem:[#allocation2 + $0x461] ss:$2 sm:$0xff]  ;;  %v1911_v54 = vld [vmem:[#allocation2 + $0x471] ss:$2 sm:$0xff]  ;;  %v2422_v56 = vld [vmem:[#allocation2 + $0x44a] ss:$2 sm:$0xff] }
 0x250   : > { %v3553_v50 = vpack.c.bf16 %v3546_v31, %v3545_v44  ;;  %v2360_v44 = vadd.f32 %v2328_v34, %v2231_v9  ;;  %v2457_v31 = vmul.f32 %v4868_v0, %v2418_v28  ;;  %v2873_v48 = vadd.f32 %v2841_v29, %v2744_v26  ;;  %v2805_v28 = vld [vmem:[#allocation2 + $0x422] ss:$2 sm:$0xff] }
 0x251   : > { %v2488_v57 = vadd.f32 %v2456_v25, %v2359_v38  ;;  %v2910_v13 = vadd.f32 %v5541_v41, %v2874_v49  ;;  %v2714_v5 = vmul.f32 %v4890_v19, %v2674_v35  ;;  %v2104_v9 = vadd.f32 %v2072_v4, %v1975_v63  ;;  %v2549_v4 = vld [vmem:[#allocation2 + $0x460] ss:$2 sm:$0xff] }
 0x252   : > { %4344 = vmatmul.msk.bf16.vlgmr.msrb.gmra.mxu2 %vm3156_vm6, %v3553_v50  ;;  %v2547_v50 = vld [vmem:[#allocation2 + $0x420] ss:$2 sm:$0xff]  ;;  %v2489_v6 = vadd.f32 %v2457_v31, %v2360_v44  ;;  %v2909_v12 = vadd.f32 %v5541_v41, %v2873_v48  ;;  %v2200_v34 = vmul.f32 %v4828_v32, %v2162_v61  ;;  %v2715_v20 = vmul.f32 %v4890_v19, %v2676_v43 }
 0x253   : > { %v2586_v7 = vmul.f32 %v4870_v1, %v2547_v50  ;;  %v2617_v40 = vadd.f32 %v2585_v58, %v2488_v57  ;;  %v2942_v27 = vmax.f32 %v2910_v13, 0.0  ;;  %v2105_v29 = vadd.f32 %v2073_v15, %v1976_v14  ;;  %v2420_v44 = vld [vmem:[#allocation2 + $0x43a] ss:$2 sm:$0xff] }
 0x254   : > { %v2941_v26 = vmax.f32 %v2909_v12, 0.0  ;;  %v2201_v30 = vmul.f32 %v4828_v32, %v2164_v3  ;;  %v2843_v38 = vmul.f32 %v4904_v37, %v2803_v23  ;;  %v2232_v25 = vadd.f32 %v2200_v34, %v2104_v9  ;;  %v1780_v31 = vld [vmem:[#allocation2 + $0x460] ss:$2 sm:$0xff]  ;;  %v1782_v50 = vld [vmem:[#allocation2 + $0x470] ss:$2 sm:$0xff] }
 0x255   : > { %v2618_v17 = vadd.f32 %v2586_v7, %v2489_v6  ;;  %v2746_v36 = vadd.f32 %v2714_v5, %v2617_v40  ;;  %v2844_v42 = vmul.f32 %v4904_v37, %v2805_v28  ;;  %v2330_v49 = vmul.f32 %v4852_v53, %v2293_v33  ;;  %v2038_v14 = vld [vmem:[#allocation2 + $0x462] ss:$2 sm:$0xff]  ;;  %v2040_v15 = vld [vmem:[#allocation2 + $0x472] ss:$2 sm:$0xff]  ;;  %v2678_v34 = vld [vmem:[#allocation2 + $0x461] ss:$2 sm:$0xff] }
 0x256   : > { %v2962_v60 = vpack.c.bf16 %v2942_v27, %v2941_v26  ;;  %v2233_v48 = vadd.f32 %v2201_v30, %v2105_v29  ;;  %v2458_v63 = vmul.f32 %v4868_v0, %v2420_v44  ;;  %v1816_v6 = vmul.f32 %v4799_v10, %v1780_v31  ;;  %v2551_v3 = vld [vmem:[#allocation2 + $0x470] ss:$2 sm:$0xff] }
 0x257   : > { %v2747_v47 = vadd.f32 %v2715_v20, %v2618_v17  ;;  %v2875_v57 = vadd.f32 %v2843_v38, %v2746_v36  ;;  %v1817_v7 = vmul.f32 %v4799_v10, %v1782_v50  ;;  %v1945_v35 = vmul.f32 %v4801_v11, %v1909_v51  ;;  %v2166_v29 = vld [vmem:[#allocation2 + $0x488] ss:$2 sm:$0xff]  ;;  %v2168_v30 = vld [vmem:[#allocation2 + $0x498] ss:$2 sm:$0xff]  ;;  %v2680_v36 = vld [vmem:[#allocation2 + $0x471] ss:$2 sm:$0xff] }
 0x258   : > { %4326 = vmatmul.msk.bf16.gmra.mxu1 %vm1510_vm3, %v2961_v24  ;;  %v2291_v24 = vld [vmem:[#allocation2 + $0x439] ss:$2 sm:$0xff]  ;;  %v1946_v61 = vmul.f32 %v4801_v11, %v1911_v54  ;;  %v2362_v13 = vadd.f32 %v2330_v49, %v2233_v48  ;;  %v2459_v43 = vmul.f32 %v4868_v0, %v2422_v56  ;;  %v2587_v9 = vmul.f32 %v4870_v1, %v2549_v4  ;;  %v2807_v44 = vld [vmem:[#allocation2 + $0x462] ss:$2 sm:$0xff]  ;;  %v2295_v56 = vld [vmem:[#allocation2 + $0x489] ss:$2 sm:$0xff] }
 0x259   : > { %v2329_v39 = vmul.f32 %v4852_v53, %v2291_v24  ;;  %v2876_v12 = vadd.f32 %v2844_v42, %v2747_v47  ;;  %v2911_v40 = vadd.f32 %v5541_v41, %v2875_v57  ;;  %v1977_v17 = vadd.f32 %v1945_v35, %v1816_v6  ;;  %v2297_v57 = vld [vmem:[#allocation2 + $0x499] ss:$2 sm:$0xff] }
 0x25a   : > { %v1978_v20 = vadd.f32 %v1946_v61, %v1817_v7  ;;  %v2074_v23 = vmul.f32 %v4812_v21, %v2038_v14  ;;  %v2075_v24 = vmul.f32 %v4812_v21, %v2040_v15  ;;  %v2491_v27 = vadd.f32 %v2459_v43, %v2362_v13  ;;  %v2426_v13 = vld [vmem:[#allocation2 + $0x49a] ss:$2 sm:$0xff] }
 0x25b   : > { %v2361_v58 = vadd.f32 %v2329_v39, %v2232_v25  ;;  %v2912_v26 = vadd.f32 %v5541_v41, %v2876_v12  ;;  %v2588_v28 = vmul.f32 %v4870_v1, %v2551_v3  ;;  %v2943_v25 = vmax.f32 %v2911_v40, 0.0  ;;  %v2424_v12 = vld [vmem:[#allocation2 + $0x48a] ss:$2 sm:$0xff]  ;;  %v1913_v40 = vld [vmem:[#allocation2 + $0x4b1] ss:$2 sm:$0xff] }
 0x25c   : > { %v2716_v42 = vmul.f32 %v4890_v19, %v2678_v34  ;;  %v2106_v31 = vadd.f32 %v2074_v23, %v1977_v17  ;;  %v2202_v47 = vmul.f32 %v4828_v32, %v2166_v29  ;;  %v2203_v48 = vmul.f32 %v4828_v32, %v2168_v30  ;;  %v1784_v3 = vld [vmem:[#allocation2 + $0x4b0] ss:$2 sm:$0xff]  ;;  %v1915_v34 = vld [vmem:[#allocation2 + $0x4c1] ss:$2 sm:$0xff]  ;;  %v2555_v29 = vld [vmem:[#allocation2 + $0x4c0] ss:$2 sm:$0xff] }
 0x25d   : > { %v2490_v5 = vadd.f32 %v2458_v63, %v2361_v58  ;;  %v2944_v50 = vmax.f32 %v2912_v26, 0.0  ;;  %v2620_v51 = vadd.f32 %v2588_v28, %v2491_v27  ;;  %v2717_v54 = vmul.f32 %v4890_v19, %v2680_v36  ;;  %v2809_v58 = vld [vmem:[#allocation2 + $0x472] ss:$2 sm:$0xff] }
 0x25e   : > { %v2845_v4 = vmul.f32 %v4904_v37, %v2807_v44  ;;  %v2234_v6 = vadd.f32 %v2202_v47, %v2106_v31  ;;  %v2331_v35 = vmul.f32 %v4852_v53, %v2295_v56  ;;  %v2332_v61 = vmul.f32 %v4852_v53, %v2297_v57  ;;  %v2553_v28 = vld [vmem:[#allocation2 + $0x4b0] ss:$2 sm:$0xff] }
 0x25f   : > { %v2619_v39 = vadd.f32 %v2587_v9, %v2490_v5  ;;  %v2963_v43 = vpack.c.bf16 %v2944_v50, %v2943_v25  ;;  %v2749_v14 = vadd.f32 %v2717_v54, %v2620_v51  ;;  %v2846_v15 = vmul.f32 %v4904_v37, %v2809_v58  ;;  %v1786_v9 = vld [vmem:[#allocation2 + $0x4c0] ss:$2 sm:$0xff]  ;;  %v2684_v50 = vld [vmem:[#allocation2 + $0x4c1] ss:$2 sm:$0xff] }
 0x260   : > { %v2460_v23 = vmul.f32 %v4868_v0, %v2424_v12  ;;  %v2363_v26 = vadd.f32 %v2331_v35, %v2234_v6  ;;  %v1818_v30 = vmul.f32 %v4799_v10, %v1784_v3  ;;  %v1819_v25 = vmul.f32 %v4799_v10, %v1786_v9  ;;  %v2044_v44 = vld [vmem:[#allocation2 + $0x4c2] ss:$2 sm:$0xff] }
 0x261   : > { %v2748_v63 = vadd.f32 %v2716_v42, %v2619_v39  ;;  %v1948_v39 = vmul.f32 %v4801_v11, %v1915_v34  ;;  %v2042_v42 = vld [vmem:[#allocation2 + $0x4b2] ss:$2 sm:$0xff]  ;;  %v2589_v31 = vmul.f32 %v4870_v1, %v2553_v28  ;;  %v2077_v57 = vmul.f32 %v4812_v21, %v2044_v44  ;;  %v2813_v12 = vld [vmem:[#allocation2 + $0x4c2] ss:$2 sm:$0xff] }
 0x262   : > { %v2492_v47 = vadd.f32 %v2460_v23, %v2363_v26  ;;  %v2076_v54 = vmul.f32 %v4812_v21, %v2042_v42  ;;  %v2170_v58 = vld [vmem:[#allocation2 + $0x4d8] ss:$2 sm:$0xff]  ;;  %v2719_v6 = vmul.f32 %v4890_v19, %v2684_v50  ;;  %v2301_v21 = vld [vmem:[#allocation2 + $0x4e9] ss:$2 sm:$0xff]  ;;  %v2848_v34 = vmul.f32 %v4904_v37, %v2813_v12 }
 0x263   : > { %v2817_v12 = vld [vmem:[#allocation2 + $0x512] ss:$2 sm:$0xff] }
 0x268   : > { %4327 = vmatmul.msk.bf16.gmra.mxu1 %vm1510_vm3, %v2962_v60  ;;  %v2107_v60 = vadd.f32 %v2075_v24, %v1978_v20  ;;  %v2877_v20 = vadd.f32 %v2845_v4, %v2748_v63  ;;  %v2461_v24 = vmul.f32 %v4868_v0, %v2426_v13  ;;  %v2172_v63 = vld [vmem:[#allocation2 + $0x4e8] ss:$2 sm:$0xff] }
 0x26a   : > { %v2235_v7 = vadd.f32 %v2203_v48, %v2107_v60  ;;  %v2590_v60 = vmul.f32 %v4870_v1, %v2555_v29  ;;  %v2913_v56 = vadd.f32 %v5541_v41, %v2877_v20 }
 0x26c   : > { %v2364_v27 = vadd.f32 %v2332_v61, %v2235_v7  ;;  %v2621_v7 = vadd.f32 %v2589_v31, %v2492_v47  ;;  %v2811_v61 = vld [vmem:[#allocation2 + $0x4b2] ss:$2 sm:$0xff] }
 0x26d   : > { %v2847_v9 = vmul.f32 %v4904_v37, %v2811_v61  ;;  %v2559_v47 = vld [vmem:[#allocation2 + $0x510] ss:$2 sm:$0xff] }
 0x26e   : > { %v2493_v48 = vadd.f32 %v2461_v24, %v2364_v27  ;;  %v2815_v61 = vld [vmem:[#allocation2 + $0x502] ss:$2 sm:$0xff] }
 0x26f   : > { %v3064_v33 = vpop.f32.mrf.mxu1 }
 0x270   : > { %v3065_v38 = vadd.f32 %v5502_v16, %v3064_v33  ;;  %v1947_v33 = vmul.f32 %v4801_v11, %v1913_v40  ;;  %v1980_v11 = vadd.f32 %v1948_v39, %v1819_v25  ;;  %v2622_v35 = vadd.f32 %v2590_v60, %v2493_v48  ;;  %v2557_v60 = vld [vmem:[#allocation2 + $0x500] ss:$2 sm:$0xff] }
 0x271   : > { %v2205_v40 = vmul.f32 %v4828_v32, %v2172_v63 }
 0x272   : > { %v3132_v49 = vmax.f32 %v3065_v38, 0.0  ;;  %v2878_v38 = vadd.f32 %v2846_v15, %v2749_v14  ;;  %v1979_v51 = vadd.f32 %v1947_v33, %v1818_v30  ;;  %v2945_v14 = vmax.f32 %v2913_v56, 0.0  ;;  %v2428_v33 = vld [vmem:[#allocation2 + $0x4da] ss:$2 sm:$0xff] }
 0x273   : > { %v2109_v3 = vadd.f32 %v2077_v57, %v1980_v11  ;;  %v2751_v23 = vadd.f32 %v2719_v6, %v2622_v35  ;;  %v2334_v30 = vmul.f32 %v4852_v53, %v2301_v21  ;;  %v2462_v42 = vmul.f32 %v4868_v0, %v2428_v33  ;;  %v2686_v11 = vld [vmem:[#allocation2 + $0x501] ss:$2 sm:$0xff]  ;;  %v2688_v57 = vld [vmem:[#allocation2 + $0x511] ss:$2 sm:$0xff] }
 0x274   : > { %3211 = vst.msk [vmem:[#allocation3 + $0x79] sm:$0xff] %vm3156_vm6, %v3132_v49  ;;  %v2682_v49 = vld [vmem:[#allocation2 + $0x4b1] ss:$2 sm:$0xff]  ;;  %v2914_v10 = vadd.f32 %v5541_v41, %v2878_v38  ;;  %v2108_v13 = vadd.f32 %v2076_v54, %v1979_v51  ;;  %v2591_v51 = vmul.f32 %v4870_v1, %v2557_v60  ;;  %v2720_v6 = vmul.f32 %v4890_v19, %v2686_v11 }
 0x275   : > { %v2718_v4 = vmul.f32 %v4890_v19, %v2682_v49  ;;  %v2237_v29 = vadd.f32 %v2205_v40, %v2109_v3  ;;  %v2880_v25 = vadd.f32 %v2848_v34, %v2751_v23  ;;  %v2721_v35 = vmul.f32 %v4890_v19, %v2688_v57  ;;  %v3242_v34 = vld [vmem:[#allocation3 + $0x60] ss:$2 sm:$0xff] }
 0x276   : > { %v2946_v15 = vmax.f32 %v2914_v10, 0.0  ;;  %v2592_v10 = vmul.f32 %v4870_v1, %v2559_v47  ;;  %v2849_v3 = vmul.f32 %v4904_v37, %v2815_v61  ;;  %v2850_v40 = vmul.f32 %v4904_v37, %v2817_v12 }
 0x277   : > { %v3066_v5 = vpop.f32.mrf.mxu1  ;;  %v2750_v20 = vadd.f32 %v2718_v4, %v2621_v7  ;;  %v2366_v44 = vadd.f32 %v2334_v30, %v2237_v29  ;;  %v2916_v49 = vadd.f32 %v5541_v41, %v2880_v25  ;;  %v3308_v30 = vld [vmem:[#allocation3 + $0x62] ss:$2 sm:$0xff] }
 0x278   : > { %v3067_v17 = vadd.f32 %v5502_v16, %v3066_v5  ;;  %4328 = vmatmul.msk.bf16.gmra.mxu1 %vm1510_vm3, %v2963_v43  ;;  %v2204_v43 = vmul.f32 %v4828_v32, %v2170_v58  ;;  %v2299_v5 = vld [vmem:[#allocation2 + $0x4d9] ss:$2 sm:$0xff]  ;;  %v2964_v28 = vpack.c.bf16 %v2946_v15, %v2945_v14  ;;  %v2430_v32 = vld [vmem:[#allocation2 + $0x4ea] ss:$2 sm:$0xff] }
 0x279   : > { %v2333_v26 = vmul.f32 %v4852_v53, %v2299_v5  ;;  %v2879_v38 = vadd.f32 %v2847_v9, %v2750_v20  ;;  %v2463_v31 = vmul.f32 %v4868_v0, %v2430_v32  ;;  %v2948_v0 = vmax.f32 %v2916_v49, 0.0 }
 0x27a   : > { %v3133_v36 = vmax.f32 %v3067_v17, 0.0  ;;  %v2236_v24 = vadd.f32 %v2204_v43, %v2108_v13 }
 0x27b   : > { %v2915_v53 = vadd.f32 %v5541_v41, %v2879_v38  ;;  %v2495_v56 = vadd.f32 %v2463_v31, %v2366_v44 }
 0x27c   : > { %3212 = vst.msk [vmem:[#allocation3 + $0x81] sm:$0xff] %vm3156_vm6, %v3133_v36  ;;  %v2365_v39 = vadd.f32 %v2333_v26, %v2236_v24 }
 0x27d   : > { %v2947_v63 = vmax.f32 %v2915_v53, 0.0  ;;  %v2624_v7 = vadd.f32 %v2592_v10, %v2495_v56 }
 0x27e   : > { %v2494_v50 = vadd.f32 %v2462_v42, %v2365_v39 }
 0x27f   : > { %v2965_v43 = vpack.c.bf16 %v2948_v0, %v2947_v63  ;;  %v2753_v15 = vadd.f32 %v2721_v35, %v2624_v7 }
 0x280   : > { %v2623_v4 = vadd.f32 %v2591_v51, %v2494_v50 }
 0x281   : > { %v2882_v9 = vadd.f32 %v2850_v40, %v2753_v15 }
 0x282   : > { %v2752_v14 = vadd.f32 %v2720_v6, %v2623_v4 }
 0x283   : > { %v2918_v24 = vadd.f32 %v5541_v41, %v2882_v9  ;;  %v3340_v33 = vld [vmem:[#allocation3 + $0x78] ss:$2 sm:$0xff]  ;;  %v3373_v53 = vld [vmem:[#allocation3 + $0x79] ss:$2 sm:$0xff] }
 0x284   : > { %v2881_v21 = vadd.f32 %v2849_v3, %v2752_v14  ;;  %v3354_v44 = vmul.f32 %v5486_v46, %v3340_v33  ;;  %v3387_v56 = vmul.f32 %v5495_v8, %v3373_v53  ;;  %v3406_v11 = vld [vmem:[#allocation3 + $0x7a] ss:$2 sm:$0xff] }
 0x285   : > { %v3069_v17 = vpop.f32.mrf.mxu1  ;;  %v2950_v29 = vmax.f32 %v2918_v24, 0.0  ;;  %v3420_v35 = vmul.f32 %v5506_v22, %v3406_v11 }
 0x286   : > { %v3070_v27 = vadd.f32 %v5502_v16, %v3069_v17  ;;  %v3275_v17 = vld [vmem:[#allocation3 + $0x61] ss:$2 sm:$0xff]  ;;  %v2917_v23 = vadd.f32 %v5541_v41, %v2881_v21  ;;  %v3322_v41 = vmul.f32 %v5467_v18, %v3308_v30 }
 0x287   : > { %v3289_v37 = vmul.f32 %v5458_v62, %v3275_v17 }
 0x288   : > { %v3134_v36 = vmax.f32 %v3070_v27, 0.0  ;;  %4329 = vmatmul.msk.bf16.gmra.mxu1 %vm1510_vm3, %v2964_v28  ;;  %v3256_v27 = vmul.f32 %v5456_v59, %v3242_v34  ;;  %v2949_v28 = vmax.f32 %v2917_v23, 0.0 }
 0x28a   : > { %3213 = vst.msk [vmem:[#allocation3 + $0x91] sm:$0xff] %vm3156_vm6, %v3134_v36  ;;  %v3297_v32 = vadd.f32 %v3289_v37, %v3256_v27  ;;  %v2966_v42 = vpack.c.bf16 %v2950_v29, %v2949_v28 }
 0x28d   : > { %v3071_v48 = vpop.f32.mrf.mxu1 }
 0x28e   : > { %v3072_v54 = vadd.f32 %v5502_v16, %v3071_v48  ;;  %v3330_v48 = vadd.f32 %v3322_v41, %v3297_v32 }
 0x290   : > { %v3135_v58 = vmax.f32 %v3072_v54, 0.0  ;;  %v3362_v49 = vadd.f32 %v3354_v44, %v3330_v48 }
 0x292   : > { %3214 = vst.msk [vmem:[#allocation3 + $0x99] sm:$0xff] %vm3156_vm6, %v3135_v58  ;;  %v3395_v4 = vadd.f32 %v3387_v56, %v3362_v49 }
 0x295   : > { %v3074_v13 = vpop.f32.mrf.mxu1 }
 0x296   : > { %v3075_v1 = vadd.f32 %v5502_v16, %v3074_v13 }
 0x298   : > { %v3136_v5 = vmax.f32 %v3075_v1, 0.0  ;;  %4330 = vmatmul.msk.bf16.gmra.mxu1 %vm1510_vm3, %v2965_v43  ;;  %v3428_v43 = vadd.f32 %v3420_v35, %v3395_v4 }
 0x299   : > { %v3244_v38 = vld [vmem:[#allocation3 + $0x90] ss:$2 sm:$0xff]  ;;  %v3277_v25 = vld [vmem:[#allocation3 + $0x91] ss:$2 sm:$0xff] }
 0x29a   : > { %3215 = vst.msk [vmem:[#allocation3 + $0xa9] sm:$0xff] %vm3156_vm6, %v3136_v5  ;;  %v3257_v60 = vmul.f32 %v5456_v59, %v3244_v38  ;;  %v3290_v47 = vmul.f32 %v5458_v62, %v3277_v25  ;;  %v3310_v50 = vld [vmem:[#allocation3 + $0x92] ss:$2 sm:$0xff]  ;;  %v3472_v14 = vld [vmem:[#allocation3 + $0x91] ss:$2 sm:$0xff] }
 0x29b   : > { %v3439_v57 = vld [vmem:[#allocation3 + $0x90] ss:$2 sm:$0xff]  ;;  %v3323_v63 = vmul.f32 %v5467_v18, %v3310_v50  ;;  %v3486_v9 = vmul.f32 %v5546_v45, %v3472_v14 }
 0x29c   : > { %v3298_v54 = vadd.f32 %v3290_v47, %v3257_v60  ;;  %v3453_v61 = vmul.f32 %v5522_v52, %v3439_v57 }
 0x29d   : > { %v3076_v19 = vpop.f32.mrf.mxu1 }
 0x29e   : > { %v3077_v20 = vadd.f32 %v5502_v16, %v3076_v19  ;;  %v3331_v7 = vadd.f32 %v3323_v63, %v3298_v54  ;;  %v3461_v15 = vadd.f32 %v3453_v61, %v3428_v43  ;;  %v3505_v19 = vld [vmem:[#allocation3 + $0x92] ss:$2 sm:$0xff] }
 0x29f   : > { %v3519_v37 = vmul.f32 %v5553_v2, %v3505_v19 }
 0x2a0   : > { %v3137_v26 = vmax.f32 %v3077_v20, 0.0  ;;  %v3494_v20 = vadd.f32 %v3486_v9, %v3461_v15 }
 0x2a2   : > { %3216 = vst.msk [vmem:[#allocation3 + $0xb1] sm:$0xff] %vm3156_vm6, %v3137_v26  ;;  %v3527_v33 = vadd.f32 %v3519_v37, %v3494_v20 }
 0x2a4   : > { %v3539_v41 = vadd.f32 %v5569_v55, %v3527_v33 }
 0x2a5   : > { %v3079_v36 = vpop.f32.mrf.mxu1 }
 0x2a6   : > { %v3080_v39 = vadd.f32 %v5502_v16, %v3079_v36 }
 0x2a8   : > { %v3138_v31 = vmax.f32 %v3080_v39, 0.0  ;;  %4331 = vmatmul.msk.bf16.gmra.mxu1 %vm1510_vm3, %v2966_v42 }
 0x2a9   : > { %v3342_v51 = vld [vmem:[#allocation3 + $0xa8] ss:$2 sm:$0xff]  ;;  %v3375_v12 = vld [vmem:[#allocation3 + $0xa9] ss:$2 sm:$0xff] }
 0x2aa   : > { %3217 = vst.msk [vmem:[#allocation3 + $0xc1] sm:$0xff] %vm3156_vm6, %v3138_v31  ;;  %v3355_v0 = vmul.f32 %v5486_v46, %v3342_v51  ;;  %v3388_v1 = vmul.f32 %v5495_v8, %v3375_v12  ;;  %v3408_v40 = vld [vmem:[#allocation3 + $0xaa] ss:$2 sm:$0xff]  ;;  %v3547_v31 = vmax.f32 %v3539_v41, 0.0 }
 0x2ab   : > { %v3421_v17 = vmul.f32 %v5506_v22, %v3408_v40  ;;  %v5723_v51 = vld [vmem:[%s5843_s6] ss:$0 sm:$0xff] }
 0x2ac   : > { %v3363_v13 = vadd.f32 %v3355_v0, %v3331_v7 }
 0x2ad   : > { %v3081_v10 = vpop.f32.mrf.mxu1 }
 0x2ae   : > { %v3082_v58 = vadd.f32 %v5502_v16, %v3081_v10  ;;  %v3396_v21 = vadd.f32 %v3388_v1, %v3363_v13 }
 0x2b0   : > { %v3139_v6 = vmax.f32 %v3082_v58, 0.0  ;;  %v3429_v26 = vadd.f32 %v3421_v17, %v3396_v21 }
 0x2b2   : > { %3218 = vst.msk [vmem:[#allocation3 + $0xc9] sm:$0xff] %vm3156_vm6, %v3139_v6 }
 0x2b5   : > { %v3084_v3 = vpop.f32.mrf.mxu1 }
 0x2b6   : > { %v3085_v5 = vadd.f32 %v5502_v16, %v3084_v3 }
 0x2b8   : > { %v3140_v34 = vmax.f32 %v3085_v5, 0.0 }
 0x2b9   : > { %v3441_v23 = vld [vmem:[#allocation3 + $0xc0] ss:$2 sm:$0xff]  ;;  %v3474_v24 = vld [vmem:[#allocation3 + $0xc1] ss:$2 sm:$0xff] }
 0x2ba   : > { %3219 = vst.msk [vmem:[#allocation3 + $0xd9] sm:$0xff] %vm3156_vm6, %v3140_v34  ;;  %v3454_v27 = vmul.f32 %v5522_v52, %v3441_v23  ;;  %v3507_v28 = vld [vmem:[#allocation3 + $0xc2] ss:$2 sm:$0xff]  ;;  %v3487_v30 = vmul.f32 %v5546_v45, %v3474_v24  ;;  %v3279_v63 = vld [vmem:[#allocation3 + $0xc1] ss:$2 sm:$0xff] }
 0x2bb   : > { %v3520_v25 = vmul.f32 %v5553_v2, %v3507_v28  ;;  %v3246_v58 = vld [vmem:[#allocation3 + $0xc0] ss:$2 sm:$0xff]  ;;  %v3291_v7 = vmul.f32 %v5458_v62, %v3279_v63 }
 0x2bc   : > { %v3462_v29 = vadd.f32 %v3454_v27, %v3429_v26  ;;  %v3258_v6 = vmul.f32 %v5456_v59, %v3246_v58  ;;  %v3312_v35 = vld [vmem:[#allocation3 + $0xc2] ss:$2 sm:$0xff] }
 0x2bd   : > { %v3086_v32 = vpop.f32.mrf.mxu1  ;;  %v3324_v15 = vmul.f32 %v5467_v18, %v3312_v35 }
 0x2be   : > { %v3087_v36 = vadd.f32 %v5502_v16, %v3086_v32  ;;  %v3495_v38 = vadd.f32 %v3487_v30, %v3462_v29  ;;  %v3299_v12 = vadd.f32 %v3291_v7, %v3258_v6 }
 0x2c0   : > { %v3141_v39 = vmax.f32 %v3087_v36, 0.0  ;;  %v3528_v42 = vadd.f32 %v3520_v25, %v3495_v38  ;;  %v3332_v9 = vadd.f32 %v3324_v15, %v3299_v12 }
 0x2c2   : > { %3220 = vst.msk [vmem:[#allocation3 + $0xe1] sm:$0xff] %vm3156_vm6, %v3141_v39  ;;  %v3540_v44 = vadd.f32 %v5569_v55, %v3528_v42 }
 0x2c4   : > { %v3548_v60 = vmax.f32 %v3540_v44, 0.0 }
 0x2c5   : > { %v3089_v47 = vpop.f32.mrf.mxu1 }
 0x2c6   : > { %v3090_v48 = vadd.f32 %v5502_v16, %v3089_v47  ;;  %v3554_v53 = vpack.c.bf16 %v3548_v60, %v3547_v31 }
 0x2c8   : > { %v3142_v49 = vmax.f32 %v3090_v48, 0.0  ;;  %4345 = vmatmul.msk.bf16.gmra.mxu2 %vm3156_vm6, %v3554_v53 }
 0x2c9   : > { %v3344_v61 = vld [vmem:[#allocation3 + $0xd8] ss:$2 sm:$0xff]  ;;  %v3377_v19 = vld [vmem:[#allocation3 + $0xd9] ss:$2 sm:$0xff] }
 0x2ca   : > { %3221 = vst.msk [vmem:[#allocation3 + $0xf1] sm:$0xff] %vm3156_vm6, %v3142_v49  ;;  %v3356_v3 = vmul.f32 %v5486_v46, %v3344_v61  ;;  %v3389_v24 = vmul.f32 %v5495_v8, %v3377_v19  ;;  %v3410_v27 = vld [vmem:[#allocation3 + $0xda] ss:$2 sm:$0xff] }
 0x2cb   : > { %v3422_v38 = vmul.f32 %v5506_v22, %v3410_v27 }
 0x2cc   : > { %v3364_v34 = vadd.f32 %v3356_v3, %v3332_v9 }
 0x2cd   : > { %v3091_v50 = vpop.f32.mrf.mxu1 }
 0x2ce   : > { %v3092_v54 = vadd.f32 %v5723_v51, %v3091_v50  ;;  %v3397_v33 = vadd.f32 %v3389_v24, %v3364_v34 }
 0x2d0   : > { %v3143_v56 = vmax.f32 %v3092_v54, 0.0  ;;  %v3430_v41 = vadd.f32 %v3422_v38, %v3397_v33 }
 0x2d2   : > { %3222 = vst.msk [vmem:[#allocation3 + $0xf9] sm:$0xff] %vm3156_vm6, %v3143_v56 }
 0x2d5   : > { %v3094_v10 = vpop.f32.mrf.mxu1 }
 0x2d6   : > { %v3095_v16 = vadd.f32 %v5723_v51, %v3094_v10 }
 0x2d8   : > { %v3144_v11 = vmax.f32 %v3095_v16, 0.0 }
 0x2d9   : > { %v3248_v43 = vld [vmem:[#allocation3 + $0xf0] ss:$2 sm:$0xff]  ;;  %v3281_v14 = vld [vmem:[#allocation3 + $0xf1] ss:$2 sm:$0xff] }
 0x2da   : > { %3223 = vst.msk [vmem:[#allocation3 + $0x109] sm:$0xff] %vm3156_vm6, %v3144_v11  ;;  %v3259_v5 = vmul.f32 %v5456_v59, %v3248_v43  ;;  %v3292_v21 = vmul.f32 %v5458_v62, %v3281_v14  ;;  %v3314_v17 = vld [vmem:[#allocation3 + $0xf2] ss:$2 sm:$0xff]  ;;  %v3476_v44 = vld [vmem:[#allocation3 + $0xf1] ss:$2 sm:$0xff] }
 0x2db   : > { %v3443_v37 = vld [vmem:[#allocation3 + $0xf0] ss:$2 sm:$0xff]  ;;  %v3325_v29 = vmul.f32 %v5467_v18, %v3314_v17  ;;  %v3488_v50 = vmul.f32 %v5546_v45, %v3476_v44 }
 0x2dc   : > { %v3300_v23 = vadd.f32 %v3292_v21, %v3259_v5  ;;  %v3455_v25 = vmul.f32 %v5522_v52, %v3443_v37  ;;  %v3509_v54 = vld [vmem:[#allocation3 + $0xf2] ss:$2 sm:$0xff] }
 0x2dd   : > { %v3096_v57 = vpop.f32.mrf.mxu1 }
 0x2de   : > { %v3097_v0 = vadd.f32 %v5723_v51, %v3096_v57  ;;  %v3333_v36 = vadd.f32 %v3325_v29, %v3300_v23  ;;  %v3463_v60 = vadd.f32 %v3455_v25, %v3430_v41 }
 0x2e0   : > { %v3145_v4 = vmax.f32 %v3097_v0, 0.0  ;;  %v3496_v16 = vadd.f32 %v3488_v50, %v3463_v60  ;;  %v3521_v0 = vmul.f32 %v5553_v2, %v3509_v54 }
 0x2e2   : > { %3224 = vst.msk [vmem:[#allocation3 + $0x111] sm:$0xff] %vm3156_vm6, %v3145_v4  ;;  %v3529_v35 = vadd.f32 %v3521_v0, %v3496_v16 }
 0x2e4   : > { %v3541_v15 = vadd.f32 %v5569_v55, %v3529_v35 }
 0x2e5   : > { %v3099_v13 = vpop.f32.mrf.mxu1 }
 0x2e6   : > { %v3100_v1 = vadd.f32 %v5723_v51, %v3099_v13 }
 0x2e8   : > { %v3146_v40 = vmax.f32 %v3100_v1, 0.0 }
 0x2e9   : > { %v3346_v20 = vld [vmem:[#allocation3 + $0x108] ss:$2 sm:$0xff]  ;;  %v3379_v39 = vld [vmem:[#allocation3 + $0x109] ss:$2 sm:$0xff] }
 0x2ea   : > { %3225 = vst.msk [vmem:[#allocation3 + $0x121] sm:$0xff] %vm3156_vm6, %v3146_v40  ;;  %v3357_v30 = vmul.f32 %v5486_v46, %v3346_v20  ;;  %v3390_v31 = vmul.f32 %v5495_v8, %v3379_v39  ;;  %v3412_v48 = vld [vmem:[#allocation3 + $0x10a] ss:$2 sm:$0xff]  ;;  %v3549_v40 = vmax.f32 %v3541_v15, 0.0 }
 0x2eb   : > { %v3423_v10 = vmul.f32 %v5506_v22, %v3412_v48 }
 0x2ec   : > { %v3365_v42 = vadd.f32 %v3357_v30, %v3333_v36 }
 0x2ed   : > { %v3101_v26 = vpop.f32.mrf.mxu1 }
 0x2ee   : > { %v3102_v28 = vadd.f32 %v5723_v51, %v3101_v26  ;;  %v3398_v49 = vadd.f32 %v3390_v31, %v3365_v42 }
 0x2f0   : > { %v3147_v32 = vmax.f32 %v3102_v28, 0.0  ;;  %v3431_v58 = vadd.f32 %v3423_v10, %v3398_v49 }
 0x2f2   : > { %3226 = vst.msk [vmem:[#allocation3 + $0x129] sm:$0xff] %vm3156_vm6, %v3147_v32 }
 0x2f5   : > { %v3104_v47 = vpop.f32.mrf.mxu1 }
 0x2f6   : > { %v3105_v53 = vadd.f32 %v5723_v51, %v3104_v47 }
 0x2f8   : > { %v3148_v56 = vmax.f32 %v3105_v53, 0.0 }
 0x2f9   : > { %v3445_v11 = vld [vmem:[#allocation3 + $0x120] ss:$2 sm:$0xff]  ;;  %v3478_v57 = vld [vmem:[#allocation3 + $0x121] ss:$2 sm:$0xff] }
 0x2fa   : > { %3227 = vst.msk [vmem:[#allocation3 + $0x139] sm:$0xff] %vm3156_vm6, %v3148_v56  ;;  %v3456_v63 = vmul.f32 %v5522_v52, %v3445_v11  ;;  %v3511_v4 = vld [vmem:[#allocation3 + $0x122] ss:$2 sm:$0xff]  ;;  %v3489_v7 = vmul.f32 %v5546_v45, %v3478_v57  ;;  %v3283_v28 = vld [vmem:[#allocation3 + $0x121] ss:$2 sm:$0xff] }
 0x2fb   : > { %v3522_v43 = vmul.f32 %v5553_v2, %v3511_v4  ;;  %v3250_v37 = vld [vmem:[#allocation3 + $0x120] ss:$2 sm:$0xff]  ;;  %v3293_v32 = vmul.f32 %v5458_v62, %v3283_v28 }
 0x2fc   : > { %v3464_v6 = vadd.f32 %v3456_v63, %v3431_v58  ;;  %v3260_v33 = vmul.f32 %v5456_v59, %v3250_v37  ;;  %v3316_v36 = vld [vmem:[#allocation3 + $0x122] ss:$2 sm:$0xff] }
 0x2fd   : > { %v3106_v61 = vpop.f32.mrf.mxu1  ;;  %v3326_v31 = vmul.f32 %v5467_v18, %v3316_v36 }
 0x2fe   : > { %v3107_v12 = vadd.f32 %v5723_v51, %v3106_v61  ;;  %v3497_v13 = vadd.f32 %v3489_v7, %v3464_v6  ;;  %v3301_v25 = vadd.f32 %v3293_v32, %v3260_v33  ;;  %v3606_v33 = vpop.f32.mrf.mxu2 }
 0x300   : > { %v3149_v14 = vmax.f32 %v3107_v12, 0.0  ;;  %v3530_v1 = vadd.f32 %v3522_v43, %v3497_v13  ;;  %v3334_v49 = vadd.f32 %v3326_v31, %v3301_v25 }
 0x302   : > { %3228 = vst.msk [vmem:[#allocation3 + $0x141] sm:$0xff] %vm3156_vm6, %v3149_v14  ;;  %v3542_v3 = vadd.f32 %v5569_v55, %v3530_v1 }
 0x304   : > { %v3550_v5 = vmax.f32 %v3542_v3, 0.0 }
 0x305   : > { %v3109_v21 = vpop.f32.mrf.mxu1 }
 0x306   : > { %v3110_v9 = vadd.f32 %v5723_v51, %v3109_v21  ;;  %v3555_v19 = vpack.c.bf16 %v3550_v5, %v3549_v40  ;;  %v3608_v32 = vpop.f32.mrf.mxu2 }
 0x308   : > { %v3150_v34 = vmax.f32 %v3110_v9, 0.0  ;;  %4346 = vmatmul.msk.bf16.gmra.mxu2 %vm3156_vm6, %v3555_v19 }
 0x309   : > { %v3348_v38 = vld [vmem:[#allocation3 + $0x138] ss:$2 sm:$0xff]  ;;  %v3381_v50 = vld [vmem:[#allocation3 + $0x139] ss:$2 sm:$0xff] }
 0x30a   : > { %3229 = vst.msk [vmem:[#allocation3 + $0x151] sm:$0xff] %vm3156_vm6, %v3150_v34  ;;  %v3358_v60 = vmul.f32 %v5486_v46, %v3348_v38  ;;  %v3391_v11 = vmul.f32 %v5495_v8, %v3381_v50  ;;  %v3414_v58 = vld [vmem:[#allocation3 + $0x13a] ss:$2 sm:$0xff] }
 0x30b   : > { %v3424_v35 = vmul.f32 %v5506_v22, %v3414_v58 }
 0x30c   : > { %v3366_v54 = vadd.f32 %v3358_v60, %v3334_v49 }
 0x30d   : > { %v3111_v17 = vpop.f32.mrf.mxu1 }
 0x30e   : > { %v3112_v20 = vadd.f32 %v5723_v51, %v3111_v17 }
 0x310   : > { %v3151_v23 = vmax.f32 %v3112_v20, 0.0 }
 0x312   : > { %3230 = vst.msk [vmem:[#allocation3 + $0x159] sm:$0xff] %vm3156_vm6, %v3151_v23 }
 0x315   : > { %v3114_v24 = vpop.f32.mrf.mxu1 }
 0x316   : > { %v3115_v55 = vadd.f32 %v5723_v51, %v3114_v24 }
 0x318   : > { %v3152_v26 = vmax.f32 %v3115_v55, 0.0 }
 0x319   : > { %v3252_v42 = vld [vmem:[#allocation3 + $0x150] ss:$2 sm:$0xff]  ;;  %v3285_v41 = vld [vmem:[#allocation3 + $0x151] ss:$2 sm:$0xff] }
 0x31a   : > { %3231 = vst.msk [vmem:[#allocation3 + $0x169] sm:$0xff] %vm3156_vm6, %v3152_v26  ;;  %v3261_v48 = vmul.f32 %v5456_v59, %v3252_v42  ;;  %v3294_v53 = vmul.f32 %v5458_v62, %v3285_v41  ;;  %v3318_v56 = vld [vmem:[#allocation3 + $0x152] ss:$2 sm:$0xff]  ;;  %v3399_v62 = vadd.f32 %v3391_v11, %v3366_v54  ;;  %v3480_v14 = vld [vmem:[#allocation3 + $0x151] ss:$2 sm:$0xff] }
 0x31b   : > { %v3447_v63 = vld [vmem:[#allocation3 + $0x150] ss:$2 sm:$0xff]  ;;  %v3327_v4 = vmul.f32 %v5467_v18, %v3318_v56 }
 0x31c   : > { %v3302_v16 = vadd.f32 %v3294_v53, %v3261_v48  ;;  %v3457_v61 = vmul.f32 %v5522_v52, %v3447_v63  ;;  %v3432_v43 = vadd.f32 %v3424_v35, %v3399_v62  ;;  %v3513_v3 = vld [vmem:[#allocation3 + $0x152] ss:$2 sm:$0xff] }
 0x31d   : > { %v3116_v27 = vpop.f32.mrf.mxu1  ;;  %v3523_v17 = vmul.f32 %v5553_v2, %v3513_v3 }
 0x31e   : > { %v3117_v29 = vadd.f32 %v5723_v51, %v3116_v27  ;;  %v3335_v7 = vadd.f32 %v3327_v4, %v3302_v16 }
 0x320   : > { %v3153_v30 = vmax.f32 %v3117_v29, 0.0 }
 0x322   : > { %3232 = vst.msk [vmem:[#allocation3 + $0x171] sm:$0xff] %vm3156_vm6, %v3153_v30 }
 0x325   : > { %v3119_v39 = vpop.f32.mrf.mxu1 }
 0x326   : > { %v3120_v44 = vadd.f32 %v5723_v51, %v3119_v39 }
 0x328   : > { %v3154_v47 = vmax.f32 %v3120_v44, 0.0 }
 0x329   : > { %v3350_v10 = vld [vmem:[#allocation3 + $0x168] ss:$2 sm:$0xff]  ;;  %v3383_v12 = vld [vmem:[#allocation3 + $0x169] ss:$2 sm:$0xff] }
 0x32a   : > { %3233 = vst.msk [vmem:[#allocation3 + $0x181] sm:$0xff] %vm3156_vm6, %v3154_v47  ;;  %v3359_v59 = vmul.f32 %v5486_v46, %v3350_v10  ;;  %v3392_v1 = vmul.f32 %v5495_v8, %v3383_v12  ;;  %v3416_v15 = vld [vmem:[#allocation3 + $0x16a] ss:$2 sm:$0xff]  ;;  %v3490_v46 = vmul.f32 %v5546_v45, %v3480_v14 }
 0x32b   : > { %v3425_v40 = vmul.f32 %v5506_v22, %v3416_v15  ;;  %v4487_v22 = vld [vmem:[%s5845_s8] ss:$0 sm:$0xff] }
 0x32c   : > { %v3367_v13 = vadd.f32 %v3359_v59, %v3335_v7 }
 0x32d   : > { %v3121_v57 = vpop.f32.mrf.mxu1 }
 0x32e   : > { %v3122_v0 = vadd.f32 %v5723_v51, %v3121_v57  ;;  %v3465_v51 = vadd.f32 %v3457_v61, %v3432_v43  ;;  %v3400_v18 = vadd.f32 %v3392_v1, %v3367_v13 }
 0x330   : > { %v3155_v6 = vmax.f32 %v3122_v0, 0.0  ;;  %v3498_v5 = vadd.f32 %v3490_v46, %v3465_v51  ;;  %v3433_v19 = vadd.f32 %v3425_v40, %v3400_v18 }
 0x332   : > { %3234 = vst.msk [vmem:[#allocation3 + $0x189] sm:$0xff] %vm3156_vm6, %v3155_v6  ;;  %v3531_v24 = vadd.f32 %v3523_v17, %v3498_v5 }
 0x334   : > { %v3543_v37 = vadd.f32 %v4487_v22, %v3531_v24 }
 0x336   : > { %v3551_v29 = vmax.f32 %v3543_v37, 0.0 }
 0x339   : > { %v3449_v21 = vld [vmem:[#allocation3 + $0x180] ss:$2 sm:$0xff]  ;;  %v3482_v9 = vld [vmem:[#allocation3 + $0x181] ss:$2 sm:$0xff] }
 0x33a   : > { %v3458_v34 = vmul.f32 %v5522_v52, %v3449_v21  ;;  %v3515_v20 = vld [vmem:[#allocation3 + $0x182] ss:$2 sm:$0xff]  ;;  %v3491_v8 = vmul.f32 %v5546_v45, %v3482_v9 }
 0x33b   : > { %v3524_v26 = vmul.f32 %v5553_v2, %v3515_v20  ;;  %v4480_v2 = vld [vmem:[%s5847_s10] ss:$0 sm:$0xff] }
 0x33c   : > { %v3466_v23 = vadd.f32 %v3458_v34, %v3433_v19  ;;  %v3607_v50 = vadd.f32 %v4480_v2, %v3606_v33  ;;  %v3609_v16 = vadd.f32 %v4480_v2, %v3608_v32 }
 0x33e   : > { %v3499_v55 = vadd.f32 %v3491_v8, %v3466_v23  ;;  %v3626_v54 = vmax.f32 %v3607_v50, 0.0  ;;  %v3627_v11 = vmax.f32 %v3609_v16, 0.0 }
 0x340   : > { %v3532_v27 = vadd.f32 %v3524_v26, %v3499_v55 }
 0x342   : > { %v3544_v28 = vadd.f32 %v4487_v22, %v3532_v27 }
 0x344   : > { %v3552_v30 = vmax.f32 %v3544_v28, 0.0 }
 0x346   : > { %v3556_v52 = vpack.c.bf16 %v3552_v30, %v3551_v29 }
 0x348   : > { %4347 = vmatmul.msk.bf16.gmra.mxu2 %vm3156_vm6, %v3556_v52 }
 0x34b   : > { %v3611_v36 = vpop.f32.mrf.mxu2 }
 0x34c   : > { %v3612_v63 = vadd.f32 %v4480_v2, %v3611_v36 }
 0x34e   : > { %v3628_v0 = vmax.f32 %v3612_v63, 0.0 }
 0x353   : > { %v3613_v45 = vpop.f32.mrf.mxu2 }
 0x354   : > { %v3614_v62 = vadd.f32 %v4480_v2, %v3613_v45 }
 0x356   : > { %v3629_v6 = vmax.f32 %v3614_v62, 0.0 }
 0x38b   : > { %v3616_v38 = vpop.f32.mrf.mxu2 }
 0x38c   : > { %v3617_v25 = vadd.f32 %v4480_v2, %v3616_v38 }
 0x38e   : > { %v3630_v39 = vmax.f32 %v3617_v25, 0.0 }
 0x390   : > { %3638 = vrot.lane.b32.xlu0 %v3630_v39, %s4554_s24 }
 0x393   : > { %v3618_v42 = vpop.f32.mrf.mxu2 }
 0x394   : > { %v3619_v41 = vadd.f32 %v4480_v2, %v3618_v42 }
 0x396   : > { %v3631_v44 = vmax.f32 %v3619_v41, 0.0 }
 0x398   : > { %3640 = vrot.lane.b32.xlu0 %v3631_v44, %s4554_s24 }
 0x3cb   : > { %v3621_v31 = vpop.f32.mrf.mxu2 }
 0x3cc   : > { %v3622_v60 = vadd.f32 %v4480_v2, %v3621_v31 }
 0x3ce   : > { %v3632_v47 = vmax.f32 %v3622_v60, 0.0 }
 0x3d0   : > { %3642 = vrot.lane.b32.xlu1 %v3632_v47, %s4554_s24 }
 0x3d3   : > { %v3623_v48 = vpop.f32.mrf.mxu2 }
 0x3d4   : > { %v3624_v53 = vadd.f32 %v4480_v2, %v3623_v48 }
 0x3d6   : > { %v3633_v49 = vmax.f32 %v3624_v53, 0.0 }
 0x3d8   : > { %3644 = vrot.lane.b32.xlu1 %v3633_v49, %s4554_s24  ;;  %s4502_s24 = sshra.s32 %s3675_s22, 4  ;;  %s4503_s24 = int_to_ptr.hbm [resolvable:$true] %s4502_s24 }
 0x3d9   : > { %s4504_s29 = scalar_lea.hbm %s4503_s24, 32  ;;  %p4509_p0 = scmp.lt.s32.totalorder %s4503_s24, %s5848_s11 }
 0x3da   : > { %p4505_p11 = scmp.ne.s32.totalorder %s4503_s24, %s4504_s29  ;;  %p4510_p1 = scmp.lt.s32.totalorder %s4508_s14, %s4504_s29 }
 0x3dc   : > { %p4506_p12 = pnand %p4505_p11, %p4655_p5  ;;  %p4511_p2 = por %p4510_p1, %p4509_p0 }
 0x3de   : > { %p4507_p13 = pneg %p4506_p12 }
 0x3e0   : > { %p4512_p3 = pnand %p4511_p2, %p4507_p13 }
 0x402   : > { %v3639_v56 = vpop.permute.xlu0 %3638 }
 0x403   : > { %v3651_v10 = vsel %vm3650_vm9, %v3626_v54, %v3639_v56 }
 0x404   : > { %3655 = vst [vmem:[%s379_s30] sm:$0xff] %v3651_v10 }
 0x40a   : > { %v3641_v57 = vpop.permute.xlu0 %3640 }
 0x40b   : > { %v3652_v58 = vsel %vm3650_vm9, %v3627_v11, %v3641_v57 }
 0x40c   : > { %3656 = vst [vmem:[%s379_s30 + $0x8] sm:$0xff] %v3652_v58 }
 0x442   : > { %v3643_v4 = vpop.permute.xlu1 %3642 }
 0x443   : > { %v3653_v59 = vsel %vm3650_vm9, %v3628_v0, %v3643_v4 }
 0x444   : > { %3657 = vst [vmem:[%s379_s30 + $0x10] sm:$0xff] %v3653_v59 }
 0x44a   : > { %v3645_v7 = vpop.permute.xlu1 %3644 }
 0x44b   : > { %v3654_v35 = vsel %vm3650_vm9, %v3629_v6, %v3645_v7 }
 0x44c   : > { %3658 = vst [vmem:[%s379_s30 + $0x18] sm:$0xff] %v3654_v35 }
 0x44d   : > { %4515 = shalt.err (!%p4512_p3)
}
 0x44e   : > { %s4555_s25 = smov 128   ;;  %s4556_s30 = smov 8  }
 0x44f   : > { %4432 = dma.vmem_to_hbm [thread:$0]  (%p4655_p5), %s3673_s16, 512, %s3675_s22, %s3660_s21, %s4555_s25, %s4555_s25, %s4556_s30  }
 0x450 PF: > { %p4438_p4 = scmp.ge.s32.totalorder %s4550_s20, 2  ;;  %s3689_s12 = sand.u32 1, %s4538_s17  }
 0x451   : > { %s3690_s0 = scalar_lea.sflag [#allocation5], %s3689_s12 }
 0x452   : > { %p4435_p7 = pnand %p4438_p4, %p4659_p6 }
 0x454   : > { %p4436_p8 = pneg %p4435_p7 }
 0x456   : > { %4533 = dma.done.wait (%p4436_p8), %s3690_s0, 512  }
 0x457   : > { %4535 = vsyncadd (%p4436_p8), %s3690_s0, 4294966784  ;;  %p21_p9 = scmp.ge.s32.totalorder %s4642_s23, 4   ;;  %s5853_s17 = smov %s4542_s18 }
 0x458   : > { %s5854_s18 = smov %s4546_s19  ;;  %s5855_s19 = smov %s4653_s26 }
 0x459   : > { %s5856_s20 = smov %s4642_s23  ;;  %23 = sbr.rel (!%p21_p9) target bundleno = 5 (0x5), region = 459 }
 0x45e   :  { %3696 = vsyncpa [#allocation5], 1 }
 0x45f   :  { %3698 = vsyncpa [#allocation5 + $0x1], 1 }

</bundles_post_ra>
